<compile_context>
chip_gen: v6e
topology: v6e:2x2x1
jax: 0.10.0
libtpu: 0.0.40
codegen_flags: <defaults>
</compile_context>

<pallas_src>
import functools

import numpy as np
import jax
import jax.numpy as jnp
from jax import lax
from jax.experimental import pallas as pl
from jax.experimental.pallas import tpu as pltpu


# ----------------------------------------------------------------------------
# Pallas kernel: whole forward pass (LSTM recurrence, minibatch discrimination,
# decider linear + sigmoid).  Everything fits in VMEM at these sizes, so there
# is no grid (single invocation, full-array blocks).
# ----------------------------------------------------------------------------
def _disc_kernel(x_ref,                         # (S*B, E)  time-major, flattened
                 wih0_ref, whh0_ref, b0_ref,    # (E,4H) (H,4H) (S*B,4H)
                 wih1_ref, whh1_ref, b1_ref,    # (H,4H) (H,4H) (B,4H)
                 wih2_ref, whh2_ref, b2_ref,    # (H,4H) (H,4H) (B,4H)
                 t_ref, g_ref,                  # (H, O*K) bf16, (O*K, O) bf16
                 wdx_ref, wdo_ref, bd_ref,      # (H,1) (H,1) (B,1)
                 out_ref,                       # (B,1)
                 xp_ref):                       # scratch (S*B, 4H) f32
    H = whh0_ref.shape[0]
    B = b1_ref.shape[0]
    S = x_ref.shape[0] // B

    # ---- layer-0 input projection hoisted off the serial chain --------------
    # ONE (S*B, E) @ (E, 4H) matmul; layer-0 bias is pre-broadcast to (S*B,4H)
    # in the wrapper so no per-step bias handling remains for layer 0.
    xp_ref[...] = (jnp.dot(x_ref[...], wih0_ref[...],
                           preferred_element_type=jnp.float32) + b0_ref[...])

    # Loop-invariant weights / biases loaded once.
    w_hh0 = whh0_ref[...]
    w_ih1, w_hh1, b1 = wih1_ref[...], whh1_ref[...], b1_ref[...]
    w_ih2, w_hh2, b2 = wih2_ref[...], whh2_ref[...], b2_ref[...]

    def act(gates, c):
        # Gate columns are pre-ordered (i, f, o, g) by the wrapper:
        # one sigmoid dispatch over 3H lanes + one tanh dispatch over H lanes.
        sig = jax.nn.sigmoid(gates[:, :3 * H])
        i = sig[:, 0 * H:1 * H]
        f = sig[:, 1 * H:2 * H]
        o = sig[:, 2 * H:3 * H]
        g = jnp.tanh(gates[:, 3 * H:4 * H])
        c_new = f * c + i * g
        h_new = o * jnp.tanh(c_new)
        return h_new, c_new

    z = jnp.zeros((B, H), jnp.float32)

    def step(t, carry):
        h0, c0, h1, c1, h2, c2 = carry
        start = pl.multiple_of(t * B, B)
        xp_t = xp_ref[pl.ds(start, B), :]                         # (B, 4H)
        # layer 0: only the recurrent matmul is on the serial chain
        h0, c0 = act(xp_t + jnp.dot(h0, w_hh0,
                                    preferred_element_type=jnp.float32), c0)
        # layers 1-2: two dots, no concatenate
        h1, c1 = act(jnp.dot(h0, w_ih1, preferred_element_type=jnp.float32)
                     + jnp.dot(h1, w_hh1, preferred_element_type=jnp.float32)
                     + b1, c1)
        h2, c2 = act(jnp.dot(h1, w_ih2, preferred_element_type=jnp.float32)
                     + jnp.dot(h2, w_hh2, preferred_element_type=jnp.float32)
                     + b2, c2)
        return (h0, c0, h1, c1, h2, c2)

    # _, (_, c_n) = lstm(x);  x = c_n[-1]  -> cell state of the last layer.
    # S is static; fully unroll so successive cells can be interleaved.
    # (Cap the unroll at 2..4 if S or H grow enough to spill the 6 carries.)
    carry = lax.fori_loop(0, S, step, (z, z, z, z, z, z), unroll=True)
    c_last = carry[5]                                             # (B, H)

    # ---- MinibatchDiscrimination (batched, selector-matmul free) ------------
    # mats = c_last @ T.view(H, O*K)                              -> (B, O*K)
    # row r = i*B + j of the pairwise tables:
    #   a_rows[r] = mats[j]  (tile)      b_rows[r] = mats[i]  (sublane bcast)
    # norm[r, o] = sum_k |mats[j,o,k] - mats[i,o,k]| via ONE group matmul.
    mats = jnp.dot(c_last.astype(jnp.bfloat16), t_ref[...],
                   preferred_element_type=jnp.float32)            # (B, O*K)
    OK = mats.shape[1]
    a_rows = jnp.concatenate([mats] * B, axis=0)                  # (B*B, O*K)
    b_rows = jnp.concatenate(
        [jnp.broadcast_to(mats[i:i + 1, :], (B, OK)) for i in range(B)],
        axis=0)                                                   # (B*B, O*K)
    diffs = jnp.abs(a_rows - b_rows)                              # (B*B, O*K)
    norm_all = jnp.dot(diffs.astype(jnp.bfloat16), g_ref[...],
                       preferred_element_type=jnp.float32)        # (B*B, O)
    expn = jnp.exp(-norm_all)
    # o_b[j, o] = sum_i exp(-norm[i*B+j, o]) - 1   (static-slice accumulation)
    acc = expn[0:B, :]
    for i in range(1, B):
        acc = acc + expn[i * B:(i + 1) * B, :]
    o_b = acc - 1.0                                               # (B, O)

    # ---- decider: Linear(2H, 1) on concat([c_last, o_b]) + Sigmoid ----------
    logits = (jnp.dot(c_last, wdx_ref[...], preferred_element_type=jnp.float32)
              + jnp.dot(o_b, wdo_ref[...], preferred_element_type=jnp.float32)
              + bd_ref[...])
    out_ref[...] = jax.nn.sigmoid(logits)


# ----------------------------------------------------------------------------
# Compile-time constant helper (numpy -> baked into the jitted graph once)
# ----------------------------------------------------------------------------
def _group_matrix(H, K):
    # group[m, o] = 1 iff m // K == o  (segment-sum over kernel_dims); exact in bf16
    OK = H * K
    return (np.arange(OK)[:, None] // K == np.arange(H)[None, :]).astype(np.float32)


# ----------------------------------------------------------------------------
# Wrapper (glue): layout transpose, gate reorder, constants, pallas_call
# ----------------------------------------------------------------------------
@jax.jit
def discriminator_forward(x, params):
    B, S, E = x.shape
    H = params["whh0"].shape[0]
    K = params["T"].shape[1] // H

    def reorder(w):
        # PyTorch gate order (i, f, g, o) -> kernel order (i, f, o, g)
        return jnp.concatenate(
            [w[..., :2 * H], w[..., 3 * H:4 * H], w[..., 2 * H:3 * H]], axis=-1)

    # Time-major, flattened input for the hoisted layer-0 projection.
    x_flat = jnp.transpose(x, (1, 0, 2)).reshape(S * B, E)        # (S*B, E)

    wih0, whh0 = reorder(params["wih0"]), reorder(params["whh0"])
    wih1, whh1 = reorder(params["wih1"]), reorder(params["whh1"])
    wih2, whh2 = reorder(params["wih2"]), reorder(params["whh2"])

    # Biases: layer-0 bias pre-broadcast to (S*B, 4H) (folded into the hoisted
    # projection); layers 1-2 pre-broadcast to (B, 4H).
    b0 = jnp.broadcast_to(reorder(params["b0"]), (S * B, 4 * H))
    b1 = jnp.broadcast_to(reorder(params["b1"]), (B, 4 * H))
    b2 = jnp.broadcast_to(reorder(params["b2"]), (B, 4 * H))
    bd = jnp.broadcast_to(params["bd"], (B, 1))

    # bf16 MXU operands for the MBD matmuls (group matrix is 0/1 -> exact).
    t_bf16 = params["T"].astype(jnp.bfloat16)                     # (H, O*K)
    group_bf16 = jnp.asarray(_group_matrix(H, K), dtype=jnp.bfloat16)  # (O*K, O)

    inputs = [x_flat,
              wih0, whh0, b0,
              wih1, whh1, b1,
              wih2, whh2, b2,
              t_bf16, group_bf16,
              params["wdx"], params["wdo"], bd]

    return pl.pallas_call(
        _disc_kernel,
        out_shape=jax.ShapeDtypeStruct((B, 1), jnp.float32),
        in_specs=[pl.BlockSpec(memory_space=pltpu.MemorySpace.VMEM)
                  for _ in inputs],
        out_specs=pl.BlockSpec(memory_space=pltpu.MemorySpace.VMEM),
        scratch_shapes=[pltpu.VMEM((S * B, 4 * H), jnp.float32)],
        compiler_params=pltpu.CompilerParams(
            vmem_limit_bytes=32 * 1024 * 1024),
    )(*inputs)


# ----------------------------------------------------------------------------
# Deterministic parameter construction (shapes follow the PyTorch module)
# ----------------------------------------------------------------------------
def init_params(key, embed_size, hidden_size, kernel_dims=64):
    H = hidden_size
    keys = jax.random.split(key, 20)
    k = 1.0 / jnp.sqrt(jnp.float32(H))

    def u(kk, shape, bound):
        return jax.random.uniform(kk, shape, jnp.float32, -bound, bound)

    p = {}
    # LSTM layer 0 (input_size = embed_size), layers 1-2 (input_size = H).
    # Weights stored transposed: (in_dim, 4H).  b = b_ih + b_hh (always summed).
    p["wih0"] = u(keys[0], (embed_size, 4 * H), k)
    p["whh0"] = u(keys[1], (H, 4 * H), k)
    p["b0"] = (u(keys[2], (4 * H,), k) + u(keys[3], (4 * H,), k)).reshape(1, 4 * H)
    p["wih1"] = u(keys[4], (H, 4 * H), k)
    p["whh1"] = u(keys[5], (H, 4 * H), k)
    p["b1"] = (u(keys[6], (4 * H,), k) + u(keys[7], (4 * H,), k)).reshape(1, 4 * H)
    p["wih2"] = u(keys[8], (H, 4 * H), k)
    p["whh2"] = u(keys[9], (H, 4 * H), k)
    p["b2"] = (u(keys[10], (4 * H,), k) + u(keys[11], (4 * H,), k)).reshape(1, 4 * H)

    # MinibatchDiscrimination.T ~ N(0,1): (in=H, out=H, kernel_dims) flattened.
    p["T"] = jax.random.normal(keys[12], (H, H * kernel_dims), jnp.float32)

    # decider Linear(2H, 1), stored as (2H, 1) and split in halves.
    kd = 1.0 / jnp.sqrt(jnp.float32(2 * H))
    w_dec = u(keys[13], (2 * H, 1), kd)
    p["wdx"] = w_dec[:H]
    p["wdo"] = w_dec[H:]
    p["bd"] = u(keys[14], (1, 1), kd)
    return p


# ----------------------------------------------------------------------------
# Pure-JAX reference (direct transcription of the PyTorch forward)
# ----------------------------------------------------------------------------
def reference_forward(x, p):
    B, S, E = x.shape
    H = p["whh0"].shape[0]

    def cell(xt, h, c, wi, wh, b):
        gates = xt @ wi + h @ wh + b
        i = jax.nn.sigmoid(gates[:, :H])
        f = jax.nn.sigmoid(gates[:, H:2 * H])
        g = jnp.tanh(gates[:, 2 * H:3 * H])
        o = jax.nn.sigmoid(gates[:, 3 * H:])
        c = f * c + i * g
        return o * jnp.tanh(c), c

    h = [jnp.zeros((B, H), jnp.float32) for _ in range(3)]
    c = [jnp.zeros((B, H), jnp.float32) for _ in range(3)]
    for t in range(S):
        xt = x[:, t, :]
        h[0], c[0] = cell(xt, h[0], c[0], p["wih0"], p["whh0"], p["b0"])
        h[1], c[1] = cell(h[0], h[1], c[1], p["wih1"], p["whh1"], p["b1"])
        h[2], c[2] = cell(h[1], h[2], c[2], p["wih2"], p["whh2"], p["b2"])
    xc = c[2]

    K = p["T"].shape[1] // H
    mats = (xc @ p["T"]).reshape(B, H, K)
    norm = jnp.abs(mats[None, :, :, :] - mats[:, None, :, :]).sum(3)
    o_b = jnp.exp(-norm).sum(0) - 1.0
    feat = jnp.concatenate([xc, o_b], axis=1)
    w = jnp.concatenate([p["wdx"], p["wdo"]], axis=0)
    return jax.nn.sigmoid(feat @ w + p["bd"])


if __name__ == "__main__":
    B, S, E, H = 4, 8, 16, 32     # batch, seq, embed_size, hidden_size
    key = jax.random.PRNGKey(0)
    pkey, xkey = jax.random.split(key)
    params = init_params(pkey, E, H)
    x = jax.random.normal(xkey, (B, S, E), jnp.float32)

    out = discriminator_forward(x, params)
    jax.block_until_ready(out)

    ref = reference_forward(x, params)
    assert out.shape == (B, 1), out.shape
    assert jnp.allclose(out, ref, atol=1e-3, rtol=1e-3), (out, ref)
    print("KERNEL_OK")
</pallas_src>

<mosaic_0001>
module attributes {stable_mosaic.version = 11 : i64} {
  func.func @_disc_kernel(%arg0: memref<32x16xf32, #tpu.memory_space<vmem>>, %arg1: memref<16x128xf32, #tpu.memory_space<vmem>>, %arg2: memref<32x128xf32, #tpu.memory_space<vmem>>, %arg3: memref<32x128xf32, #tpu.memory_space<vmem>>, %arg4: memref<32x128xf32, #tpu.memory_space<vmem>>, %arg5: memref<32x128xf32, #tpu.memory_space<vmem>>, %arg6: memref<4x128xf32, #tpu.memory_space<vmem>>, %arg7: memref<32x128xf32, #tpu.memory_space<vmem>>, %arg8: memref<32x128xf32, #tpu.memory_space<vmem>>, %arg9: memref<4x128xf32, #tpu.memory_space<vmem>>, %arg10: memref<32x2048xbf16, #tpu.memory_space<vmem>>, %arg11: memref<2048x32xbf16, #tpu.memory_space<vmem>>, %arg12: memref<32x1xf32, #tpu.memory_space<vmem>>, %arg13: memref<32x1xf32, #tpu.memory_space<vmem>>, %arg14: memref<4x1xf32, #tpu.memory_space<vmem>>, %arg15: memref<4x1xf32, #tpu.memory_space<vmem>>, %arg16: memref<32x128xf32, #tpu.memory_space<vmem>>) attributes {dimension_semantics = [], scalar_prefetch = 0 : i64, scratch_operands = 1 : i64, tpu.core_type = #tpu.core_type<tc>} {
    %c0 = arith.constant 0 : index
    %c0_0 = arith.constant 0 : index
    %0 = vector.load %arg0[%c0, %c0_0] : memref<32x16xf32, #tpu.memory_space<vmem>>, vector<32x16xf32>
    %c0_1 = arith.constant 0 : index
    %c0_2 = arith.constant 0 : index
    %1 = vector.load %arg1[%c0_1, %c0_2] : memref<16x128xf32, #tpu.memory_space<vmem>>, vector<16x128xf32>
    %cst = arith.constant dense<0.000000e+00> : vector<32x128xf32>
    %2 = tpu.matmul %0, %1, %cst {dimension_numbers = #tpu.dot_dimension_numbers<[1], [0], [0], [1], [0, 0, 1, 1], [], []>} : vector<32x16xf32>, vector<16x128xf32>, vector<32x128xf32> -> vector<32x128xf32>
    %c0_3 = arith.constant 0 : index
    %c0_4 = arith.constant 0 : index
    %3 = vector.load %arg3[%c0_3, %c0_4] : memref<32x128xf32, #tpu.memory_space<vmem>>, vector<32x128xf32>
    %4 = arith.addf %2, %3 : vector<32x128xf32>
    %c0_5 = arith.constant 0 : index
    %c0_6 = arith.constant 0 : index
    %5 = vector.load %arg16[%c0_5, %c0_6] : memref<32x128xf32, #tpu.memory_space<vmem>>, vector<32x128xf32>
    tpu.vector_store %arg16[%c0_5, %c0_6], %4 {strides = array<i32>} : memref<32x128xf32, #tpu.memory_space<vmem>>, vector<32x128xf32>,
    %c0_7 = arith.constant 0 : index
    %c0_8 = arith.constant 0 : index
    %6 = vector.load %arg2[%c0_7, %c0_8] : memref<32x128xf32, #tpu.memory_space<vmem>>, vector<32x128xf32>
    %c0_9 = arith.constant 0 : index
    %c0_10 = arith.constant 0 : index
    %7 = vector.load %arg4[%c0_9, %c0_10] : memref<32x128xf32, #tpu.memory_space<vmem>>, vector<32x128xf32>
    %c0_11 = arith.constant 0 : index
    %c0_12 = arith.constant 0 : index
    %8 = vector.load %arg5[%c0_11, %c0_12] : memref<32x128xf32, #tpu.memory_space<vmem>>, vector<32x128xf32>
    %c0_13 = arith.constant 0 : index
    %c0_14 = arith.constant 0 : index
    %9 = vector.load %arg6[%c0_13, %c0_14] : memref<4x128xf32, #tpu.memory_space<vmem>>, vector<4x128xf32>
    %c0_15 = arith.constant 0 : index
    %c0_16 = arith.constant 0 : index
    %10 = vector.load %arg7[%c0_15, %c0_16] : memref<32x128xf32, #tpu.memory_space<vmem>>, vector<32x128xf32>
    %c0_17 = arith.constant 0 : index
    %c0_18 = arith.constant 0 : index
    %11 = vector.load %arg8[%c0_17, %c0_18] : memref<32x128xf32, #tpu.memory_space<vmem>>, vector<32x128xf32>
    %c0_19 = arith.constant 0 : index
    %c0_20 = arith.constant 0 : index
    %12 = vector.load %arg9[%c0_19, %c0_20] : memref<4x128xf32, #tpu.memory_space<vmem>>, vector<4x128xf32>
    %cst_21 = arith.constant 0.000000e+00 : f32
    %13 = vector.broadcast %cst_21 : f32 to vector<4x32xf32>
    %c0_i32 = arith.constant 0 : i32
    %c4_i32 = arith.constant 4 : i32
    %14 = arith.muli %c0_i32, %c4_i32 : i32
    %15 = tpu.assume_multiple %14, 4 : i32
    %16 = arith.index_cast %15 : i32 to index
    %c0_22 = arith.constant 0 : index
    %17 = vector.load %arg16[%16, %c0_22] : memref<32x128xf32, #tpu.memory_space<vmem>>, vector<4x128xf32>
    %cst_23 = arith.constant dense<0.000000e+00> : vector<4x128xf32>
    %18 = tpu.matmul %13, %6, %cst_23 {dimension_numbers = #tpu.dot_dimension_numbers<[1], [0], [0], [1], [0, 0, 1, 1], [], []>} : vector<4x32xf32>, vector<32x128xf32>, vector<4x128xf32> -> vector<4x128xf32>
    %19 = arith.addf %17, %18 : vector<4x128xf32>
    %20 = vector.extract_strided_slice %19 {offsets = [0, 0], sizes = [4, 96], strides = [1, 1]} : vector<4x128xf32> to vector<4x96xf32>
    %21 = arith.negf %20 : vector<4x96xf32>
    %22 = math.exp %21 : vector<4x96xf32>
    %cst_24 = arith.constant 1.000000e+00 : f32
    %23 = vector.broadcast %cst_24 : f32 to vector<4x96xf32>
    %24 = arith.addf %23, %22 : vector<4x96xf32>
    %25 = arith.divf %23, %24 : vector<4x96xf32>
    %26 = vector.extract_strided_slice %25 {offsets = [0, 0], sizes = [4, 32], strides = [1, 1]} : vector<4x96xf32> to vector<4x32xf32>
    %27 = vector.extract_strided_slice %25 {offsets = [0, 32], sizes = [4, 32], strides = [1, 1]} : vector<4x96xf32> to vector<4x32xf32>
    %28 = vector.extract_strided_slice %25 {offsets = [0, 64], sizes = [4, 32], strides = [1, 1]} : vector<4x96xf32> to vector<4x32xf32>
    %29 = vector.extract_strided_slice %19 {offsets = [0, 96], sizes = [4, 32], strides = [1, 1]} : vector<4x128xf32> to vector<4x32xf32>
    %30 = math.tanh %29 : vector<4x32xf32>
    %31 = arith.mulf %27, %13 : vector<4x32xf32>
    %32 = arith.mulf %26, %30 : vector<4x32xf32>
    %33 = arith.addf %31, %32 : vector<4x32xf32>
    %34 = math.tanh %33 : vector<4x32xf32>
    %35 = arith.mulf %28, %34 : vector<4x32xf32>
    %cst_25 = arith.constant dense<0.000000e+00> : vector<4x128xf32>
    %36 = tpu.matmul %35, %7, %cst_25 {dimension_numbers = #tpu.dot_dimension_numbers<[1], [0], [0], [1], [0, 0, 1, 1], [], []>} : vector<4x32xf32>, vector<32x128xf32>, vector<4x128xf32> -> vector<4x128xf32>
    %cst_26 = arith.constant dense<0.000000e+00> : vector<4x128xf32>
    %37 = tpu.matmul %13, %8, %cst_26 {dimension_numbers = #tpu.dot_dimension_numbers<[1], [0], [0], [1], [0, 0, 1, 1], [], []>} : vector<4x32xf32>, vector<32x128xf32>, vector<4x128xf32> -> vector<4x128xf32>
    %38 = arith.addf %36, %37 : vector<4x128xf32>
    %39 = arith.addf %38, %9 : vector<4x128xf32>
    %40 = vector.extract_strided_slice %39 {offsets = [0, 0], sizes = [4, 96], strides = [1, 1]} : vector<4x128xf32> to vector<4x96xf32>
    %41 = arith.negf %40 : vector<4x96xf32>
    %42 = math.exp %41 : vector<4x96xf32>
    %cst_27 = arith.constant 1.000000e+00 : f32
    %43 = vector.broadcast %cst_27 : f32 to vector<4x96xf32>
    %44 = arith.addf %43, %42 : vector<4x96xf32>
    %45 = arith.divf %43, %44 : vector<4x96xf32>
    %46 = vector.extract_strided_slice %45 {offsets = [0, 0], sizes = [4, 32], strides = [1, 1]} : vector<4x96xf32> to vector<4x32xf32>
    %47 = vector.extract_strided_slice %45 {offsets = [0, 32], sizes = [4, 32], strides = [1, 1]} : vector<4x96xf32> to vector<4x32xf32>
    %48 = vector.extract_strided_slice %45 {offsets = [0, 64], sizes = [4, 32], strides = [1, 1]} : vector<4x96xf32> to vector<4x32xf32>
    %49 = vector.extract_strided_slice %39 {offsets = [0, 96], sizes = [4, 32], strides = [1, 1]} : vector<4x128xf32> to vector<4x32xf32>
    %50 = math.tanh %49 : vector<4x32xf32>
    %51 = arith.mulf %47, %13 : vector<4x32xf32>
    %52 = arith.mulf %46, %50 : vector<4x32xf32>
    %53 = arith.addf %51, %52 : vector<4x32xf32>
    %54 = math.tanh %53 : vector<4x32xf32>
    %55 = arith.mulf %48, %54 : vector<4x32xf32>
    %cst_28 = arith.constant dense<0.000000e+00> : vector<4x128xf32>
    %56 = tpu.matmul %55, %10, %cst_28 {dimension_numbers = #tpu.dot_dimension_numbers<[1], [0], [0], [1], [0, 0, 1, 1], [], []>} : vector<4x32xf32>, vector<32x128xf32>, vector<4x128xf32> -> vector<4x128xf32>
    %cst_29 = arith.constant dense<0.000000e+00> : vector<4x128xf32>
    %57 = tpu.matmul %13, %11, %cst_29 {dimension_numbers = #tpu.dot_dimension_numbers<[1], [0], [0], [1], [0, 0, 1, 1], [], []>} : vector<4x32xf32>, vector<32x128xf32>, vector<4x128xf32> -> vector<4x128xf32>
    %58 = arith.addf %56, %57 : vector<4x128xf32>
    %59 = arith.addf %58, %12 : vector<4x128xf32>
    %60 = vector.extract_strided_slice %59 {offsets = [0, 0], sizes = [4, 96], strides = [1, 1]} : vector<4x128xf32> to vector<4x96xf32>
    %61 = arith.negf %60 : vector<4x96xf32>
    %62 = math.exp %61 : vector<4x96xf32>
    %cst_30 = arith.constant 1.000000e+00 : f32
    %63 = vector.broadcast %cst_30 : f32 to vector<4x96xf32>
    %64 = arith.addf %63, %62 : vector<4x96xf32>
    %65 = arith.divf %63, %64 : vector<4x96xf32>
    %66 = vector.extract_strided_slice %65 {offsets = [0, 0], sizes = [4, 32], strides = [1, 1]} : vector<4x96xf32> to vector<4x32xf32>
    %67 = vector.extract_strided_slice %65 {offsets = [0, 32], sizes = [4, 32], strides = [1, 1]} : vector<4x96xf32> to vector<4x32xf32>
    %68 = vector.extract_strided_slice %65 {offsets = [0, 64], sizes = [4, 32], strides = [1, 1]} : vector<4x96xf32> to vector<4x32xf32>
    %69 = vector.extract_strided_slice %59 {offsets = [0, 96], sizes = [4, 32], strides = [1, 1]} : vector<4x128xf32> to vector<4x32xf32>
    %70 = math.tanh %69 : vector<4x32xf32>
    %71 = arith.mulf %67, %13 : vector<4x32xf32>
    %72 = arith.mulf %66, %70 : vector<4x32xf32>
    %73 = arith.addf %71, %72 : vector<4x32xf32>
    %74 = math.tanh %73 : vector<4x32xf32>
    %75 = arith.mulf %68, %74 : vector<4x32xf32>
    %c1_i32 = arith.constant 1 : i32
    %c4_i32_31 = arith.constant 4 : i32
    %76 = arith.muli %c1_i32, %c4_i32_31 : i32
    %77 = tpu.assume_multiple %76, 4 : i32
    %78 = arith.index_cast %77 : i32 to index
    %c0_32 = arith.constant 0 : index
    %79 = vector.load %arg16[%78, %c0_32] : memref<32x128xf32, #tpu.memory_space<vmem>>, vector<4x128xf32>
    %cst_33 = arith.constant dense<0.000000e+00> : vector<4x128xf32>
    %80 = tpu.matmul %35, %6, %cst_33 {dimension_numbers = #tpu.dot_dimension_numbers<[1], [0], [0], [1], [0, 0, 1, 1], [], []>} : vector<4x32xf32>, vector<32x128xf32>, vector<4x128xf32> -> vector<4x128xf32>
    %81 = arith.addf %79, %80 : vector<4x128xf32>
    %82 = vector.extract_strided_slice %81 {offsets = [0, 0], sizes = [4, 96], strides = [1, 1]} : vector<4x128xf32> to vector<4x96xf32>
    %83 = arith.negf %82 : vector<4x96xf32>
    %84 = math.exp %83 : vector<4x96xf32>
    %cst_34 = arith.constant 1.000000e+00 : f32
    %85 = vector.broadcast %cst_34 : f32 to vector<4x96xf32>
    %86 = arith.addf %85, %84 : vector<4x96xf32>
    %87 = arith.divf %85, %86 : vector<4x96xf32>
    %88 = vector.extract_strided_slice %87 {offsets = [0, 0], sizes = [4, 32], strides = [1, 1]} : vector<4x96xf32> to vector<4x32xf32>
    %89 = vector.extract_strided_slice %87 {offsets = [0, 32], sizes = [4, 32], strides = [1, 1]} : vector<4x96xf32> to vector<4x32xf32>
    %90 = vector.extract_strided_slice %87 {offsets = [0, 64], sizes = [4, 32], strides = [1, 1]} : vector<4x96xf32> to vector<4x32xf32>
    %91 = vector.extract_strided_slice %81 {offsets = [0, 96], sizes = [4, 32], strides = [1, 1]} : vector<4x128xf32> to vector<4x32xf32>
    %92 = math.tanh %91 : vector<4x32xf32>
    %93 = arith.mulf %89, %33 : vector<4x32xf32>
    %94 = arith.mulf %88, %92 : vector<4x32xf32>
    %95 = arith.addf %93, %94 : vector<4x32xf32>
    %96 = math.tanh %95 : vector<4x32xf32>
    %97 = arith.mulf %90, %96 : vector<4x32xf32>
    %cst_35 = arith.constant dense<0.000000e+00> : vector<4x128xf32>
    %98 = tpu.matmul %97, %7, %cst_35 {dimension_numbers = #tpu.dot_dimension_numbers<[1], [0], [0], [1], [0, 0, 1, 1], [], []>} : vector<4x32xf32>, vector<32x128xf32>, vector<4x128xf32> -> vector<4x128xf32>
    %cst_36 = arith.constant dense<0.000000e+00> : vector<4x128xf32>
    %99 = tpu.matmul %55, %8, %cst_36 {dimension_numbers = #tpu.dot_dimension_numbers<[1], [0], [0], [1], [0, 0, 1, 1], [], []>} : vector<4x32xf32>, vector<32x128xf32>, vector<4x128xf32> -> vector<4x128xf32>
    %100 = arith.addf %98, %99 : vector<4x128xf32>
    %101 = arith.addf %100, %9 : vector<4x128xf32>
    %102 = vector.extract_strided_slice %101 {offsets = [0, 0], sizes = [4, 96], strides = [1, 1]} : vector<4x128xf32> to vector<4x96xf32>
    %103 = arith.negf %102 : vector<4x96xf32>
    %104 = math.exp %103 : vector<4x96xf32>
    %cst_37 = arith.constant 1.000000e+00 : f32
    %105 = vector.broadcast %cst_37 : f32 to vector<4x96xf32>
    %106 = arith.addf %105, %104 : vector<4x96xf32>
    %107 = arith.divf %105, %106 : vector<4x96xf32>
    %108 = vector.extract_strided_slice %107 {offsets = [0, 0], sizes = [4, 32], strides = [1, 1]} : vector<4x96xf32> to vector<4x32xf32>
    %109 = vector.extract_strided_slice %107 {offsets = [0, 32], sizes = [4, 32], strides = [1, 1]} : vector<4x96xf32> to vector<4x32xf32>
    %110 = vector.extract_strided_slice %107 {offsets = [0, 64], sizes = [4, 32], strides = [1, 1]} : vector<4x96xf32> to vector<4x32xf32>
    %111 = vector.extract_strided_slice %101 {offsets = [0, 96], sizes = [4, 32], strides = [1, 1]} : vector<4x128xf32> to vector<4x32xf32>
    %112 = math.tanh %111 : vector<4x32xf32>
    %113 = arith.mulf %109, %53 : vector<4x32xf32>
    %114 = arith.mulf %108, %112 : vector<4x32xf32>
    %115 = arith.addf %113, %114 : vector<4x32xf32>
    %116 = math.tanh %115 : vector<4x32xf32>
    %117 = arith.mulf %110, %116 : vector<4x32xf32>
    %cst_38 = arith.constant dense<0.000000e+00> : vector<4x128xf32>
    %118 = tpu.matmul %117, %10, %cst_38 {dimension_numbers = #tpu.dot_dimension_numbers<[1], [0], [0], [1], [0, 0, 1, 1], [], []>} : vector<4x32xf32>, vector<32x128xf32>, vector<4x128xf32> -> vector<4x128xf32>
    %cst_39 = arith.constant dense<0.000000e+00> : vector<4x128xf32>
    %119 = tpu.matmul %75, %11, %cst_39 {dimension_numbers = #tpu.dot_dimension_numbers<[1], [0], [0], [1], [0, 0, 1, 1], [], []>} : vector<4x32xf32>, vector<32x128xf32>, vector<4x128xf32> -> vector<4x128xf32>
    %120 = arith.addf %118, %119 : vector<4x128xf32>
    %121 = arith.addf %120, %12 : vector<4x128xf32>
    %122 = vector.extract_strided_slice %121 {offsets = [0, 0], sizes = [4, 96], strides = [1, 1]} : vector<4x128xf32> to vector<4x96xf32>
    %123 = arith.negf %122 : vector<4x96xf32>
    %124 = math.exp %123 : vector<4x96xf32>
    %cst_40 = arith.constant 1.000000e+00 : f32
    %125 = vector.broadcast %cst_40 : f32 to vector<4x96xf32>
    %126 = arith.addf %125, %124 : vector<4x96xf32>
    %127 = arith.divf %125, %126 : vector<4x96xf32>
    %128 = vector.extract_strided_slice %127 {offsets = [0, 0], sizes = [4, 32], strides = [1, 1]} : vector<4x96xf32> to vector<4x32xf32>
    %129 = vector.extract_strided_slice %127 {offsets = [0, 32], sizes = [4, 32], strides = [1, 1]} : vector<4x96xf32> to vector<4x32xf32>
    %130 = vector.extract_strided_slice %127 {offsets = [0, 64], sizes = [4, 32], strides = [1, 1]} : vector<4x96xf32> to vector<4x32xf32>
    %131 = vector.extract_strided_slice %121 {offsets = [0, 96], sizes = [4, 32], strides = [1, 1]} : vector<4x128xf32> to vector<4x32xf32>
    %132 = math.tanh %131 : vector<4x32xf32>
    %133 = arith.mulf %129, %73 : vector<4x32xf32>
    %134 = arith.mulf %128, %132 : vector<4x32xf32>
    %135 = arith.addf %133, %134 : vector<4x32xf32>
    %136 = math.tanh %135 : vector<4x32xf32>
    %137 = arith.mulf %130, %136 : vector<4x32xf32>
    %c2_i32 = arith.constant 2 : i32
    %c4_i32_41 = arith.constant 4 : i32
    %138 = arith.muli %c2_i32, %c4_i32_41 : i32
    %139 = tpu.assume_multiple %138, 4 : i32
    %140 = arith.index_cast %139 : i32 to index
    %c0_42 = arith.constant 0 : index
    %141 = vector.load %arg16[%140, %c0_42] : memref<32x128xf32, #tpu.memory_space<vmem>>, vector<4x128xf32>
    %cst_43 = arith.constant dense<0.000000e+00> : vector<4x128xf32>
    %142 = tpu.matmul %97, %6, %cst_43 {dimension_numbers = #tpu.dot_dimension_numbers<[1], [0], [0], [1], [0, 0, 1, 1], [], []>} : vector<4x32xf32>, vector<32x128xf32>, vector<4x128xf32> -> vector<4x128xf32>
    %143 = arith.addf %141, %142 : vector<4x128xf32>
    %144 = vector.extract_strided_slice %143 {offsets = [0, 0], sizes = [4, 96], strides = [1, 1]} : vector<4x128xf32> to vector<4x96xf32>
    %145 = arith.negf %144 : vector<4x96xf32>
    %146 = math.exp %145 : vector<4x96xf32>
    %cst_44 = arith.constant 1.000000e+00 : f32
    %147 = vector.broadcast %cst_44 : f32 to vector<4x96xf32>
    %148 = arith.addf %147, %146 : vector<4x96xf32>
    %149 = arith.divf %147, %148 : vector<4x96xf32>
    %150 = vector.extract_strided_slice %149 {offsets = [0, 0], sizes = [4, 32], strides = [1, 1]} : vector<4x96xf32> to vector<4x32xf32>
    %151 = vector.extract_strided_slice %149 {offsets = [0, 32], sizes = [4, 32], strides = [1, 1]} : vector<4x96xf32> to vector<4x32xf32>
    %152 = vector.extract_strided_slice %149 {offsets = [0, 64], sizes = [4, 32], strides = [1, 1]} : vector<4x96xf32> to vector<4x32xf32>
    %153 = vector.extract_strided_slice %143 {offsets = [0, 96], sizes = [4, 32], strides = [1, 1]} : vector<4x128xf32> to vector<4x32xf32>
    %154 = math.tanh %153 : vector<4x32xf32>
    %155 = arith.mulf %151, %95 : vector<4x32xf32>
    %156 = arith.mulf %150, %154 : vector<4x32xf32>
    %157 = arith.addf %155, %156 : vector<4x32xf32>
    %158 = math.tanh %157 : vector<4x32xf32>
    %159 = arith.mulf %152, %158 : vector<4x32xf32>
    %cst_45 = arith.constant dense<0.000000e+00> : vector<4x128xf32>
    %160 = tpu.matmul %159, %7, %cst_45 {dimension_numbers = #tpu.dot_dimension_numbers<[1], [0], [0], [1], [0, 0, 1, 1], [], []>} : vector<4x32xf32>, vector<32x128xf32>, vector<4x128xf32> -> vector<4x128xf32>
    %cst_46 = arith.constant dense<0.000000e+00> : vector<4x128xf32>
    %161 = tpu.matmul %117, %8, %cst_46 {dimension_numbers = #tpu.dot_dimension_numbers<[1], [0], [0], [1], [0, 0, 1, 1], [], []>} : vector<4x32xf32>, vector<32x128xf32>, vector<4x128xf32> -> vector<4x128xf32>
    %162 = arith.addf %160, %161 : vector<4x128xf32>
    %163 = arith.addf %162, %9 : vector<4x128xf32>
    %164 = vector.extract_strided_slice %163 {offsets = [0, 0], sizes = [4, 96], strides = [1, 1]} : vector<4x128xf32> to vector<4x96xf32>
    %165 = arith.negf %164 : vector<4x96xf32>
    %166 = math.exp %165 : vector<4x96xf32>
    %cst_47 = arith.constant 1.000000e+00 : f32
    %167 = vector.broadcast %cst_47 : f32 to vector<4x96xf32>
    %168 = arith.addf %167, %166 : vector<4x96xf32>
    %169 = arith.divf %167, %168 : vector<4x96xf32>
    %170 = vector.extract_strided_slice %169 {offsets = [0, 0], sizes = [4, 32], strides = [1, 1]} : vector<4x96xf32> to vector<4x32xf32>
    %171 = vector.extract_strided_slice %169 {offsets = [0, 32], sizes = [4, 32], strides = [1, 1]} : vector<4x96xf32> to vector<4x32xf32>
    %172 = vector.extract_strided_slice %169 {offsets = [0, 64], sizes = [4, 32], strides = [1, 1]} : vector<4x96xf32> to vector<4x32xf32>
    %173 = vector.extract_strided_slice %163 {offsets = [0, 96], sizes = [4, 32], strides = [1, 1]} : vector<4x128xf32> to vector<4x32xf32>
    %174 = math.tanh %173 : vector<4x32xf32>
    %175 = arith.mulf %171, %115 : vector<4x32xf32>
    %176 = arith.mulf %170, %174 : vector<4x32xf32>
    %177 = arith.addf %175, %176 : vector<4x32xf32>
    %178 = math.tanh %177 : vector<4x32xf32>
    %179 = arith.mulf %172, %178 : vector<4x32xf32>
    %cst_48 = arith.constant dense<0.000000e+00> : vector<4x128xf32>
    %180 = tpu.matmul %179, %10, %cst_48 {dimension_numbers = #tpu.dot_dimension_numbers<[1], [0], [0], [1], [0, 0, 1, 1], [], []>} : vector<4x32xf32>, vector<32x128xf32>, vector<4x128xf32> -> vector<4x128xf32>
    %cst_49 = arith.constant dense<0.000000e+00> : vector<4x128xf32>
    %181 = tpu.matmul %137, %11, %cst_49 {dimension_numbers = #tpu.dot_dimension_numbers<[1], [0], [0], [1], [0, 0, 1, 1], [], []>} : vector<4x32xf32>, vector<32x128xf32>, vector<4x128xf32> -> vector<4x128xf32>
    %182 = arith.addf %180, %181 : vector<4x128xf32>
    %183 = arith.addf %182, %12 : vector<4x128xf32>
    %184 = vector.extract_strided_slice %183 {offsets = [0, 0], sizes = [4, 96], strides = [1, 1]} : vector<4x128xf32> to vector<4x96xf32>
    %185 = arith.negf %184 : vector<4x96xf32>
    %186 = math.exp %185 : vector<4x96xf32>
    %cst_50 = arith.constant 1.000000e+00 : f32
    %187 = vector.broadcast %cst_50 : f32 to vector<4x96xf32>
    %188 = arith.addf %187, %186 : vector<4x96xf32>
    %189 = arith.divf %187, %188 : vector<4x96xf32>
    %190 = vector.extract_strided_slice %189 {offsets = [0, 0], sizes = [4, 32], strides = [1, 1]} : vector<4x96xf32> to vector<4x32xf32>
    %191 = vector.extract_strided_slice %189 {offsets = [0, 32], sizes = [4, 32], strides = [1, 1]} : vector<4x96xf32> to vector<4x32xf32>
    %192 = vector.extract_strided_slice %189 {offsets = [0, 64], sizes = [4, 32], strides = [1, 1]} : vector<4x96xf32> to vector<4x32xf32>
    %193 = vector.extract_strided_slice %183 {offsets = [0, 96], sizes = [4, 32], strides = [1, 1]} : vector<4x128xf32> to vector<4x32xf32>
    %194 = math.tanh %193 : vector<4x32xf32>
    %195 = arith.mulf %191, %135 : vector<4x32xf32>
    %196 = arith.mulf %190, %194 : vector<4x32xf32>
    %197 = arith.addf %195, %196 : vector<4x32xf32>
    %198 = math.tanh %197 : vector<4x32xf32>
    %199 = arith.mulf %192, %198 : vector<4x32xf32>
    %c3_i32 = arith.constant 3 : i32
    %c4_i32_51 = arith.constant 4 : i32
    %200 = arith.muli %c3_i32, %c4_i32_51 : i32
    %201 = tpu.assume_multiple %200, 4 : i32
    %202 = arith.index_cast %201 : i32 to index
    %c0_52 = arith.constant 0 : index
    %203 = vector.load %arg16[%202, %c0_52] : memref<32x128xf32, #tpu.memory_space<vmem>>, vector<4x128xf32>
    %cst_53 = arith.constant dense<0.000000e+00> : vector<4x128xf32>
    %204 = tpu.matmul %159, %6, %cst_53 {dimension_numbers = #tpu.dot_dimension_numbers<[1], [0], [0], [1], [0, 0, 1, 1], [], []>} : vector<4x32xf32>, vector<32x128xf32>, vector<4x128xf32> -> vector<4x128xf32>
    %205 = arith.addf %203, %204 : vector<4x128xf32>
    %206 = vector.extract_strided_slice %205 {offsets = [0, 0], sizes = [4, 96], strides = [1, 1]} : vector<4x128xf32> to vector<4x96xf32>
    %207 = arith.negf %206 : vector<4x96xf32>
    %208 = math.exp %207 : vector<4x96xf32>
    %cst_54 = arith.constant 1.000000e+00 : f32
    %209 = vector.broadcast %cst_54 : f32 to vector<4x96xf32>
    %210 = arith.addf %209, %208 : vector<4x96xf32>
    %211 = arith.divf %209, %210 : vector<4x96xf32>
    %212 = vector.extract_strided_slice %211 {offsets = [0, 0], sizes = [4, 32], strides = [1, 1]} : vector<4x96xf32> to vector<4x32xf32>
    %213 = vector.extract_strided_slice %211 {offsets = [0, 32], sizes = [4, 32], strides = [1, 1]} : vector<4x96xf32> to vector<4x32xf32>
    %214 = vector.extract_strided_slice %211 {offsets = [0, 64], sizes = [4, 32], strides = [1, 1]} : vector<4x96xf32> to vector<4x32xf32>
    %215 = vector.extract_strided_slice %205 {offsets = [0, 96], sizes = [4, 32], strides = [1, 1]} : vector<4x128xf32> to vector<4x32xf32>
    %216 = math.tanh %215 : vector<4x32xf32>
    %217 = arith.mulf %213, %157 : vector<4x32xf32>
    %218 = arith.mulf %212, %216 : vector<4x32xf32>
    %219 = arith.addf %217, %218 : vector<4x32xf32>
    %220 = math.tanh %219 : vector<4x32xf32>
    %221 = arith.mulf %214, %220 : vector<4x32xf32>
    %cst_55 = arith.constant dense<0.000000e+00> : vector<4x128xf32>
    %222 = tpu.matmul %221, %7, %cst_55 {dimension_numbers = #tpu.dot_dimension_numbers<[1], [0], [0], [1], [0, 0, 1, 1], [], []>} : vector<4x32xf32>, vector<32x128xf32>, vector<4x128xf32> -> vector<4x128xf32>
    %cst_56 = arith.constant dense<0.000000e+00> : vector<4x128xf32>
    %223 = tpu.matmul %179, %8, %cst_56 {dimension_numbers = #tpu.dot_dimension_numbers<[1], [0], [0], [1], [0, 0, 1, 1], [], []>} : vector<4x32xf32>, vector<32x128xf32>, vector<4x128xf32> -> vector<4x128xf32>
    %224 = arith.addf %222, %223 : vector<4x128xf32>
    %225 = arith.addf %224, %9 : vector<4x128xf32>
    %226 = vector.extract_strided_slice %225 {offsets = [0, 0], sizes = [4, 96], strides = [1, 1]} : vector<4x128xf32> to vector<4x96xf32>
    %227 = arith.negf %226 : vector<4x96xf32>
    %228 = math.exp %227 : vector<4x96xf32>
    %cst_57 = arith.constant 1.000000e+00 : f32
    %229 = vector.broadcast %cst_57 : f32 to vector<4x96xf32>
    %230 = arith.addf %229, %228 : vector<4x96xf32>
    %231 = arith.divf %229, %230 : vector<4x96xf32>
    %232 = vector.extract_strided_slice %231 {offsets = [0, 0], sizes = [4, 32], strides = [1, 1]} : vector<4x96xf32> to vector<4x32xf32>
    %233 = vector.extract_strided_slice %231 {offsets = [0, 32], sizes = [4, 32], strides = [1, 1]} : vector<4x96xf32> to vector<4x32xf32>
    %234 = vector.extract_strided_slice %231 {offsets = [0, 64], sizes = [4, 32], strides = [1, 1]} : vector<4x96xf32> to vector<4x32xf32>
    %235 = vector.extract_strided_slice %225 {offsets = [0, 96], sizes = [4, 32], strides = [1, 1]} : vector<4x128xf32> to vector<4x32xf32>
    %236 = math.tanh %235 : vector<4x32xf32>
    %237 = arith.mulf %233, %177 : vector<4x32xf32>
    %238 = arith.mulf %232, %236 : vector<4x32xf32>
    %239 = arith.addf %237, %238 : vector<4x32xf32>
    %240 = math.tanh %239 : vector<4x32xf32>
    %241 = arith.mulf %234, %240 : vector<4x32xf32>
    %cst_58 = arith.constant dense<0.000000e+00> : vector<4x128xf32>
    %242 = tpu.matmul %241, %10, %cst_58 {dimension_numbers = #tpu.dot_dimension_numbers<[1], [0], [0], [1], [0, 0, 1, 1], [], []>} : vector<4x32xf32>, vector<32x128xf32>, vector<4x128xf32> -> vector<4x128xf32>
    %cst_59 = arith.constant dense<0.000000e+00> : vector<4x128xf32>
    %243 = tpu.matmul %199, %11, %cst_59 {dimension_numbers = #tpu.dot_dimension_numbers<[1], [0], [0], [1], [0, 0, 1, 1], [], []>} : vector<4x32xf32>, vector<32x128xf32>, vector<4x128xf32> -> vector<4x128xf32>
    %244 = arith.addf %242, %243 : vector<4x128xf32>
    %245 = arith.addf %244, %12 : vector<4x128xf32>
    %246 = vector.extract_strided_slice %245 {offsets = [0, 0], sizes = [4, 96], strides = [1, 1]} : vector<4x128xf32> to vector<4x96xf32>
    %247 = arith.negf %246 : vector<4x96xf32>
    %248 = math.exp %247 : vector<4x96xf32>
    %cst_60 = arith.constant 1.000000e+00 : f32
    %249 = vector.broadcast %cst_60 : f32 to vector<4x96xf32>
    %250 = arith.addf %249, %248 : vector<4x96xf32>
    %251 = arith.divf %249, %250 : vector<4x96xf32>
    %252 = vector.extract_strided_slice %251 {offsets = [0, 0], sizes = [4, 32], strides = [1, 1]} : vector<4x96xf32> to vector<4x32xf32>
    %253 = vector.extract_strided_slice %251 {offsets = [0, 32], sizes = [4, 32], strides = [1, 1]} : vector<4x96xf32> to vector<4x32xf32>
    %254 = vector.extract_strided_slice %251 {offsets = [0, 64], sizes = [4, 32], strides = [1, 1]} : vector<4x96xf32> to vector<4x32xf32>
    %255 = vector.extract_strided_slice %245 {offsets = [0, 96], sizes = [4, 32], strides = [1, 1]} : vector<4x128xf32> to vector<4x32xf32>
    %256 = math.tanh %255 : vector<4x32xf32>
    %257 = arith.mulf %253, %197 : vector<4x32xf32>
    %258 = arith.mulf %252, %256 : vector<4x32xf32>
    %259 = arith.addf %257, %258 : vector<4x32xf32>
    %260 = math.tanh %259 : vector<4x32xf32>
    %261 = arith.mulf %254, %260 : vector<4x32xf32>
    %c4_i32_61 = arith.constant 4 : i32
    %c4_i32_62 = arith.constant 4 : i32
    %262 = arith.muli %c4_i32_61, %c4_i32_62 : i32
    %263 = tpu.assume_multiple %262, 4 : i32
    %264 = arith.index_cast %263 : i32 to index
    %c0_63 = arith.constant 0 : index
    %265 = vector.load %arg16[%264, %c0_63] : memref<32x128xf32, #tpu.memory_space<vmem>>, vector<4x128xf32>
    %cst_64 = arith.constant dense<0.000000e+00> : vector<4x128xf32>
    %266 = tpu.matmul %221, %6, %cst_64 {dimension_numbers = #tpu.dot_dimension_numbers<[1], [0], [0], [1], [0, 0, 1, 1], [], []>} : vector<4x32xf32>, vector<32x128xf32>, vector<4x128xf32> -> vector<4x128xf32>
    %267 = arith.addf %265, %266 : vector<4x128xf32>
    %268 = vector.extract_strided_slice %267 {offsets = [0, 0], sizes = [4, 96], strides = [1, 1]} : vector<4x128xf32> to vector<4x96xf32>
    %269 = arith.negf %268 : vector<4x96xf32>
    %270 = math.exp %269 : vector<4x96xf32>
    %cst_65 = arith.constant 1.000000e+00 : f32
    %271 = vector.broadcast %cst_65 : f32 to vector<4x96xf32>
    %272 = arith.addf %271, %270 : vector<4x96xf32>
    %273 = arith.divf %271, %272 : vector<4x96xf32>
    %274 = vector.extract_strided_slice %273 {offsets = [0, 0], sizes = [4, 32], strides = [1, 1]} : vector<4x96xf32> to vector<4x32xf32>
    %275 = vector.extract_strided_slice %273 {offsets = [0, 32], sizes = [4, 32], strides = [1, 1]} : vector<4x96xf32> to vector<4x32xf32>
    %276 = vector.extract_strided_slice %273 {offsets = [0, 64], sizes = [4, 32], strides = [1, 1]} : vector<4x96xf32> to vector<4x32xf32>
    %277 = vector.extract_strided_slice %267 {offsets = [0, 96], sizes = [4, 32], strides = [1, 1]} : vector<4x128xf32> to vector<4x32xf32>
    %278 = math.tanh %277 : vector<4x32xf32>
    %279 = arith.mulf %275, %219 : vector<4x32xf32>
    %280 = arith.mulf %274, %278 : vector<4x32xf32>
    %281 = arith.addf %279, %280 : vector<4x32xf32>
    %282 = math.tanh %281 : vector<4x32xf32>
    %283 = arith.mulf %276, %282 : vector<4x32xf32>
    %cst_66 = arith.constant dense<0.000000e+00> : vector<4x128xf32>
    %284 = tpu.matmul %283, %7, %cst_66 {dimension_numbers = #tpu.dot_dimension_numbers<[1], [0], [0], [1], [0, 0, 1, 1], [], []>} : vector<4x32xf32>, vector<32x128xf32>, vector<4x128xf32> -> vector<4x128xf32>
    %cst_67 = arith.constant dense<0.000000e+00> : vector<4x128xf32>
    %285 = tpu.matmul %241, %8, %cst_67 {dimension_numbers = #tpu.dot_dimension_numbers<[1], [0], [0], [1], [0, 0, 1, 1], [], []>} : vector<4x32xf32>, vector<32x128xf32>, vector<4x128xf32> -> vector<4x128xf32>
    %286 = arith.addf %284, %285 : vector<4x128xf32>
    %287 = arith.addf %286, %9 : vector<4x128xf32>
    %288 = vector.extract_strided_slice %287 {offsets = [0, 0], sizes = [4, 96], strides = [1, 1]} : vector<4x128xf32> to vector<4x96xf32>
    %289 = arith.negf %288 : vector<4x96xf32>
    %290 = math.exp %289 : vector<4x96xf32>
    %cst_68 = arith.constant 1.000000e+00 : f32
    %291 = vector.broadcast %cst_68 : f32 to vector<4x96xf32>
    %292 = arith.addf %291, %290 : vector<4x96xf32>
    %293 = arith.divf %291, %292 : vector<4x96xf32>
    %294 = vector.extract_strided_slice %293 {offsets = [0, 0], sizes = [4, 32], strides = [1, 1]} : vector<4x96xf32> to vector<4x32xf32>
    %295 = vector.extract_strided_slice %293 {offsets = [0, 32], sizes = [4, 32], strides = [1, 1]} : vector<4x96xf32> to vector<4x32xf32>
    %296 = vector.extract_strided_slice %293 {offsets = [0, 64], sizes = [4, 32], strides = [1, 1]} : vector<4x96xf32> to vector<4x32xf32>
    %297 = vector.extract_strided_slice %287 {offsets = [0, 96], sizes = [4, 32], strides = [1, 1]} : vector<4x128xf32> to vector<4x32xf32>
    %298 = math.tanh %297 : vector<4x32xf32>
    %299 = arith.mulf %295, %239 : vector<4x32xf32>
    %300 = arith.mulf %294, %298 : vector<4x32xf32>
    %301 = arith.addf %299, %300 : vector<4x32xf32>
    %302 = math.tanh %301 : vector<4x32xf32>
    %303 = arith.mulf %296, %302 : vector<4x32xf32>
    %cst_69 = arith.constant dense<0.000000e+00> : vector<4x128xf32>
    %304 = tpu.matmul %303, %10, %cst_69 {dimension_numbers = #tpu.dot_dimension_numbers<[1], [0], [0], [1], [0, 0, 1, 1], [], []>} : vector<4x32xf32>, vector<32x128xf32>, vector<4x128xf32> -> vector<4x128xf32>
    %cst_70 = arith.constant dense<0.000000e+00> : vector<4x128xf32>
    %305 = tpu.matmul %261, %11, %cst_70 {dimension_numbers = #tpu.dot_dimension_numbers<[1], [0], [0], [1], [0, 0, 1, 1], [], []>} : vector<4x32xf32>, vector<32x128xf32>, vector<4x128xf32> -> vector<4x128xf32>
    %306 = arith.addf %304, %305 : vector<4x128xf32>
    %307 = arith.addf %306, %12 : vector<4x128xf32>
    %308 = vector.extract_strided_slice %307 {offsets = [0, 0], sizes = [4, 96], strides = [1, 1]} : vector<4x128xf32> to vector<4x96xf32>
    %309 = arith.negf %308 : vector<4x96xf32>
    %310 = math.exp %309 : vector<4x96xf32>
    %cst_71 = arith.constant 1.000000e+00 : f32
    %311 = vector.broadcast %cst_71 : f32 to vector<4x96xf32>
    %312 = arith.addf %311, %310 : vector<4x96xf32>
    %313 = arith.divf %311, %312 : vector<4x96xf32>
    %314 = vector.extract_strided_slice %313 {offsets = [0, 0], sizes = [4, 32], strides = [1, 1]} : vector<4x96xf32> to vector<4x32xf32>
    %315 = vector.extract_strided_slice %313 {offsets = [0, 32], sizes = [4, 32], strides = [1, 1]} : vector<4x96xf32> to vector<4x32xf32>
    %316 = vector.extract_strided_slice %313 {offsets = [0, 64], sizes = [4, 32], strides = [1, 1]} : vector<4x96xf32> to vector<4x32xf32>
    %317 = vector.extract_strided_slice %307 {offsets = [0, 96], sizes = [4, 32], strides = [1, 1]} : vector<4x128xf32> to vector<4x32xf32>
    %318 = math.tanh %317 : vector<4x32xf32>
    %319 = arith.mulf %315, %259 : vector<4x32xf32>
    %320 = arith.mulf %314, %318 : vector<4x32xf32>
    %321 = arith.addf %319, %320 : vector<4x32xf32>
    %322 = math.tanh %321 : vector<4x32xf32>
    %323 = arith.mulf %316, %322 : vector<4x32xf32>
    %c5_i32 = arith.constant 5 : i32
    %c4_i32_72 = arith.constant 4 : i32
    %324 = arith.muli %c5_i32, %c4_i32_72 : i32
    %325 = tpu.assume_multiple %324, 4 : i32
    %326 = arith.index_cast %325 : i32 to index
    %c0_73 = arith.constant 0 : index
    %327 = vector.load %arg16[%326, %c0_73] : memref<32x128xf32, #tpu.memory_space<vmem>>, vector<4x128xf32>
    %cst_74 = arith.constant dense<0.000000e+00> : vector<4x128xf32>
    %328 = tpu.matmul %283, %6, %cst_74 {dimension_numbers = #tpu.dot_dimension_numbers<[1], [0], [0], [1], [0, 0, 1, 1], [], []>} : vector<4x32xf32>, vector<32x128xf32>, vector<4x128xf32> -> vector<4x128xf32>
    %329 = arith.addf %327, %328 : vector<4x128xf32>
    %330 = vector.extract_strided_slice %329 {offsets = [0, 0], sizes = [4, 96], strides = [1, 1]} : vector<4x128xf32> to vector<4x96xf32>
    %331 = arith.negf %330 : vector<4x96xf32>
    %332 = math.exp %331 : vector<4x96xf32>
    %cst_75 = arith.constant 1.000000e+00 : f32
    %333 = vector.broadcast %cst_75 : f32 to vector<4x96xf32>
    %334 = arith.addf %333, %332 : vector<4x96xf32>
    %335 = arith.divf %333, %334 : vector<4x96xf32>
    %336 = vector.extract_strided_slice %335 {offsets = [0, 0], sizes = [4, 32], strides = [1, 1]} : vector<4x96xf32> to vector<4x32xf32>
    %337 = vector.extract_strided_slice %335 {offsets = [0, 32], sizes = [4, 32], strides = [1, 1]} : vector<4x96xf32> to vector<4x32xf32>
    %338 = vector.extract_strided_slice %335 {offsets = [0, 64], sizes = [4, 32], strides = [1, 1]} : vector<4x96xf32> to vector<4x32xf32>
    %339 = vector.extract_strided_slice %329 {offsets = [0, 96], sizes = [4, 32], strides = [1, 1]} : vector<4x128xf32> to vector<4x32xf32>
    %340 = math.tanh %339 : vector<4x32xf32>
    %341 = arith.mulf %337, %281 : vector<4x32xf32>
    %342 = arith.mulf %336, %340 : vector<4x32xf32>
    %343 = arith.addf %341, %342 : vector<4x32xf32>
    %344 = math.tanh %343 : vector<4x32xf32>
    %345 = arith.mulf %338, %344 : vector<4x32xf32>
    %cst_76 = arith.constant dense<0.000000e+00> : vector<4x128xf32>
    %346 = tpu.matmul %345, %7, %cst_76 {dimension_numbers = #tpu.dot_dimension_numbers<[1], [0], [0], [1], [0, 0, 1, 1], [], []>} : vector<4x32xf32>, vector<32x128xf32>, vector<4x128xf32> -> vector<4x128xf32>
    %cst_77 = arith.constant dense<0.000000e+00> : vector<4x128xf32>
    %347 = tpu.matmul %303, %8, %cst_77 {dimension_numbers = #tpu.dot_dimension_numbers<[1], [0], [0], [1], [0, 0, 1, 1], [], []>} : vector<4x32xf32>, vector<32x128xf32>, vector<4x128xf32> -> vector<4x128xf32>
    %348 = arith.addf %346, %347 : vector<4x128xf32>
    %349 = arith.addf %348, %9 : vector<4x128xf32>
    %350 = vector.extract_strided_slice %349 {offsets = [0, 0], sizes = [4, 96], strides = [1, 1]} : vector<4x128xf32> to vector<4x96xf32>
    %351 = arith.negf %350 : vector<4x96xf32>
    %352 = math.exp %351 : vector<4x96xf32>
    %cst_78 = arith.constant 1.000000e+00 : f32
    %353 = vector.broadcast %cst_78 : f32 to vector<4x96xf32>
    %354 = arith.addf %353, %352 : vector<4x96xf32>
    %355 = arith.divf %353, %354 : vector<4x96xf32>
    %356 = vector.extract_strided_slice %355 {offsets = [0, 0], sizes = [4, 32], strides = [1, 1]} : vector<4x96xf32> to vector<4x32xf32>
    %357 = vector.extract_strided_slice %355 {offsets = [0, 32], sizes = [4, 32], strides = [1, 1]} : vector<4x96xf32> to vector<4x32xf32>
    %358 = vector.extract_strided_slice %355 {offsets = [0, 64], sizes = [4, 32], strides = [1, 1]} : vector<4x96xf32> to vector<4x32xf32>
    %359 = vector.extract_strided_slice %349 {offsets = [0, 96], sizes = [4, 32], strides = [1, 1]} : vector<4x128xf32> to vector<4x32xf32>
    %360 = math.tanh %359 : vector<4x32xf32>
    %361 = arith.mulf %357, %301 : vector<4x32xf32>
    %362 = arith.mulf %356, %360 : vector<4x32xf32>
    %363 = arith.addf %361, %362 : vector<4x32xf32>
    %364 = math.tanh %363 : vector<4x32xf32>
    %365 = arith.mulf %358, %364 : vector<4x32xf32>
    %cst_79 = arith.constant dense<0.000000e+00> : vector<4x128xf32>
    %366 = tpu.matmul %365, %10, %cst_79 {dimension_numbers = #tpu.dot_dimension_numbers<[1], [0], [0], [1], [0, 0, 1, 1], [], []>} : vector<4x32xf32>, vector<32x128xf32>, vector<4x128xf32> -> vector<4x128xf32>
    %cst_80 = arith.constant dense<0.000000e+00> : vector<4x128xf32>
    %367 = tpu.matmul %323, %11, %cst_80 {dimension_numbers = #tpu.dot_dimension_numbers<[1], [0], [0], [1], [0, 0, 1, 1], [], []>} : vector<4x32xf32>, vector<32x128xf32>, vector<4x128xf32> -> vector<4x128xf32>
    %368 = arith.addf %366, %367 : vector<4x128xf32>
    %369 = arith.addf %368, %12 : vector<4x128xf32>
    %370 = vector.extract_strided_slice %369 {offsets = [0, 0], sizes = [4, 96], strides = [1, 1]} : vector<4x128xf32> to vector<4x96xf32>
    %371 = arith.negf %370 : vector<4x96xf32>
    %372 = math.exp %371 : vector<4x96xf32>
    %cst_81 = arith.constant 1.000000e+00 : f32
    %373 = vector.broadcast %cst_81 : f32 to vector<4x96xf32>
    %374 = arith.addf %373, %372 : vector<4x96xf32>
    %375 = arith.divf %373, %374 : vector<4x96xf32>
    %376 = vector.extract_strided_slice %375 {offsets = [0, 0], sizes = [4, 32], strides = [1, 1]} : vector<4x96xf32> to vector<4x32xf32>
    %377 = vector.extract_strided_slice %375 {offsets = [0, 32], sizes = [4, 32], strides = [1, 1]} : vector<4x96xf32> to vector<4x32xf32>
    %378 = vector.extract_strided_slice %375 {offsets = [0, 64], sizes = [4, 32], strides = [1, 1]} : vector<4x96xf32> to vector<4x32xf32>
    %379 = vector.extract_strided_slice %369 {offsets = [0, 96], sizes = [4, 32], strides = [1, 1]} : vector<4x128xf32> to vector<4x32xf32>
    %380 = math.tanh %379 : vector<4x32xf32>
    %381 = arith.mulf %377, %321 : vector<4x32xf32>
    %382 = arith.mulf %376, %380 : vector<4x32xf32>
    %383 = arith.addf %381, %382 : vector<4x32xf32>
    %384 = math.tanh %383 : vector<4x32xf32>
    %385 = arith.mulf %378, %384 : vector<4x32xf32>
    %c6_i32 = arith.constant 6 : i32
    %c4_i32_82 = arith.constant 4 : i32
    %386 = arith.muli %c6_i32, %c4_i32_82 : i32
    %387 = tpu.assume_multiple %386, 4 : i32
    %388 = arith.index_cast %387 : i32 to index
    %c0_83 = arith.constant 0 : index
    %389 = vector.load %arg16[%388, %c0_83] : memref<32x128xf32, #tpu.memory_space<vmem>>, vector<4x128xf32>
    %cst_84 = arith.constant dense<0.000000e+00> : vector<4x128xf32>
    %390 = tpu.matmul %345, %6, %cst_84 {dimension_numbers = #tpu.dot_dimension_numbers<[1], [0], [0], [1], [0, 0, 1, 1], [], []>} : vector<4x32xf32>, vector<32x128xf32>, vector<4x128xf32> -> vector<4x128xf32>
    %391 = arith.addf %389, %390 : vector<4x128xf32>
    %392 = vector.extract_strided_slice %391 {offsets = [0, 0], sizes = [4, 96], strides = [1, 1]} : vector<4x128xf32> to vector<4x96xf32>
    %393 = arith.negf %392 : vector<4x96xf32>
    %394 = math.exp %393 : vector<4x96xf32>
    %cst_85 = arith.constant 1.000000e+00 : f32
    %395 = vector.broadcast %cst_85 : f32 to vector<4x96xf32>
    %396 = arith.addf %395, %394 : vector<4x96xf32>
    %397 = arith.divf %395, %396 : vector<4x96xf32>
    %398 = vector.extract_strided_slice %397 {offsets = [0, 0], sizes = [4, 32], strides = [1, 1]} : vector<4x96xf32> to vector<4x32xf32>
    %399 = vector.extract_strided_slice %397 {offsets = [0, 32], sizes = [4, 32], strides = [1, 1]} : vector<4x96xf32> to vector<4x32xf32>
    %400 = vector.extract_strided_slice %397 {offsets = [0, 64], sizes = [4, 32], strides = [1, 1]} : vector<4x96xf32> to vector<4x32xf32>
    %401 = vector.extract_strided_slice %391 {offsets = [0, 96], sizes = [4, 32], strides = [1, 1]} : vector<4x128xf32> to vector<4x32xf32>
    %402 = math.tanh %401 : vector<4x32xf32>
    %403 = arith.mulf %399, %343 : vector<4x32xf32>
    %404 = arith.mulf %398, %402 : vector<4x32xf32>
    %405 = arith.addf %403, %404 : vector<4x32xf32>
    %406 = math.tanh %405 : vector<4x32xf32>
    %407 = arith.mulf %400, %406 : vector<4x32xf32>
    %cst_86 = arith.constant dense<0.000000e+00> : vector<4x128xf32>
    %408 = tpu.matmul %407, %7, %cst_86 {dimension_numbers = #tpu.dot_dimension_numbers<[1], [0], [0], [1], [0, 0, 1, 1], [], []>} : vector<4x32xf32>, vector<32x128xf32>, vector<4x128xf32> -> vector<4x128xf32>
    %cst_87 = arith.constant dense<0.000000e+00> : vector<4x128xf32>
    %409 = tpu.matmul %365, %8, %cst_87 {dimension_numbers = #tpu.dot_dimension_numbers<[1], [0], [0], [1], [0, 0, 1, 1], [], []>} : vector<4x32xf32>, vector<32x128xf32>, vector<4x128xf32> -> vector<4x128xf32>
    %410 = arith.addf %408, %409 : vector<4x128xf32>
    %411 = arith.addf %410, %9 : vector<4x128xf32>
    %412 = vector.extract_strided_slice %411 {offsets = [0, 0], sizes = [4, 96], strides = [1, 1]} : vector<4x128xf32> to vector<4x96xf32>
    %413 = arith.negf %412 : vector<4x96xf32>
    %414 = math.exp %413 : vector<4x96xf32>
    %cst_88 = arith.constant 1.000000e+00 : f32
    %415 = vector.broadcast %cst_88 : f32 to vector<4x96xf32>
    %416 = arith.addf %415, %414 : vector<4x96xf32>
    %417 = arith.divf %415, %416 : vector<4x96xf32>
    %418 = vector.extract_strided_slice %417 {offsets = [0, 0], sizes = [4, 32], strides = [1, 1]} : vector<4x96xf32> to vector<4x32xf32>
    %419 = vector.extract_strided_slice %417 {offsets = [0, 32], sizes = [4, 32], strides = [1, 1]} : vector<4x96xf32> to vector<4x32xf32>
    %420 = vector.extract_strided_slice %417 {offsets = [0, 64], sizes = [4, 32], strides = [1, 1]} : vector<4x96xf32> to vector<4x32xf32>
    %421 = vector.extract_strided_slice %411 {offsets = [0, 96], sizes = [4, 32], strides = [1, 1]} : vector<4x128xf32> to vector<4x32xf32>
    %422 = math.tanh %421 : vector<4x32xf32>
    %423 = arith.mulf %419, %363 : vector<4x32xf32>
    %424 = arith.mulf %418, %422 : vector<4x32xf32>
    %425 = arith.addf %423, %424 : vector<4x32xf32>
    %426 = math.tanh %425 : vector<4x32xf32>
    %427 = arith.mulf %420, %426 : vector<4x32xf32>
    %cst_89 = arith.constant dense<0.000000e+00> : vector<4x128xf32>
    %428 = tpu.matmul %427, %10, %cst_89 {dimension_numbers = #tpu.dot_dimension_numbers<[1], [0], [0], [1], [0, 0, 1, 1], [], []>} : vector<4x32xf32>, vector<32x128xf32>, vector<4x128xf32> -> vector<4x128xf32>
    %cst_90 = arith.constant dense<0.000000e+00> : vector<4x128xf32>
    %429 = tpu.matmul %385, %11, %cst_90 {dimension_numbers = #tpu.dot_dimension_numbers<[1], [0], [0], [1], [0, 0, 1, 1], [], []>} : vector<4x32xf32>, vector<32x128xf32>, vector<4x128xf32> -> vector<4x128xf32>
    %430 = arith.addf %428, %429 : vector<4x128xf32>
    %431 = arith.addf %430, %12 : vector<4x128xf32>
    %432 = vector.extract_strided_slice %431 {offsets = [0, 0], sizes = [4, 96], strides = [1, 1]} : vector<4x128xf32> to vector<4x96xf32>
    %433 = arith.negf %432 : vector<4x96xf32>
    %434 = math.exp %433 : vector<4x96xf32>
    %cst_91 = arith.constant 1.000000e+00 : f32
    %435 = vector.broadcast %cst_91 : f32 to vector<4x96xf32>
    %436 = arith.addf %435, %434 : vector<4x96xf32>
    %437 = arith.divf %435, %436 : vector<4x96xf32>
    %438 = vector.extract_strided_slice %437 {offsets = [0, 0], sizes = [4, 32], strides = [1, 1]} : vector<4x96xf32> to vector<4x32xf32>
    %439 = vector.extract_strided_slice %437 {offsets = [0, 32], sizes = [4, 32], strides = [1, 1]} : vector<4x96xf32> to vector<4x32xf32>
    %440 = vector.extract_strided_slice %437 {offsets = [0, 64], sizes = [4, 32], strides = [1, 1]} : vector<4x96xf32> to vector<4x32xf32>
    %441 = vector.extract_strided_slice %431 {offsets = [0, 96], sizes = [4, 32], strides = [1, 1]} : vector<4x128xf32> to vector<4x32xf32>
    %442 = math.tanh %441 : vector<4x32xf32>
    %443 = arith.mulf %439, %383 : vector<4x32xf32>
    %444 = arith.mulf %438, %442 : vector<4x32xf32>
    %445 = arith.addf %443, %444 : vector<4x32xf32>
    %446 = math.tanh %445 : vector<4x32xf32>
    %447 = arith.mulf %440, %446 : vector<4x32xf32>
    %c7_i32 = arith.constant 7 : i32
    %c4_i32_92 = arith.constant 4 : i32
    %448 = arith.muli %c7_i32, %c4_i32_92 : i32
    %449 = tpu.assume_multiple %448, 4 : i32
    %450 = arith.index_cast %449 : i32 to index
    %c0_93 = arith.constant 0 : index
    %451 = vector.load %arg16[%450, %c0_93] : memref<32x128xf32, #tpu.memory_space<vmem>>, vector<4x128xf32>
    %cst_94 = arith.constant dense<0.000000e+00> : vector<4x128xf32>
    %452 = tpu.matmul %407, %6, %cst_94 {dimension_numbers = #tpu.dot_dimension_numbers<[1], [0], [0], [1], [0, 0, 1, 1], [], []>} : vector<4x32xf32>, vector<32x128xf32>, vector<4x128xf32> -> vector<4x128xf32>
    %453 = arith.addf %451, %452 : vector<4x128xf32>
    %454 = vector.extract_strided_slice %453 {offsets = [0, 0], sizes = [4, 96], strides = [1, 1]} : vector<4x128xf32> to vector<4x96xf32>
    %455 = arith.negf %454 : vector<4x96xf32>
    %456 = math.exp %455 : vector<4x96xf32>
    %cst_95 = arith.constant 1.000000e+00 : f32
    %457 = vector.broadcast %cst_95 : f32 to vector<4x96xf32>
    %458 = arith.addf %457, %456 : vector<4x96xf32>
    %459 = arith.divf %457, %458 : vector<4x96xf32>
    %460 = vector.extract_strided_slice %459 {offsets = [0, 0], sizes = [4, 32], strides = [1, 1]} : vector<4x96xf32> to vector<4x32xf32>
    %461 = vector.extract_strided_slice %459 {offsets = [0, 32], sizes = [4, 32], strides = [1, 1]} : vector<4x96xf32> to vector<4x32xf32>
    %462 = vector.extract_strided_slice %459 {offsets = [0, 64], sizes = [4, 32], strides = [1, 1]} : vector<4x96xf32> to vector<4x32xf32>
    %463 = vector.extract_strided_slice %453 {offsets = [0, 96], sizes = [4, 32], strides = [1, 1]} : vector<4x128xf32> to vector<4x32xf32>
    %464 = math.tanh %463 : vector<4x32xf32>
    %465 = arith.mulf %461, %405 : vector<4x32xf32>
    %466 = arith.mulf %460, %464 : vector<4x32xf32>
    %467 = arith.addf %465, %466 : vector<4x32xf32>
    %468 = math.tanh %467 : vector<4x32xf32>
    %469 = arith.mulf %462, %468 : vector<4x32xf32>
    %cst_96 = arith.constant dense<0.000000e+00> : vector<4x128xf32>
    %470 = tpu.matmul %469, %7, %cst_96 {dimension_numbers = #tpu.dot_dimension_numbers<[1], [0], [0], [1], [0, 0, 1, 1], [], []>} : vector<4x32xf32>, vector<32x128xf32>, vector<4x128xf32> -> vector<4x128xf32>
    %cst_97 = arith.constant dense<0.000000e+00> : vector<4x128xf32>
    %471 = tpu.matmul %427, %8, %cst_97 {dimension_numbers = #tpu.dot_dimension_numbers<[1], [0], [0], [1], [0, 0, 1, 1], [], []>} : vector<4x32xf32>, vector<32x128xf32>, vector<4x128xf32> -> vector<4x128xf32>
    %472 = arith.addf %470, %471 : vector<4x128xf32>
    %473 = arith.addf %472, %9 : vector<4x128xf32>
    %474 = vector.extract_strided_slice %473 {offsets = [0, 0], sizes = [4, 96], strides = [1, 1]} : vector<4x128xf32> to vector<4x96xf32>
    %475 = arith.negf %474 : vector<4x96xf32>
    %476 = math.exp %475 : vector<4x96xf32>
    %cst_98 = arith.constant 1.000000e+00 : f32
    %477 = vector.broadcast %cst_98 : f32 to vector<4x96xf32>
    %478 = arith.addf %477, %476 : vector<4x96xf32>
    %479 = arith.divf %477, %478 : vector<4x96xf32>
    %480 = vector.extract_strided_slice %479 {offsets = [0, 0], sizes = [4, 32], strides = [1, 1]} : vector<4x96xf32> to vector<4x32xf32>
    %481 = vector.extract_strided_slice %479 {offsets = [0, 32], sizes = [4, 32], strides = [1, 1]} : vector<4x96xf32> to vector<4x32xf32>
    %482 = vector.extract_strided_slice %479 {offsets = [0, 64], sizes = [4, 32], strides = [1, 1]} : vector<4x96xf32> to vector<4x32xf32>
    %483 = vector.extract_strided_slice %473 {offsets = [0, 96], sizes = [4, 32], strides = [1, 1]} : vector<4x128xf32> to vector<4x32xf32>
    %484 = math.tanh %483 : vector<4x32xf32>
    %485 = arith.mulf %481, %425 : vector<4x32xf32>
    %486 = arith.mulf %480, %484 : vector<4x32xf32>
    %487 = arith.addf %485, %486 : vector<4x32xf32>
    %488 = math.tanh %487 : vector<4x32xf32>
    %489 = arith.mulf %482, %488 : vector<4x32xf32>
    %cst_99 = arith.constant dense<0.000000e+00> : vector<4x128xf32>
    %490 = tpu.matmul %489, %10, %cst_99 {dimension_numbers = #tpu.dot_dimension_numbers<[1], [0], [0], [1], [0, 0, 1, 1], [], []>} : vector<4x32xf32>, vector<32x128xf32>, vector<4x128xf32> -> vector<4x128xf32>
    %cst_100 = arith.constant dense<0.000000e+00> : vector<4x128xf32>
    %491 = tpu.matmul %447, %11, %cst_100 {dimension_numbers = #tpu.dot_dimension_numbers<[1], [0], [0], [1], [0, 0, 1, 1], [], []>} : vector<4x32xf32>, vector<32x128xf32>, vector<4x128xf32> -> vector<4x128xf32>
    %492 = arith.addf %490, %491 : vector<4x128xf32>
    %493 = arith.addf %492, %12 : vector<4x128xf32>
    %494 = vector.extract_strided_slice %493 {offsets = [0, 0], sizes = [4, 96], strides = [1, 1]} : vector<4x128xf32> to vector<4x96xf32>
    %495 = arith.negf %494 : vector<4x96xf32>
    %496 = math.exp %495 : vector<4x96xf32>
    %cst_101 = arith.constant 1.000000e+00 : f32
    %497 = vector.broadcast %cst_101 : f32 to vector<4x96xf32>
    %498 = arith.addf %497, %496 : vector<4x96xf32>
    %499 = arith.divf %497, %498 : vector<4x96xf32>
    %500 = vector.extract_strided_slice %499 {offsets = [0, 0], sizes = [4, 32], strides = [1, 1]} : vector<4x96xf32> to vector<4x32xf32>
    %501 = vector.extract_strided_slice %499 {offsets = [0, 32], sizes = [4, 32], strides = [1, 1]} : vector<4x96xf32> to vector<4x32xf32>
    %502 = vector.extract_strided_slice %499 {offsets = [0, 64], sizes = [4, 32], strides = [1, 1]} : vector<4x96xf32> to vector<4x32xf32>
    %503 = vector.extract_strided_slice %493 {offsets = [0, 96], sizes = [4, 32], strides = [1, 1]} : vector<4x128xf32> to vector<4x32xf32>
    %504 = math.tanh %503 : vector<4x32xf32>
    %505 = arith.mulf %501, %445 : vector<4x32xf32>
    %506 = arith.mulf %500, %504 : vector<4x32xf32>
    %507 = arith.addf %505, %506 : vector<4x32xf32>
    %508 = math.tanh %507 : vector<4x32xf32>
    %509 = arith.mulf %502, %508 : vector<4x32xf32>
    %c8_i32 = arith.constant 8 : i32
    %510 = arith.truncf %507 : vector<4x32xf32> to vector<4x32xbf16>
    %c0_102 = arith.constant 0 : index
    %c0_103 = arith.constant 0 : index
    %511 = vector.load %arg10[%c0_102, %c0_103] : memref<32x2048xbf16, #tpu.memory_space<vmem>>, vector<32x2048xbf16>
    %cst_104 = arith.constant dense<0.000000e+00> : vector<4x2048xf32>
    %512 = tpu.matmul %510, %511, %cst_104 {dimension_numbers = #tpu.dot_dimension_numbers<[1], [0], [0], [1], [0, 0, 1, 1], [], []>} : vector<4x32xbf16>, vector<32x2048xbf16>, vector<4x2048xf32> -> vector<4x2048xf32>
    %513 = tpu.concatenate %512, %512, %512, %512 in 0 : vector<4x2048xf32>, vector<4x2048xf32>, vector<4x2048xf32>, vector<4x2048xf32> -> vector<16x2048xf32>
    %514 = vector.extract_strided_slice %512 {offsets = [0, 0], sizes = [1, 2048], strides = [1, 1]} : vector<4x2048xf32> to vector<1x2048xf32>
    %515 = vector.shape_cast %514 : vector<1x2048xf32> to vector<1x2048xf32>
    %516 = vector.broadcast %515 : vector<1x2048xf32> to vector<4x2048xf32>
    %517 = vector.extract_strided_slice %512 {offsets = [1, 0], sizes = [1, 2048], strides = [1, 1]} : vector<4x2048xf32> to vector<1x2048xf32>
    %518 = vector.shape_cast %517 : vector<1x2048xf32> to vector<1x2048xf32>
    %519 = vector.broadcast %518 : vector<1x2048xf32> to vector<4x2048xf32>
    %520 = vector.extract_strided_slice %512 {offsets = [2, 0], sizes = [1, 2048], strides = [1, 1]} : vector<4x2048xf32> to vector<1x2048xf32>
    %521 = vector.shape_cast %520 : vector<1x2048xf32> to vector<1x2048xf32>
    %522 = vector.broadcast %521 : vector<1x2048xf32> to vector<4x2048xf32>
    %523 = vector.extract_strided_slice %512 {offsets = [3, 0], sizes = [1, 2048], strides = [1, 1]} : vector<4x2048xf32> to vector<1x2048xf32>
    %524 = vector.shape_cast %523 : vector<1x2048xf32> to vector<1x2048xf32>
    %525 = vector.broadcast %524 : vector<1x2048xf32> to vector<4x2048xf32>
    %526 = tpu.concatenate %516, %519, %522, %525 in 0 : vector<4x2048xf32>, vector<4x2048xf32>, vector<4x2048xf32>, vector<4x2048xf32> -> vector<16x2048xf32>
    %527 = arith.subf %513, %526 : vector<16x2048xf32>
    %528 = math.absf %527 : vector<16x2048xf32>
    %529 = arith.truncf %528 : vector<16x2048xf32> to vector<16x2048xbf16>
    %c0_105 = arith.constant 0 : index
    %c0_106 = arith.constant 0 : index
    %530 = vector.load %arg11[%c0_105, %c0_106] : memref<2048x32xbf16, #tpu.memory_space<vmem>>, vector<2048x32xbf16>
    %cst_107 = arith.constant dense<0.000000e+00> : vector<16x32xf32>
    %531 = tpu.matmul %529, %530, %cst_107 {dimension_numbers = #tpu.dot_dimension_numbers<[1], [0], [0], [1], [0, 0, 1, 1], [], []>} : vector<16x2048xbf16>, vector<2048x32xbf16>, vector<16x32xf32> -> vector<16x32xf32>
    %cst_108 = arith.constant 0.000000e+00 : f32
    %532 = vector.broadcast %cst_108 : f32 to vector<16x32xf32>
    %533 = arith.subf %532, %531 : vector<16x32xf32>
    %534 = math.exp %533 : vector<16x32xf32>
    %535 = vector.extract_strided_slice %534 {offsets = [0, 0], sizes = [4, 32], strides = [1, 1]} : vector<16x32xf32> to vector<4x32xf32>
    %536 = vector.extract_strided_slice %534 {offsets = [4, 0], sizes = [4, 32], strides = [1, 1]} : vector<16x32xf32> to vector<4x32xf32>
    %537 = arith.addf %535, %536 : vector<4x32xf32>
    %538 = vector.extract_strided_slice %534 {offsets = [8, 0], sizes = [4, 32], strides = [1, 1]} : vector<16x32xf32> to vector<4x32xf32>
    %539 = arith.addf %537, %538 : vector<4x32xf32>
    %540 = vector.extract_strided_slice %534 {offsets = [12, 0], sizes = [4, 32], strides = [1, 1]} : vector<16x32xf32> to vector<4x32xf32>
    %541 = arith.addf %539, %540 : vector<4x32xf32>
    %cst_109 = arith.constant 1.000000e+00 : f32
    %542 = vector.broadcast %cst_109 : f32 to vector<4x32xf32>
    %543 = arith.subf %541, %542 : vector<4x32xf32>
    %c0_110 = arith.constant 0 : index
    %c0_111 = arith.constant 0 : index
    %544 = vector.load %arg12[%c0_110, %c0_111] : memref<32x1xf32, #tpu.memory_space<vmem>>, vector<32x1xf32>
    %cst_112 = arith.constant dense<0.000000e+00> : vector<4x1xf32>
    %545 = tpu.matmul %507, %544, %cst_112 {dimension_numbers = #tpu.dot_dimension_numbers<[1], [0], [0], [1], [0, 0, 1, 1], [], []>} : vector<4x32xf32>, vector<32x1xf32>, vector<4x1xf32> -> vector<4x1xf32>
    %c0_113 = arith.constant 0 : index
    %c0_114 = arith.constant 0 : index
    %546 = vector.load %arg13[%c0_113, %c0_114] : memref<32x1xf32, #tpu.memory_space<vmem>>, vector<32x1xf32>
    %cst_115 = arith.constant dense<0.000000e+00> : vector<4x1xf32>
    %547 = tpu.matmul %543, %546, %cst_115 {dimension_numbers = #tpu.dot_dimension_numbers<[1], [0], [0], [1], [0, 0, 1, 1], [], []>} : vector<4x32xf32>, vector<32x1xf32>, vector<4x1xf32> -> vector<4x1xf32>
    %548 = arith.addf %545, %547 : vector<4x1xf32>
    %c0_116 = arith.constant 0 : index
    %c0_117 = arith.constant 0 : index
    %549 = vector.load %arg14[%c0_116, %c0_117] : memref<4x1xf32, #tpu.memory_space<vmem>>, vector<4x1xf32>
    %550 = arith.addf %548, %549 : vector<4x1xf32>
    %551 = arith.negf %550 : vector<4x1xf32>
    %552 = math.exp %551 : vector<4x1xf32>
    %cst_118 = arith.constant 1.000000e+00 : f32
    %553 = vector.broadcast %cst_118 : f32 to vector<4x1xf32>
    %554 = arith.addf %553, %552 : vector<4x1xf32>
    %555 = arith.divf %553, %554 : vector<4x1xf32>
    %c0_119 = arith.constant 0 : index
    %c0_120 = arith.constant 0 : index
    %556 = vector.load %arg15[%c0_119, %c0_120] : memref<4x1xf32, #tpu.memory_space<vmem>>, vector<4x1xf32>
    tpu.vector_store %arg15[%c0_119, %c0_120], %555 {strides = array<i32>} : memref<4x1xf32, #tpu.memory_space<vmem>>, vector<4x1xf32>,
    return
  }
}

</mosaic_0001>

<bundles_post_ra>
// kernel: discriminator_forward.1
= control target key start
LH: loop header
LB: loop body
LE: loop exit
PB: predicated region body
PF: predicated region fallthrough
CT: control target
= control target key end

     0   :  { %vm61_vm0 = vcmask 130048   ;;  %v9688_v3 = vmov 0.0   ;;  %vm7667_vm1 = vmmov 0   ;;  %s7668_s22 = smov 32   ;;  %s7669_s18 = smov 64   ;;  %vm186_vm2 = vcmask 261120   ;;  %s9672_s1 = inlined_call_operand.vmem [shape: f32[16,128], index: 1, kind: input, shape index: {}]   ;;  %s9673_s0 = inlined_call_operand.vmem [shape: f32[32,16], index: 0, kind: input, shape index: {}]   ;;  %s9674_s2 = inlined_call_operand.vmem [shape: f32[32,128], index: 2, kind: input, shape index: {}]   ;;  %s9675_s3 = inlined_call_operand.vmem [shape: f32[32,128], index: 3, kind: input, shape index: {}]   ;;  %s9676_s5 = inlined_call_operand.vmem [shape: f32[32,128], index: 5, kind: input, shape index: {}]   ;;  %s9677_s4 = inlined_call_operand.vmem [shape: f32[32,128], index: 4, kind: input, shape index: {}]   ;;  %s9678_s8 = inlined_call_operand.vmem [shape: f32[32,128], index: 8, kind: input, shape index: {}]   ;;  %s9679_s6 = inlined_call_operand.vmem [shape: f32[4,128], index: 6, kind: input, shape index: {}]   ;;  %s9680_s7 = inlined_call_operand.vmem [shape: f32[32,128], index: 7, kind: input, shape index: {}]   ;;  %s9681_s9 = inlined_call_operand.vmem [shape: f32[4,128], index: 9, kind: input, shape index: {}]   ;;  %s9682_s10 = inlined_call_operand.vmem [shape: bf16[32,2048], index: 10, kind: input, shape index: {}]   ;;  %s9683_s11 = inlined_call_operand.vmem [shape: bf16[2048,32], index: 11, kind: input, shape index: {}]   ;;  %s9684_s12 = inlined_call_operand.vmem [shape: f32[32,1], index: 12, kind: input, shape index: {}]   ;;  %s9685_s13 = inlined_call_operand.vmem [shape: f32[32,1], index: 13, kind: input, shape index: {}]   ;;  %s9686_s14 = inlined_call_operand.vmem [shape: f32[4,1], index: 14, kind: input, shape index: {}]   ;;  %s9687_s15 = inlined_call_operand.vmem [shape: f32[4,1], index: 15, kind: output, shape index: {}]  }
   0x1   :  { %v56_v0 = vld [vmem:[%s9672_s1 + $0x8] sm:$0xff]  ;;  %v55_v1 = vld [vmem:[%s9672_s1] sm:$0xff]  ;;  %6850 = vmatprep.subr.mxu1 %v9688_v3  ;;  %6858 = vmatprep.mubr.msk.f32.mxu1 %vm7667_vm1, %v9688_v3  ;;  %v7768_v4 = vld [vmem:[%s9674_s2 + $0x18] sm:$0xff]  ;;  %s7671_s24 = smov 96   ;;  %vm4288_vm3 = vcmask 1043456   ;;  %vm6205_vm4 = vcmask 3072  }
   0x2   :  { %v51_v2 = vld [vmem:[%s9673_s0] sm:$0xff]  ;;  %6840 = vmatprep.subr.mxu0 %v56_v0  ;;  %v7773_v5 = vld [vmem:[%s9674_s2 + $0x10] sm:$0xff]  ;;  %v52_v6 = vld [vmem:[%s9673_s0 + $0x8] sm:$0xff]  ;;  %6851 = vmatpush3.msra.mxu1 %v7768_v4 }
   0x3   :  { %6844 = vmatprep.mubr.msk.f32.mxu0 %vm61_vm0, %v51_v2  ;;  %6841 = vmatpush3.msra.mxu0 %v56_v0  ;;  %v7783_v7 = vld [vmem:[%s9674_s2 + $0x8] sm:$0xff]  ;;  %v7791_v8 = vld [vmem:[%s9674_s2] sm:$0xff]  ;;  %v53_v29 = vld [vmem:[%s9673_s0 + $0x10] sm:$0xff] }
   0x4   :  { %6842 = vmatprep.subr.mxu0 %v55_v1  ;;  %6852 = vmatprep.subr.mxu1 %v9688_v3  ;;  %v58_v9 = vld [vmem:[%s9675_s3 + $0x8] sm:$0xff]  ;;  %v57_v11 = vld [vmem:[%s9675_s3] sm:$0xff]  ;;  %v54_v30 = vld [vmem:[%s9673_s0 + $0x18] sm:$0xff] }
   0x5   :  { %6843 = vmatpush3.msra.mxu0 %v55_v1  ;;  %6853 = vmatpush3.msra.mxu1 %v7773_v5  ;;  %v7825_v31 = vld [vmem:[%s9676_s5 + $0x18] sm:$0xff]  ;;  %v7830_v32 = vld [vmem:[%s9676_s5 + $0x10] sm:$0xff]  ;;  %v7839_v33 = vld [vmem:[%s9676_s5 + $0x8] sm:$0xff] }
   0x6   :  { %6845 = vmatmul.mubr.msk.f32.vlgmr.msra.gmra.mxu0 %vm61_vm0, %v52_v6  ;;  %6854 = vmatprep.subr.mxu1 %v9688_v3  ;;  %v7844_v34 = vld [vmem:[%s9677_s4 + $0x18] sm:$0xff]  ;;  %v7852_v35 = vld [vmem:[%s9677_s4 + $0x10] sm:$0xff]  ;;  %v7858_v36 = vld [vmem:[%s9676_s5] sm:$0xff] }
   0x7   :  { %6855 = vmatpush3.msra.mxu1 %v7783_v7  ;;  %6861 = vmatprep.subr.mxu0 %v9688_v3  ;;  %v7867_v37 = vld [vmem:[%s9678_s8 + $0x18] sm:$0xff]  ;;  %v7877_v38 = vld [vmem:[%s9678_s8 + $0x10] sm:$0xff]  ;;  %v7882_v39 = vld [vmem:[%s9677_s4 + $0x8] sm:$0xff] }
   0x8   :  { %6856 = vmatprep.subr.mxu1 %v9688_v3  ;;  %6847 = vmatprep.mubr.msk.f32.mxu0 %vm61_vm0, %v53_v29  ;;  %v7892_v41 = vld [vmem:[%s9678_s8 + $0x8] sm:$0xff]  ;;  %v7897_v42 = vld [vmem:[%s9677_s4] sm:$0xff]  ;;  %v60_v46 = vld [vmem:[%s9675_s3 + $0x18] sm:$0xff] }
   0x9   :  { %6857 = vmatpush3.msra.mxu1 %v7791_v8  ;;  %6862 = vmatpush3.msra.mxu0 %v7825_v31  ;;  %v7905_v43 = vld [vmem:[%s9678_s8] sm:$0xff]  ;;  %v59_v48 = vld [vmem:[%s9675_s3 + $0x10] sm:$0xff]  ;;  %v7981_v29 = vld [vmem:[%s9680_s7 + $0x8] sm:$0xff] }
   0xa   :  { %6859 = vmatmul.mubr.f32.vlgmr.msra.gmra.mxu1 %v9688_v3  ;;  %6872 = vmatprep.subr.mxu1 %v9688_v3  ;;  %v7952_v57 = vld [vmem:[%s9679_s6] sm:$0xf] }
   0xb   :  { %6880 = vmatprep.mubr.msk.f32.mxu1 %vm7667_vm1, %v9688_v3  ;;  %6863 = vmatprep.subr.mxu0 %v9688_v3 }
   0xc   :  { %6848 = vmatmul.mubr.msk.f32.gmra.mxu0 %vm61_vm0, %v54_v30  ;;  %6873 = vmatpush3.msra.mxu1 %v7844_v34 }
   0xd   :  { %6864 = vmatpush3.msra.mxu0 %v7830_v32  ;;  %6869 = vmatprep.mubr.msk.f32.mxu0 %vm7667_vm1, %v9688_v3 }
   0xe   :  { %6865 = vmatprep.subr.mxu0 %v9688_v3  ;;  %6874 = vmatprep.subr.mxu1 %v9688_v3 }
   0xf   :  { %6866 = vmatpush3.msra.mxu0 %v7839_v33  ;;  %6875 = vmatpush3.msra.mxu1 %v7852_v35 }
  0x10   :  { %6867 = vmatprep.subr.mxu0 %v9688_v3  ;;  %6876 = vmatprep.subr.mxu1 %v9688_v3 }
  0x11   :  { %6868 = vmatpush3.msra.mxu0 %v7858_v36  ;;  %6877 = vmatpush3.msra.mxu1 %v7882_v39 }
  0x12   :  { %6883 = vmatprep.subr.mxu0 %v9688_v3  ;;  %6870 = vmatmul.mubr.f32.vlgmr.msra.gmra.mxu0 %v9688_v3 }
  0x13   :  { %6884 = vmatpush3.msra.mxu0 %v7867_v37  ;;  %6891 = vmatprep.mubr.msk.f32.mxu0 %vm7667_vm1, %v9688_v3 }
  0x14   :  { %6885 = vmatprep.subr.mxu0 %v9688_v3  ;;  %6878 = vmatprep.subr.mxu1 %v9688_v3 }
  0x15   :  { %6886 = vmatpush3.msra.mxu0 %v7877_v38  ;;  %6879 = vmatpush3.msra.mxu1 %v7897_v42 }
  0x16   :  { %6887 = vmatprep.subr.mxu0 %v9688_v3  ;;  %6894 = vmatprep.subr.mxu1 %v9688_v3 }
  0x17   :  { %6888 = vmatpush3.msra.mxu0 %v7892_v41 }
  0x18   :  { %6889 = vmatprep.subr.mxu0 %v9688_v3 }
  0x19   :  { %6890 = vmatpush3.msra.mxu0 %v7905_v43 }
  0x1a   :  { %6905 = vmatprep.subr.mxu0 %v9688_v3  ;;  %6892 = vmatmul.mubr.f32.vlgmr.msra.gmra.mxu0 %v9688_v3 }
  0x1b   :  { %6906 = vmatpush3.msra.mxu0 %v7768_v4  ;;  %6913 = vmatprep.mubr.msk.f32.mxu0 %vm7667_vm1, %v9688_v3 }
  0x1c   :  { %6907 = vmatprep.subr.mxu0 %v9688_v3 }
  0x1d   :  { %6908 = vmatpush3.msra.mxu0 %v7773_v5 }
  0x1e   :  { %6909 = vmatprep.subr.mxu0 %v9688_v3 }
  0x1f   :  { %6910 = vmatpush3.msra.mxu0 %v7783_v7 }
  0x20   :  { %6911 = vmatprep.subr.mxu0 %v9688_v3 }
  0x21   :  { %6912 = vmatpush3.msra.mxu0 %v7791_v8 }
  0x22   :  { %6927 = vmatprep.subr.mxu0 %v9688_v3 }
  0xc6   :  { %v6846_v10 = vpop.f32.mrf.mxu0 }
  0xc7   :  { %v146_v12 = vadd.f32 %v6846_v10, %v58_v9 }
  0xc8   :  { %v140_v13 = vpop.f32.mrf.mxu0 }
  0xc9   :  { %160 = vst [vmem:[#allocation2 + $0x8] sm:$0xff] %v146_v12  ;;  %v141_v14 = vadd.f32 %v140_v13, %v57_v11 }
  0xca   :  { %v256_v15 = vpop.f32.mrf.mxu1 }
  0xcb   :  { %159 = vst [vmem:[#allocation2] sm:$0xff] %v141_v14 }
  0xcc   :  { %v6860_v16 = vpop.f32.mrf.mxu1  ;;  %v6849_v47 = vpop.f32.mrf.mxu0 }
  0xcd   :  { %v156_v49 = vadd.f32 %v6849_v47, %v60_v46 }
  0xce   :  { %v150_v50 = vpop.f32.mrf.mxu0 }
  0xcf   :  { %162 = vst [vmem:[#allocation2 + $0x18] sm:$0xff] %v156_v49  ;;  %v151_v51 = vadd.f32 %v150_v50, %v59_v48 }
  0xd1   :  { %161 = vst [vmem:[#allocation2 + $0x10] sm:$0xff] %v151_v51 }
  0xd2   :  { %v185_v17 = vld [vmem:[#allocation2] sm:$0xf]  ;;  %v351_v52 = vpop.f32.mrf.mxu0  ;;  %v626_v59 = vld [vmem:[#allocation2 + $0x4] sm:$0xf] }
  0xd3   :  { %v260_v18 = vadd.f32 %v256_v15, %v185_v17 }
  0xd4   :  { %v6871_v53 = vpop.f32.mrf.mxu0 }
  0xd5   :  { %7446 = vtanh.f32 %v260_v18  ;;  %v6215_v20 = vmul.f32 -1.442695, %v260_v18 }
  0xd7   :  { %7448 = vpow2.f32 %v6215_v20 }
  0xda   :  { %v7933_v54 = vpop.f32.mrf.mxu0 }
  0xdc   :  { %v6893_v55 = vpop.f32.mrf.mxu0 }
  0xe2   :  { %v7447_v19 = vpop.eup %7446 }
  0xe3   :  { %270 = vrot.lane.b32.xlu0 %v7447_v19, %s7668_s22 }
  0xe4   :  { %v7449_v21 = vpop.eup %7448 }
  0xe5   :  { %v264_v22 = vadd.f32 1.0, %v7449_v21 }
  0xe7   :  { %7450 = vrcp.f32 %v264_v22 }
  0xf4   :  { %v7808_v23 = vpop.eup %7450 }
  0xf5   :  { %v268_v26 = vmul.f32 0.0, %v7808_v23 }
 0x155   :  { %v271_v24 = vpop.permute.xlu0 %270 }
 0x156   :  { %v273_v25 = vmul.f32 %v7808_v23, %v271_v24 }
 0x158   :  { %275 = vrot.lane.b32.xlu0 %v273_v25, %s7668_s22 }
 0x1ca   :  { %v276_v27 = vpop.permute.xlu0 %275 }
 0x1cb   :  { %v7813_v28 = vadd.f32 %v276_v27, %v268_v26  ;;  %v7969_v27 = vld [vmem:[%s9680_s7 + $0x18] sm:$0xff] }
 0x1cd   :  { %7452 = vtanh.f32 %v7813_v28 }
 0x1da   :  { %v7453_v40 = vpop.eup %7452 }
 0x1db   :  { %281 = vrot.lane.b32.xlu1 %v7453_v40, %s7668_s22 }
 0x24d   :  { %v282_v44 = vpop.permute.xlu1 %281 }
 0x24e   :  { %v284_v45 = vmul.f32 %v7808_v23, %v282_v44  ;;  %v7992_v44 = vld [vmem:[%s9680_s7] sm:$0xff] }
 0x250   :  { %356 = vrot.lane.b32.xlu1 %v284_v45, %s7669_s18 }
 0x2c2   :  { %v357_v56 = vpop.permute.xlu1 %356 }
 0x2c3   :  { %6881 = vmatmul.mubr.msk.f32.vlgmr.msra.gmra.mxu1 %vm186_vm2, %v357_v56  ;;  %6914 = vmatmul.mubr.msk.f32.vlgmr.msra.gmra.mxu0 %vm186_vm2, %v357_v56 }
 0x2c4   :  { %6928 = vmatpush3.msra.mxu0 %v7844_v34  ;;  %6935 = vmatprep.mubr.msk.f32.mxu0 %vm7667_vm1, %v9688_v3 }
 0x2c5   :  { %6929 = vmatprep.subr.mxu0 %v9688_v3  ;;  %6902 = vmatprep.mubr.msk.f32.mxu1 %vm7667_vm1, %v9688_v3 }
 0x2c6   :  { %6930 = vmatpush3.msra.mxu0 %v7852_v35  ;;  %6895 = vmatpush3.msra.mxu1 %v7969_v27 }
 0x2c7   :  { %6931 = vmatprep.subr.mxu0 %v9688_v3  ;;  %6896 = vmatprep.subr.mxu1 %v9688_v3 }
 0x2c8   :  { %6932 = vmatpush3.msra.mxu0 %v7882_v39 }
 0x2c9   :  { %6933 = vmatprep.subr.mxu0 %v9688_v3 }
 0x2ca   :  { %6934 = vmatpush3.msra.mxu0 %v7897_v42 }
 0x2cb   :  { %6949 = vmatprep.subr.mxu0 %v9688_v3 }
 0x383   :  { %v426_v58 = vpop.f32.mrf.mxu1  ;;  %v693_v60 = vpop.f32.mrf.mxu0 }
 0x384   :  { %v427_v61 = vadd.f32 %v426_v58, %v351_v52  ;;  %v697_v62 = vadd.f32 %v693_v60, %v626_v59  ;;  %v8037_v52 = vld [vmem:[%s9681_s9] sm:$0xf] }
 0x385   :  { %v6882_v63 = vpop.f32.mrf.mxu1  ;;  %v6915_v0 = vpop.f32.mrf.mxu0 }
 0x386   :  { %v430_v1 = vadd.f32 %v427_v61, %v7952_v57  ;;  %7454 = vtanh.f32 %v697_v62  ;;  %v6221_v9 = vmul.f32 -1.442695, %v697_v62 }
 0x388   :  { %7456 = vtanh.f32 %v430_v1  ;;  %v6217_v10 = vmul.f32 -1.442695, %v430_v1 }
 0x389   :  { %7458 = vpow2.f32 %v6221_v9 }
 0x38a   :  { %7460 = vpow2.f32 %v6217_v10 }
 0x393   :  { %v7455_v2 = vpop.eup %7454 }
 0x394   :  { %707 = vrot.lane.b32.xlu1 %v7455_v2, %s7668_s22 }
 0x395   :  { %v7457_v6 = vpop.eup %7456 }
 0x396   :  { %440 = vrot.lane.b32.xlu0 %v7457_v6, %s7668_s22  ;;  %v7459_v11 = vpop.eup %7458 }
 0x397   :  { %v7461_v12 = vpop.eup %7460  ;;  %v701_v13 = vadd.f32 1.0, %v7459_v11 }
 0x398   :  { %v434_v14 = vadd.f32 1.0, %v7461_v12 }
 0x399   :  { %7462 = vrcp.f32 %v701_v13 }
 0x39a   :  { %7464 = vrcp.f32 %v434_v14 }
 0x3a6   :  { %v7463_v15 = vpop.eup %7462 }
 0x3a7   :  { %v7465_v18 = vpop.eup %7464  ;;  %v705_v21 = vmul.f32 %v7463_v15, %v7813_v28  ;;  %v7974_v28 = vld [vmem:[%s9680_s7 + $0x10] sm:$0xff] }
 0x3a8   :  { %v438_v24 = vmul.f32 0.0, %v7465_v18  ;;  %6897 = vmatpush3.msra.mxu1 %v7974_v28 }
 0x3a9   :  { %6898 = vmatprep.subr.mxu1 %v9688_v3 }
 0x3aa   :  { %6899 = vmatpush3.msra.mxu1 %v7981_v29 }
 0x3ab   :  { %6900 = vmatprep.subr.mxu1 %v9688_v3 }
 0x3ac   :  { %6901 = vmatpush3.msra.mxu1 %v7992_v44 }
 0x3ad   :  { %6916 = vmatprep.subr.mxu1 %v9688_v3 }
 0x406   :  { %v708_v16 = vpop.permute.xlu1 %707 }
 0x407   :  { %v710_v17 = vmul.f32 %v7463_v15, %v708_v16 }
 0x408   :  { %v441_v19 = vpop.permute.xlu0 %440 }
 0x409   :  { %v443_v20 = vmul.f32 %v7465_v18, %v441_v19  ;;  %712 = vrot.lane.b32.xlu1 %v710_v17, %s7668_s22 }
 0x40b   :  { %445 = vrot.lane.b32.xlu0 %v443_v20, %s7668_s22 }
 0x47b   :  { %v713_v22 = vpop.permute.xlu1 %712 }
 0x47c   :  { %v7960_v23 = vadd.f32 %v713_v22, %v705_v21 }
 0x47d   :  { %v446_v25 = vpop.permute.xlu0 %445 }
 0x47e   :  { %7466 = vtanh.f32 %v7960_v23  ;;  %v7963_v26 = vadd.f32 %v446_v25, %v438_v24 }
 0x480   :  { %7468 = vtanh.f32 %v7963_v26 }
 0x48b   :  { %v7467_v30 = vpop.eup %7466 }
 0x48c   :  { %718 = vrot.lane.b32.xlu1 %v7467_v30, %s7668_s22 }
 0x48d   :  { %v7469_v40 = vpop.eup %7468 }
 0x48e   :  { %451 = vrot.lane.b32.xlu0 %v7469_v40, %s7668_s22 }
 0x4fe   :  { %v719_v45 = vpop.permute.xlu1 %718 }
 0x4ff   :  { %v721_v46 = vmul.f32 %v7463_v15, %v719_v45 }
 0x500   :  { %v452_v47 = vpop.permute.xlu0 %451 }
 0x501   :  { %v454_v48 = vmul.f32 %v7465_v18, %v452_v47  ;;  %793 = vrot.lane.b32.xlu1 %v721_v46, %s7669_s18 }
 0x503   :  { %526 = vrot.lane.b32.xlu0 %v454_v48, %s7669_s18 }
 0x573   :  { %v7998_v49 = vpop.permute.xlu1 %793 }
 0x574   :  { %6936 = vmatmul.mubr.msk.f32.vlgmr.msra.gmra.mxu0 %vm186_vm2, %v7998_v49 }
 0x575   :  { %v527_v50 = vpop.permute.xlu0 %526  ;;  %6950 = vmatpush3.msra.mxu0 %v7969_v27  ;;  %6957 = vmatprep.mubr.msk.f32.mxu0 %vm7667_vm1, %v9688_v3 }
 0x576   :  { %6903 = vmatmul.mubr.msk.f32.vlgmr.msra.gmra.mxu1 %vm186_vm2, %v527_v50  ;;  %6951 = vmatprep.subr.mxu0 %v9688_v3 }
 0x577   :  { %6917 = vmatpush3.msra.mxu1 %v7825_v31  ;;  %6924 = vmatprep.mubr.msk.f32.mxu1 %vm7667_vm1, %v9688_v3 }
 0x578   :  { %6918 = vmatprep.subr.mxu1 %v9688_v3  ;;  %6952 = vmatpush3.msra.mxu0 %v7974_v28 }
 0x579   :  { %6919 = vmatpush3.msra.mxu1 %v7830_v32  ;;  %6953 = vmatprep.subr.mxu0 %v9688_v3 }
 0x57a   :  { %6920 = vmatprep.subr.mxu1 %v9688_v3  ;;  %6954 = vmatpush3.msra.mxu0 %v7981_v29 }
 0x57b   :  { %6921 = vmatpush3.msra.mxu1 %v7839_v33  ;;  %6955 = vmatprep.subr.mxu0 %v9688_v3 }
 0x57c   :  { %6922 = vmatprep.subr.mxu1 %v9688_v3  ;;  %6956 = vmatpush3.msra.mxu0 %v7992_v44 }
 0x57d   :  { %6923 = vmatpush3.msra.mxu1 %v7858_v36  ;;  %6971 = vmatprep.subr.mxu0 %v9688_v3 }
 0x57e   :  { %6925 = vmatmul.mubr.msk.f32.vlgmr.msra.gmra.mxu1 %vm186_vm2, %v527_v50  ;;  %6938 = vmatprep.subr.mxu1 %v9688_v3 }
 0x57f   :  { %6939 = vmatpush3.msra.mxu1 %v7867_v37  ;;  %6946 = vmatprep.mubr.msk.f32.mxu1 %vm7667_vm1, %v9688_v3 }
 0x580   :  { %6940 = vmatprep.subr.mxu1 %v9688_v3 }
 0x581   :  { %6941 = vmatpush3.msra.mxu1 %v7877_v38 }
 0x582   :  { %6942 = vmatprep.subr.mxu1 %v9688_v3 }
 0x583   :  { %6943 = vmatpush3.msra.mxu1 %v7892_v41 }
 0x584   :  { %6944 = vmatprep.subr.mxu1 %v9688_v3 }
 0x585   :  { %6945 = vmatpush3.msra.mxu1 %v7905_v43 }
 0x586   :  { %6960 = vmatprep.subr.mxu1 %v9688_v3 }
 0x634   :  { %v863_v51 = vpop.f32.mrf.mxu0 }
 0x636   :  { %v596_v53 = vpop.f32.mrf.mxu1  ;;  %v6937_v55 = vpop.f32.mrf.mxu0 }
 0x637   :  { %v597_v56 = vadd.f32 %v596_v53, %v7933_v54  ;;  %v1068_v53 = vld [vmem:[#allocation2 + $0x8] sm:$0xf] }
 0x638   :  { %v6904_v58 = vpop.f32.mrf.mxu1 }
 0x639   :  { %v600_v59 = vadd.f32 %v597_v56, %v8037_v52 }
 0x63b   :  { %7470 = vtanh.f32 %v600_v59  ;;  %v6219_v2 = vmul.f32 -1.442695, %v600_v59 }
 0x63e   :  { %v788_v60 = vpop.f32.mrf.mxu1 }
 0x63f   :  { %v864_v61 = vadd.f32 %v863_v51, %v788_v60 }
 0x640   :  { %v6926_v62 = vpop.f32.mrf.mxu1 }
 0x641   :  { %v867_v63 = vadd.f32 %v864_v61, %v7952_v57 }
 0x643   :  { %7472 = vtanh.f32 %v867_v63  ;;  %v6224_v6 = vmul.f32 -1.442695, %v867_v63 }
 0x644   :  { %7474 = vpow2.f32 %v6219_v2 }
 0x645   :  { %7476 = vpow2.f32 %v6224_v6 }
 0x648   :  { %v7471_v0 = vpop.eup %7470 }
 0x649   :  { %610 = vrot.lane.b32.xlu0 %v7471_v0, %s7668_s22 }
 0x650   :  { %v7473_v1 = vpop.eup %7472 }
 0x651   :  { %877 = vrot.lane.b32.xlu1 %v7473_v1, %s7668_s22  ;;  %v7475_v54 = vpop.eup %7474 }
 0x652   :  { %v604_v9 = vadd.f32 1.0, %v7475_v54  ;;  %v7477_v10 = vpop.eup %7476 }
 0x653   :  { %v871_v11 = vadd.f32 1.0, %v7477_v10 }
 0x654   :  { %7478 = vrcp.f32 %v604_v9 }
 0x655   :  { %7480 = vrcp.f32 %v871_v11 }
 0x661   :  { %v7479_v12 = vpop.eup %7478 }
 0x662   :  { %v7481_v15 = vpop.eup %7480  ;;  %v608_v18 = vmul.f32 0.0, %v7479_v12 }
 0x663   :  { %v875_v21 = vmul.f32 %v7481_v15, %v7963_v26 }
 0x6bb   :  { %v611_v13 = vpop.permute.xlu0 %610 }
 0x6bc   :  { %v613_v14 = vmul.f32 %v7479_v12, %v611_v13 }
 0x6be   :  { %615 = vrot.lane.b32.xlu0 %v613_v14, %s7668_s22 }
 0x6c3   :  { %v878_v16 = vpop.permute.xlu1 %877 }
 0x6c4   :  { %v880_v17 = vmul.f32 %v7481_v15, %v878_v16 }
 0x6c6   :  { %882 = vrot.lane.b32.xlu1 %v880_v17, %s7668_s22 }
 0x730   :  { %v616_v19 = vpop.permute.xlu0 %615 }
 0x731   :  { %v8046_v20 = vadd.f32 %v616_v19, %v608_v18 }
 0x733   :  { %7482 = vtanh.f32 %v8046_v20 }
 0x738   :  { %v883_v22 = vpop.permute.xlu1 %882 }
 0x739   :  { %v8050_v24 = vadd.f32 %v883_v22, %v875_v21 }
 0x73b   :  { %7484 = vtanh.f32 %v8050_v24 }
 0x740   :  { %v7483_v25 = vpop.eup %7482 }
 0x741   :  { %621 = vrot.lane.b32.xlu0 %v7483_v25, %s7668_s22 }
 0x748   :  { %v7485_v30 = vpop.eup %7484 }
 0x749   :  { %888 = vrot.lane.b32.xlu1 %v7485_v30, %s7668_s22 }
 0x7b3   :  { %v622_v40 = vpop.permute.xlu0 %621 }
 0x7b4   :  { %v624_v45 = vmul.f32 %v7479_v12, %v622_v40 }
 0x7b6   :  { %893 = vrot.lane.b32.xlu0 %v624_v45, %s7669_s18 }
 0x7bb   :  { %v889_v46 = vpop.permute.xlu1 %888 }
 0x7bc   :  { %v891_v47 = vmul.f32 %v7481_v15, %v889_v46 }
 0x7be   :  { %968 = vrot.lane.b32.xlu1 %v891_v47, %s7669_s18 }
 0x828   :  { %v894_v26 = vpop.permute.xlu0 %893 }
 0x829   :  { %6947 = vmatmul.mubr.msk.f32.vlgmr.msra.gmra.mxu1 %vm186_vm2, %v894_v26 }
 0x82a   :  { %6961 = vmatpush3.msra.mxu1 %v7768_v4  ;;  %6968 = vmatprep.mubr.msk.f32.mxu1 %vm7667_vm1, %v9688_v3 }
 0x82b   :  { %6962 = vmatprep.subr.mxu1 %v9688_v3 }
 0x82c   :  { %6963 = vmatpush3.msra.mxu1 %v7773_v5 }
 0x82d   :  { %6964 = vmatprep.subr.mxu1 %v9688_v3 }
 0x82e   :  { %6965 = vmatpush3.msra.mxu1 %v7783_v7 }
 0x82f   :  { %6966 = vmatprep.subr.mxu1 %v9688_v3 }
 0x830   :  { %6967 = vmatpush3.msra.mxu1 %v7791_v8  ;;  %v969_v48 = vpop.permute.xlu1 %968 }
 0x831   :  { %6958 = vmatmul.mubr.msk.f32.vlgmr.msra.gmra.mxu0 %vm186_vm2, %v969_v48  ;;  %6969 = vmatmul.mubr.msk.f32.vlgmr.msra.gmra.mxu1 %vm186_vm2, %v7998_v49 }
 0x832   :  { %6972 = vmatpush3.msra.mxu0 %v7825_v31  ;;  %6979 = vmatprep.mubr.msk.f32.mxu0 %vm7667_vm1, %v9688_v3 }
 0x833   :  { %6973 = vmatprep.subr.mxu0 %v9688_v3  ;;  %6982 = vmatprep.subr.mxu1 %v9688_v3 }
 0x834   :  { %6974 = vmatpush3.msra.mxu0 %v7830_v32  ;;  %6983 = vmatpush3.msra.mxu1 %v7844_v34 }
 0x835   :  { %6975 = vmatprep.subr.mxu0 %v9688_v3  ;;  %6984 = vmatprep.subr.mxu1 %v9688_v3 }
 0x836   :  { %6976 = vmatpush3.msra.mxu0 %v7839_v33  ;;  %6985 = vmatpush3.msra.mxu1 %v7852_v35 }
 0x837   :  { %6977 = vmatprep.subr.mxu0 %v9688_v3  ;;  %6986 = vmatprep.subr.mxu1 %v9688_v3 }
 0x838   :  { %6978 = vmatpush3.msra.mxu0 %v7858_v36  ;;  %6987 = vmatpush3.msra.mxu1 %v7882_v39 }
 0x839   :  { %6980 = vmatmul.mubr.msk.f32.vlgmr.msra.gmra.mxu0 %vm186_vm2, %v969_v48  ;;  %6993 = vmatprep.subr.mxu0 %v9688_v3 }
 0x83a   :  { %6994 = vmatpush3.msra.mxu0 %v7867_v37  ;;  %6988 = vmatprep.subr.mxu1 %v9688_v3 }
 0x83b   :  { %6995 = vmatprep.subr.mxu0 %v9688_v3  ;;  %6989 = vmatpush3.msra.mxu1 %v7897_v42 }
 0x83c   :  { %6996 = vmatpush3.msra.mxu0 %v7877_v38  ;;  %6990 = vmatprep.mubr.msk.f32.mxu1 %vm7667_vm1, %v9688_v3 }
 0x83d   :  { %6997 = vmatprep.subr.mxu0 %v9688_v3  ;;  %7001 = vmatprep.mubr.msk.f32.mxu0 %vm7667_vm1, %v9688_v3 }
 0x83e   :  { %6998 = vmatpush3.msra.mxu0 %v7892_v41  ;;  %7004 = vmatprep.subr.mxu1 %v9688_v3 }
 0x83f   :  { %6999 = vmatprep.subr.mxu0 %v9688_v3 }
 0x840   :  { %7000 = vmatpush3.msra.mxu0 %v7905_v43 }
 0x841   :  { %7015 = vmatprep.subr.mxu0 %v9688_v3 }
 0x8e9   :  { %v963_v49 = vpop.f32.mrf.mxu1 }
 0x8eb   :  { %v6948_v50 = vpop.f32.mrf.mxu1 }
 0x8f1   :  { %v1038_v51 = vpop.f32.mrf.mxu0  ;;  %v1135_v55 = vpop.f32.mrf.mxu1 }
 0x8f2   :  { %v1039_v56 = vadd.f32 %v1038_v51, %v963_v49  ;;  %v1139_v58 = vadd.f32 %v1135_v55, %v1068_v53  ;;  %v1510_v51 = vld [vmem:[#allocation2 + $0xc] sm:$0xf] }
 0x8f3   :  { %v6959_v59 = vpop.f32.mrf.mxu0  ;;  %v6970_v60 = vpop.f32.mrf.mxu1 }
 0x8f4   :  { %v1042_v61 = vadd.f32 %v1039_v56, %v8037_v52  ;;  %7486 = vtanh.f32 %v1139_v58  ;;  %v6229_v2 = vmul.f32 -1.442695, %v1139_v58 }
 0x8f6   :  { %7488 = vtanh.f32 %v1042_v61  ;;  %v6227_v6 = vmul.f32 -1.442695, %v1042_v61 }
 0x8f7   :  { %7490 = vpow2.f32 %v6229_v2 }
 0x8f8   :  { %7492 = vpow2.f32 %v6227_v6 }
 0x8f9   :  { %v8103_v62 = vpop.f32.mrf.mxu0 }
 0x8fb   :  { %v6981_v63 = vpop.f32.mrf.mxu0 }
 0x901   :  { %v7487_v0 = vpop.eup %7486 }
 0x902   :  { %1149 = vrot.lane.b32.xlu0 %v7487_v0, %s7668_s22 }
 0x903   :  { %v7489_v1 = vpop.eup %7488 }
 0x904   :  { %1052 = vrot.lane.b32.xlu1 %v7489_v1, %s7668_s22  ;;  %v7491_v54 = vpop.eup %7490 }
 0x905   :  { %v7493_v9 = vpop.eup %7492  ;;  %v1143_v10 = vadd.f32 1.0, %v7491_v54 }
 0x906   :  { %v1046_v11 = vadd.f32 1.0, %v7493_v9 }
 0x907   :  { %7494 = vrcp.f32 %v1143_v10 }
 0x908   :  { %7496 = vrcp.f32 %v1046_v11 }
 0x914   :  { %v7495_v12 = vpop.eup %7494 }
 0x915   :  { %v7497_v15 = vpop.eup %7496  ;;  %v1147_v18 = vmul.f32 %v7495_v12, %v7960_v23 }
 0x916   :  { %v1050_v22 = vmul.f32 %v7497_v15, %v8046_v20 }
 0x974   :  { %v1150_v13 = vpop.permute.xlu0 %1149 }
 0x975   :  { %v1152_v14 = vmul.f32 %v7495_v12, %v1150_v13 }
 0x976   :  { %v1053_v16 = vpop.permute.xlu1 %1052 }
 0x977   :  { %v1055_v17 = vmul.f32 %v7497_v15, %v1053_v16  ;;  %1154 = vrot.lane.b32.xlu0 %v1152_v14, %s7668_s22 }
 0x979   :  { %1057 = vrot.lane.b32.xlu1 %v1055_v17, %s7668_s22 }
 0x9e9   :  { %v1155_v19 = vpop.permute.xlu0 %1154 }
 0x9ea   :  { %v8110_v21 = vadd.f32 %v1155_v19, %v1147_v18 }
 0x9eb   :  { %v1058_v25 = vpop.permute.xlu1 %1057 }
 0x9ec   :  { %7498 = vtanh.f32 %v8110_v21  ;;  %v8114_v30 = vadd.f32 %v1058_v25, %v1050_v22 }
 0x9ee   :  { %7500 = vtanh.f32 %v8114_v30 }
 0x9f9   :  { %v7499_v40 = vpop.eup %7498 }
 0x9fa   :  { %1160 = vrot.lane.b32.xlu0 %v7499_v40, %s7668_s22 }
 0x9fb   :  { %v7501_v45 = vpop.eup %7500 }
 0x9fc   :  { %1063 = vrot.lane.b32.xlu1 %v7501_v45, %s7668_s22 }
 0xa6c   :  { %v1161_v46 = vpop.permute.xlu0 %1160 }
 0xa6d   :  { %v1163_v23 = vmul.f32 %v7495_v12, %v1161_v46 }
 0xa6e   :  { %v1064_v47 = vpop.permute.xlu1 %1063 }
 0xa6f   :  { %v1066_v26 = vmul.f32 %v7497_v15, %v1064_v47  ;;  %1235 = vrot.lane.b32.xlu0 %v1163_v23, %s7669_s18 }
 0xa71   :  { %1335 = vrot.lane.b32.xlu1 %v1066_v26, %s7669_s18 }
 0xae1   :  { %v1236_v20 = vpop.permute.xlu0 %1235 }
 0xae2   :  { %6991 = vmatmul.mubr.msk.f32.vlgmr.msra.gmra.mxu1 %vm186_vm2, %v1236_v20 }
 0xae3   :  { %v1336_v48 = vpop.permute.xlu1 %1335  ;;  %7005 = vmatpush3.msra.mxu1 %v7969_v27  ;;  %7012 = vmatprep.mubr.msk.f32.mxu1 %vm7667_vm1, %v9688_v3 }
 0xae4   :  { %7002 = vmatmul.mubr.msk.f32.vlgmr.msra.gmra.mxu0 %vm186_vm2, %v1336_v48  ;;  %7006 = vmatprep.subr.mxu1 %v9688_v3 }
 0xae5   :  { %7016 = vmatpush3.msra.mxu0 %v7768_v4  ;;  %7023 = vmatprep.mubr.msk.f32.mxu0 %vm7667_vm1, %v9688_v3 }
 0xae6   :  { %7017 = vmatprep.subr.mxu0 %v9688_v3  ;;  %7007 = vmatpush3.msra.mxu1 %v7974_v28 }
 0xae7   :  { %7018 = vmatpush3.msra.mxu0 %v7773_v5  ;;  %7008 = vmatprep.subr.mxu1 %v9688_v3 }
 0xae8   :  { %7019 = vmatprep.subr.mxu0 %v9688_v3  ;;  %7009 = vmatpush3.msra.mxu1 %v7981_v29 }
 0xae9   :  { %7020 = vmatpush3.msra.mxu0 %v7783_v7  ;;  %7010 = vmatprep.subr.mxu1 %v9688_v3 }
 0xaea   :  { %7021 = vmatprep.subr.mxu0 %v9688_v3  ;;  %7011 = vmatpush3.msra.mxu1 %v7992_v44 }
 0xaeb   :  { %7022 = vmatpush3.msra.mxu0 %v7791_v8  ;;  %7026 = vmatprep.subr.mxu1 %v9688_v3 }
 0xaec   :  { %7024 = vmatmul.mubr.msk.f32.vlgmr.msra.gmra.mxu0 %vm186_vm2, %v1236_v20  ;;  %7037 = vmatprep.subr.mxu0 %v9688_v3 }
 0xaed   :  { %7038 = vmatpush3.msra.mxu0 %v7844_v34  ;;  %7045 = vmatprep.mubr.msk.f32.mxu0 %vm7667_vm1, %v9688_v3 }
 0xaee   :  { %7039 = vmatprep.subr.mxu0 %v9688_v3 }
 0xaef   :  { %7040 = vmatpush3.msra.mxu0 %v7852_v35 }
 0xaf0   :  { %7041 = vmatprep.subr.mxu0 %v9688_v3 }
 0xaf1   :  { %7042 = vmatpush3.msra.mxu0 %v7882_v39 }
 0xaf2   :  { %7043 = vmatprep.subr.mxu0 %v9688_v3 }
 0xaf3   :  { %7044 = vmatpush3.msra.mxu0 %v7897_v42 }
 0xaf4   :  { %7059 = vmatprep.subr.mxu0 %v9688_v3 }
 0xba2   :  { %v1305_v4 = vpop.f32.mrf.mxu1 }
 0xba3   :  { %v1306_v5 = vadd.f32 %v1305_v4, %v8103_v62 }
 0xba4   :  { %v6992_v7 = vpop.f32.mrf.mxu1  ;;  %v8155_v8 = vpop.f32.mrf.mxu0 }
 0xba5   :  { %v1309_v49 = vadd.f32 %v1306_v5, %v7952_v57 }
 0xba6   :  { %v7003_v50 = vpop.f32.mrf.mxu0 }
 0xba7   :  { %7502 = vtanh.f32 %v1309_v49  ;;  %v6232_v60 = vmul.f32 -1.442695, %v1309_v49 }
 0xbac   :  { %v1577_v53 = vpop.f32.mrf.mxu0 }
 0xbad   :  { %v1581_v55 = vadd.f32 %v1577_v53, %v1510_v51 }
 0xbae   :  { %v7025_v56 = vpop.f32.mrf.mxu0 }
 0xbaf   :  { %7504 = vtanh.f32 %v1581_v55  ;;  %v6237_v61 = vmul.f32 -1.442695, %v1581_v55 }
 0xbb0   :  { %7506 = vpow2.f32 %v6232_v60 }
 0xbb1   :  { %7508 = vpow2.f32 %v6237_v61 }
 0xbb4   :  { %v7503_v58 = vpop.eup %7502 }
 0xbb5   :  { %1319 = vrot.lane.b32.xlu0 %v7503_v58, %s7668_s22 }
 0xbbc   :  { %v7505_v59 = vpop.eup %7504 }
 0xbbd   :  { %1591 = vrot.lane.b32.xlu1 %v7505_v59, %s7668_s22  ;;  %v7507_v62 = vpop.eup %7506 }
 0xbbe   :  { %v1313_v63 = vadd.f32 1.0, %v7507_v62  ;;  %v7509_v0 = vpop.eup %7508 }
 0xbbf   :  { %v1585_v1 = vadd.f32 1.0, %v7509_v0 }
 0xbc0   :  { %7510 = vrcp.f32 %v1313_v63 }
 0xbc1   :  { %7512 = vrcp.f32 %v1585_v1 }
 0xbcd   :  { %v7511_v2 = vpop.eup %7510 }
 0xbce   :  { %v7513_v9 = vpop.eup %7512  ;;  %v1317_v12 = vmul.f32 %v7511_v2, %v8050_v24 }
 0xbcf   :  { %v1589_v15 = vmul.f32 %v7513_v9, %v8110_v21 }
 0xc27   :  { %v1320_v6 = vpop.permute.xlu0 %1319 }
 0xc28   :  { %v1322_v54 = vmul.f32 %v7511_v2, %v1320_v6 }
 0xc2a   :  { %1324 = vrot.lane.b32.xlu0 %v1322_v54, %s7668_s22 }
 0xc2f   :  { %v1592_v10 = vpop.permute.xlu1 %1591 }
 0xc30   :  { %v1594_v11 = vmul.f32 %v7513_v9, %v1592_v10 }
 0xc32   :  { %1596 = vrot.lane.b32.xlu1 %v1594_v11, %s7668_s22 }
 0xc9c   :  { %v1325_v13 = vpop.permute.xlu0 %1324 }
 0xc9d   :  { %v8163_v14 = vadd.f32 %v1325_v13, %v1317_v12 }
 0xc9f   :  { %7514 = vtanh.f32 %v8163_v14 }
 0xca4   :  { %v1597_v16 = vpop.permute.xlu1 %1596 }
 0xca5   :  { %v8167_v17 = vadd.f32 %v1597_v16, %v1589_v15  ;;  %v8242_v15 = vld [vmem:[%s9674_s2 + $0x10] sm:$0xff]  ;;  %v8249_v16 = vld [vmem:[%s9674_s2 + $0x8] sm:$0xff] }
 0xca7   :  { %7516 = vtanh.f32 %v8167_v17 }
 0xcac   :  { %v7515_v18 = vpop.eup %7514 }
 0xcad   :  { %1330 = vrot.lane.b32.xlu0 %v7515_v18, %s7668_s22  ;;  %v8256_v18 = vld [vmem:[%s9674_s2] sm:$0xff] }
 0xcb4   :  { %v7517_v19 = vpop.eup %7516 }
 0xcb5   :  { %1602 = vrot.lane.b32.xlu1 %v7517_v19, %s7668_s22 }
 0xd1f   :  { %v1331_v22 = vpop.permute.xlu0 %1330 }
 0xd20   :  { %v1333_v24 = vmul.f32 %v7511_v2, %v1331_v22  ;;  %v8265_v22 = vld [vmem:[%s9676_s5 + $0x18] sm:$0xff] }
 0xd22   :  { %1410 = vrot.lane.b32.xlu0 %v1333_v24, %s7669_s18  ;;  %v8275_v24 = vld [vmem:[%s9676_s5 + $0x10] sm:$0xff] }
 0xd27   :  { %v1603_v25 = vpop.permute.xlu1 %1602 }
 0xd28   :  { %v1605_v40 = vmul.f32 %v7513_v9, %v1603_v25  ;;  %v8284_v25 = vld [vmem:[%s9676_s5 + $0x8] sm:$0xff] }
 0xd2a   :  { %1677 = vrot.lane.b32.xlu1 %v1605_v40, %s7669_s18 }
 0xd94   :  { %v1411_v21 = vpop.permute.xlu0 %1410 }
 0xd95   :  { %7013 = vmatmul.mubr.msk.f32.vlgmr.msra.gmra.mxu1 %vm186_vm2, %v1411_v21 }
 0xd96   :  { %7027 = vmatpush3.msra.mxu1 %v7825_v31  ;;  %7034 = vmatprep.mubr.msk.f32.mxu1 %vm7667_vm1, %v9688_v3 }
 0xd97   :  { %7028 = vmatprep.subr.mxu1 %v9688_v3 }
 0xd98   :  { %7029 = vmatpush3.msra.mxu1 %v7830_v32 }
 0xd99   :  { %7030 = vmatprep.subr.mxu1 %v9688_v3 }
 0xd9a   :  { %7031 = vmatpush3.msra.mxu1 %v7839_v33 }
 0xd9b   :  { %7032 = vmatprep.subr.mxu1 %v9688_v3 }
 0xd9c   :  { %v8183_v45 = vpop.permute.xlu1 %1677  ;;  %7033 = vmatpush3.msra.mxu1 %v7858_v36 }
 0xd9d   :  { %7035 = vmatmul.mubr.msk.f32.vlgmr.msra.gmra.mxu1 %vm186_vm2, %v1411_v21  ;;  %7046 = vmatmul.mubr.msk.f32.vlgmr.msra.gmra.mxu0 %vm186_vm2, %v8183_v45 }
 0xd9e   :  { %7048 = vmatprep.subr.mxu1 %v9688_v3  ;;  %7056 = vmatprep.mubr.msk.f32.mxu1 %vm7667_vm1, %v9688_v3 }
 0xd9f   :  { %7049 = vmatpush3.msra.mxu1 %v7867_v37  ;;  %7060 = vmatpush3.msra.mxu0 %v7969_v27 }
 0xda0   :  { %7050 = vmatprep.subr.mxu1 %v9688_v3  ;;  %7061 = vmatprep.subr.mxu0 %v9688_v3 }
 0xda1   :  { %7051 = vmatpush3.msra.mxu1 %v7877_v38  ;;  %7062 = vmatpush3.msra.mxu0 %v7974_v28 }
 0xda2   :  { %7052 = vmatprep.subr.mxu1 %v9688_v3  ;;  %7063 = vmatprep.subr.mxu0 %v9688_v3 }
 0xda3   :  { %7053 = vmatpush3.msra.mxu1 %v7892_v41  ;;  %7064 = vmatpush3.msra.mxu0 %v7981_v29 }
 0xda4   :  { %7054 = vmatprep.subr.mxu1 %v9688_v3  ;;  %7065 = vmatprep.subr.mxu0 %v9688_v3 }
 0xda5   :  { %7055 = vmatpush3.msra.mxu1 %v7905_v43  ;;  %7066 = vmatpush3.msra.mxu0 %v7992_v44 }
 0xda6   :  { %7070 = vmatprep.subr.mxu1 %v9688_v3  ;;  %7067 = vmatprep.mubr.msk.f32.mxu0 %vm7667_vm1, %v9688_v3 }
 0xda7   :  { %7081 = vmatprep.subr.mxu0 %v9688_v3 }
 0xe55   :  { %v1480_v31 = vpop.f32.mrf.mxu1 }
 0xe56   :  { %v1481_v32 = vadd.f32 %v1480_v31, %v8155_v8 }
 0xe57   :  { %v7014_v33 = vpop.f32.mrf.mxu1 }
 0xe58   :  { %v1484_v46 = vadd.f32 %v1481_v32, %v8037_v52 }
 0xe5a   :  { %7518 = vtanh.f32 %v1484_v46  ;;  %v6235_v49 = vmul.f32 -1.442695, %v1484_v46 }
 0xe5d   :  { %v1672_v23 = vpop.f32.mrf.mxu1  ;;  %v1747_v47 = vpop.f32.mrf.mxu0 }
 0xe5e   :  { %v1748_v26 = vadd.f32 %v1747_v47, %v1672_v23 }
 0xe5f   :  { %v7036_v20 = vpop.f32.mrf.mxu1  ;;  %v7047_v48 = vpop.f32.mrf.mxu0 }
 0xe60   :  { %v1751_v4 = vadd.f32 %v1748_v26, %v7952_v57 }
 0xe62   :  { %7520 = vtanh.f32 %v1751_v4  ;;  %v6240_v8 = vmul.f32 -1.442695, %v1751_v4 }
 0xe63   :  { %7522 = vpow2.f32 %v6235_v49 }
 0xe64   :  { %7524 = vpow2.f32 %v6240_v8 }
 0xe67   :  { %v7519_v5 = vpop.eup %7518 }
 0xe68   :  { %1494 = vrot.lane.b32.xlu0 %v7519_v5, %s7668_s22 }
 0xe6f   :  { %v7521_v7 = vpop.eup %7520 }
 0xe70   :  { %1761 = vrot.lane.b32.xlu1 %v7521_v7, %s7668_s22  ;;  %v7523_v50 = vpop.eup %7522 }
 0xe71   :  { %v1488_v51 = vadd.f32 1.0, %v7523_v50  ;;  %v7525_v53 = vpop.eup %7524 }
 0xe72   :  { %v1755_v55 = vadd.f32 1.0, %v7525_v53 }
 0xe73   :  { %7526 = vrcp.f32 %v1488_v51 }
 0xe74   :  { %7528 = vrcp.f32 %v1755_v55 }
 0xe80   :  { %v7527_v56 = vpop.eup %7526 }
 0xe81   :  { %v7529_v59 = vpop.eup %7528  ;;  %v1492_v62 = vmul.f32 %v7527_v56, %v8114_v30 }
 0xe82   :  { %v1759_v1 = vmul.f32 %v7529_v59, %v8163_v14  ;;  %v8233_v14 = vld [vmem:[%s9674_s2 + $0x18] sm:$0xff] }
 0xeda   :  { %v1495_v58 = vpop.permute.xlu0 %1494 }
 0xedb   :  { %v1497_v57 = vmul.f32 %v7527_v56, %v1495_v58 }
 0xedd   :  { %1499 = vrot.lane.b32.xlu0 %v1497_v57, %s7668_s22 }
 0xee2   :  { %v1762_v60 = vpop.permute.xlu1 %1761 }
 0xee3   :  { %v1764_v61 = vmul.f32 %v7529_v59, %v1762_v60 }
 0xee5   :  { %1766 = vrot.lane.b32.xlu1 %v1764_v61, %s7668_s22 }
 0xf4f   :  { %v1500_v63 = vpop.permute.xlu0 %1499 }
 0xf50   :  { %v8218_v0 = vadd.f32 %v1500_v63, %v1492_v62 }
 0xf52   :  { %7530 = vtanh.f32 %v8218_v0 }
 0xf57   :  { %v1767_v2 = vpop.permute.xlu1 %1766 }
 0xf58   :  { %v8222_v6 = vadd.f32 %v1767_v2, %v1759_v1 }
 0xf5a   :  { %7532 = vtanh.f32 %v8222_v6 }
 0xf5f   :  { %v7531_v54 = vpop.eup %7530 }
 0xf60   :  { %1505 = vrot.lane.b32.xlu0 %v7531_v54, %s7668_s22 }
 0xf67   :  { %v7533_v9 = vpop.eup %7532 }
 0xf68   :  { %1772 = vrot.lane.b32.xlu1 %v7533_v9, %s7668_s22  ;;  %v8387_v9 = vld [vmem:[%s9679_s6] sm:$0xf] }
 0xfd2   :  { %v1506_v10 = vpop.permute.xlu0 %1505 }
 0xfd3   :  { %v1508_v30 = vmul.f32 %v7527_v56, %v1506_v10 }
 0xfd5   :  { %1777 = vrot.lane.b32.xlu0 %v1508_v30, %s7669_s18 }
 0xfda   :  { %v1773_v11 = vpop.permute.xlu1 %1772 }
 0xfdb   :  { %v1775_v12 = vmul.f32 %v7529_v59, %v1773_v11  ;;  %v2394_v11 = vld [vmem:[#allocation2 + $0x14] sm:$0xf] }
 0xfdd   :  { %1852 = vrot.lane.b32.xlu1 %v1775_v12, %s7669_s18 }
0x1047   :  { %v1778_v13 = vpop.permute.xlu0 %1777 }
0x1048   :  { %7057 = vmatmul.mubr.msk.f32.vlgmr.msra.gmra.mxu1 %vm186_vm2, %v1778_v13 }
0x1049   :  { %7071 = vmatpush3.msra.mxu1 %v8233_v14  ;;  %7078 = vmatprep.mubr.msk.f32.mxu1 %vm7667_vm1, %v9688_v3 }
0x104a   :  { %7072 = vmatprep.subr.mxu1 %v9688_v3 }
0x104b   :  { %7073 = vmatpush3.msra.mxu1 %v8242_v15 }
0x104c   :  { %7074 = vmatprep.subr.mxu1 %v9688_v3 }
0x104d   :  { %7075 = vmatpush3.msra.mxu1 %v8249_v16 }
0x104e   :  { %7076 = vmatprep.subr.mxu1 %v9688_v3 }
0x104f   :  { %7077 = vmatpush3.msra.mxu1 %v8256_v18  ;;  %v1853_v19 = vpop.permute.xlu1 %1852 }
0x1050   :  { %7068 = vmatmul.mubr.msk.f32.vlgmr.msra.gmra.mxu0 %vm186_vm2, %v1853_v19  ;;  %7079 = vmatmul.mubr.msk.f32.vlgmr.msra.gmra.mxu1 %vm186_vm2, %v8183_v45 }
0x1051   :  { %7082 = vmatpush3.msra.mxu0 %v8265_v22  ;;  %7089 = vmatprep.mubr.msk.f32.mxu0 %vm7667_vm1, %v9688_v3 }
0x1052   :  { %7083 = vmatprep.subr.mxu0 %v9688_v3  ;;  %7092 = vmatprep.subr.mxu1 %v9688_v3 }
0x1053   :  { %7084 = vmatpush3.msra.mxu0 %v8275_v24  ;;  %7093 = vmatpush3.msra.mxu1 %v7844_v34 }
0x1054   :  { %7085 = vmatprep.subr.mxu0 %v9688_v3  ;;  %7094 = vmatprep.subr.mxu1 %v9688_v3 }
0x1055   :  { %7086 = vmatpush3.msra.mxu0 %v8284_v25  ;;  %7095 = vmatpush3.msra.mxu1 %v7852_v35 }
0x1056   :  { %7087 = vmatprep.subr.mxu0 %v9688_v3  ;;  %7096 = vmatprep.subr.mxu1 %v9688_v3 }
0x1057   :  { %7088 = vmatpush3.msra.mxu0 %v7858_v36  ;;  %7097 = vmatpush3.msra.mxu1 %v7882_v39 }
0x1058   :  { %7090 = vmatmul.mubr.msk.f32.vlgmr.msra.gmra.mxu0 %vm186_vm2, %v1853_v19  ;;  %7103 = vmatprep.subr.mxu0 %v9688_v3 }
0x1059   :  { %7104 = vmatpush3.msra.mxu0 %v7867_v37  ;;  %7098 = vmatprep.subr.mxu1 %v9688_v3  ;;  %v1952_v37 = vld [vmem:[#allocation2 + $0x10] sm:$0xf] }
0x105a   :  { %7105 = vmatprep.subr.mxu0 %v9688_v3  ;;  %7099 = vmatpush3.msra.mxu1 %v7897_v42 }
0x105b   :  { %7106 = vmatpush3.msra.mxu0 %v7877_v38  ;;  %7100 = vmatprep.mubr.msk.f32.mxu1 %vm7667_vm1, %v9688_v3 }
0x105c   :  { %7107 = vmatprep.subr.mxu0 %v9688_v3  ;;  %7111 = vmatprep.mubr.msk.f32.mxu0 %vm7667_vm1, %v9688_v3 }
0x105d   :  { %7108 = vmatpush3.msra.mxu0 %v7892_v41  ;;  %7114 = vmatprep.subr.mxu1 %v9688_v3 }
0x105e   :  { %7109 = vmatprep.subr.mxu0 %v9688_v3 }
0x105f   :  { %7110 = vmatpush3.msra.mxu0 %v7905_v43 }
0x1060   :  { %7125 = vmatprep.subr.mxu0 %v9688_v3 }
0x1108   :  { %v1847_v34 = vpop.f32.mrf.mxu1 }
0x110a   :  { %v7058_v35 = vpop.f32.mrf.mxu1 }
0x1110   :  { %v1922_v36 = vpop.f32.mrf.mxu0  ;;  %v2019_v38 = vpop.f32.mrf.mxu1 }
0x1111   :  { %v1923_v39 = vadd.f32 %v1922_v36, %v1847_v34  ;;  %v2023_v42 = vadd.f32 %v2019_v38, %v1952_v37 }
0x1112   :  { %v7069_v40 = vpop.f32.mrf.mxu0  ;;  %v7080_v21 = vpop.f32.mrf.mxu1 }
0x1113   :  { %v1926_v45 = vadd.f32 %v1923_v39, %v8037_v52  ;;  %7534 = vtanh.f32 %v2023_v42  ;;  %v6245_v33 = vmul.f32 -1.442695, %v2023_v42 }
0x1115   :  { %7536 = vtanh.f32 %v1926_v45  ;;  %v6243_v46 = vmul.f32 -1.442695, %v1926_v45 }
0x1116   :  { %7538 = vpow2.f32 %v6245_v33 }
0x1117   :  { %7540 = vpow2.f32 %v6243_v46 }
0x1118   :  { %v8310_v41 = vpop.f32.mrf.mxu0 }
0x111a   :  { %v7091_v31 = vpop.f32.mrf.mxu0 }
0x1120   :  { %v7535_v32 = vpop.eup %7534 }
0x1121   :  { %2033 = vrot.lane.b32.xlu0 %v7535_v32, %s7668_s22 }
0x1122   :  { %v7537_v43 = vpop.eup %7536 }
0x1123   :  { %1936 = vrot.lane.b32.xlu1 %v7537_v43, %s7668_s22  ;;  %v7539_v23 = vpop.eup %7538 }
0x1124   :  { %v7541_v47 = vpop.eup %7540  ;;  %v2027_v26 = vadd.f32 1.0, %v7539_v23 }
0x1125   :  { %v1930_v20 = vadd.f32 1.0, %v7541_v47 }
0x1126   :  { %7542 = vrcp.f32 %v2027_v26 }
0x1127   :  { %7544 = vrcp.f32 %v1930_v20 }
0x1133   :  { %v7543_v52 = vpop.eup %7542 }
0x1134   :  { %v7545_v5 = vpop.eup %7544  ;;  %v2031_v8 = vmul.f32 %v7543_v52, %v8167_v17 }
0x1135   :  { %v1934_v53 = vmul.f32 %v7545_v5, %v8218_v0 }
0x1193   :  { %v2034_v48 = vpop.permute.xlu0 %2033 }
0x1194   :  { %v2036_v4 = vmul.f32 %v7543_v52, %v2034_v48 }
0x1195   :  { %v1937_v7 = vpop.permute.xlu1 %1936 }
0x1196   :  { %v1939_v49 = vmul.f32 %v7545_v5, %v1937_v7  ;;  %2038 = vrot.lane.b32.xlu0 %v2036_v4, %s7668_s22 }
0x1198   :  { %1941 = vrot.lane.b32.xlu1 %v1939_v49, %s7668_s22 }
0x1208   :  { %v2039_v50 = vpop.permute.xlu0 %2038 }
0x1209   :  { %v8317_v51 = vadd.f32 %v2039_v50, %v2031_v8  ;;  %v8420_v50 = vld [vmem:[%s9676_s5] sm:$0xff] }
0x120a   :  { %v1942_v55 = vpop.permute.xlu1 %1941 }
0x120b   :  { %7546 = vtanh.f32 %v8317_v51  ;;  %v8321_v56 = vadd.f32 %v1942_v55, %v1934_v53  ;;  %v8438_v53 = vld [vmem:[%s9680_s7 + $0x18] sm:$0xff]  ;;  %v8446_v55 = vld [vmem:[%s9678_s8 + $0x10] sm:$0xff] }
0x120d   :  { %7548 = vtanh.f32 %v8321_v56 }
0x1218   :  { %v7547_v58 = vpop.eup %7546 }
0x1219   :  { %2044 = vrot.lane.b32.xlu0 %v7547_v58, %s7668_s22  ;;  %v8452_v58 = vld [vmem:[%s9680_s7 + $0x10] sm:$0xff] }
0x121a   :  { %v7549_v57 = vpop.eup %7548 }
0x121b   :  { %1947 = vrot.lane.b32.xlu1 %v7549_v57, %s7668_s22  ;;  %v8460_v57 = vld [vmem:[%s9678_s8 + $0x8] sm:$0xff] }
0x128b   :  { %v2045_v59 = vpop.permute.xlu0 %2044 }
0x128c   :  { %v2047_v17 = vmul.f32 %v7543_v52, %v2045_v59  ;;  %v8466_v59 = vld [vmem:[%s9680_s7 + $0x8] sm:$0xff] }
0x128d   :  { %v1948_v60 = vpop.permute.xlu1 %1947 }
0x128e   :  { %v1950_v61 = vmul.f32 %v7545_v5, %v1948_v60  ;;  %2119 = vrot.lane.b32.xlu0 %v2047_v17, %s7669_s18  ;;  %v8474_v17 = vld [vmem:[%s9678_s8] sm:$0xff] }
0x128f   :  { %v8480_v60 = vld [vmem:[%s9680_s7] sm:$0xff] }
0x1290   :  { %2219 = vrot.lane.b32.xlu1 %v1950_v61, %s7669_s18 }
0x1300   :  { %v2120_v62 = vpop.permute.xlu0 %2119 }
0x1301   :  { %7101 = vmatmul.mubr.msk.f32.vlgmr.msra.gmra.mxu1 %vm186_vm2, %v2120_v62 }
0x1302   :  { %v2220_v63 = vpop.permute.xlu1 %2219  ;;  %7115 = vmatpush3.msra.mxu1 %v7969_v27  ;;  %7122 = vmatprep.mubr.msk.f32.mxu1 %vm7667_vm1, %v9688_v3  ;;  %v8354_v27 = vld [vmem:[%s9677_s4 + $0x18] sm:$0xff] }
0x1303   :  { %7112 = vmatmul.mubr.msk.f32.vlgmr.msra.gmra.mxu0 %vm186_vm2, %v2220_v63  ;;  %7116 = vmatprep.subr.mxu1 %v9688_v3 }
0x1304   :  { %7126 = vmatpush3.msra.mxu0 %v8233_v14  ;;  %7133 = vmatprep.mubr.msk.f32.mxu0 %vm7667_vm1, %v9688_v3 }
0x1305   :  { %7127 = vmatprep.subr.mxu0 %v9688_v3  ;;  %7117 = vmatpush3.msra.mxu1 %v7974_v28  ;;  %v8363_v28 = vld [vmem:[%s9677_s4 + $0x10] sm:$0xff] }
0x1306   :  { %7128 = vmatpush3.msra.mxu0 %v8242_v15  ;;  %7118 = vmatprep.subr.mxu1 %v9688_v3 }
0x1307   :  { %7129 = vmatprep.subr.mxu0 %v9688_v3  ;;  %7119 = vmatpush3.msra.mxu1 %v7981_v29  ;;  %v8370_v29 = vld [vmem:[%s9677_s4 + $0x8] sm:$0xff] }
0x1308   :  { %7130 = vmatpush3.msra.mxu0 %v8249_v16  ;;  %7120 = vmatprep.subr.mxu1 %v9688_v3 }
0x1309   :  { %7131 = vmatprep.subr.mxu0 %v9688_v3  ;;  %7121 = vmatpush3.msra.mxu1 %v7992_v44  ;;  %v8377_v44 = vld [vmem:[%s9677_s4] sm:$0xff] }
0x130a   :  { %7132 = vmatpush3.msra.mxu0 %v8256_v18  ;;  %7136 = vmatprep.subr.mxu1 %v9688_v3 }
0x130b   :  { %7134 = vmatmul.mubr.msk.f32.vlgmr.msra.gmra.mxu0 %vm186_vm2, %v2120_v62  ;;  %7147 = vmatprep.subr.mxu0 %v9688_v3 }
0x130c   :  { %7148 = vmatpush3.msra.mxu0 %v8354_v27  ;;  %7155 = vmatprep.mubr.msk.f32.mxu0 %vm7667_vm1, %v9688_v3 }
0x130d   :  { %7149 = vmatprep.subr.mxu0 %v9688_v3 }
0x130e   :  { %7150 = vmatpush3.msra.mxu0 %v8363_v28 }
0x130f   :  { %7151 = vmatprep.subr.mxu0 %v9688_v3 }
0x1310   :  { %7152 = vmatpush3.msra.mxu0 %v8370_v29 }
0x1311   :  { %7153 = vmatprep.subr.mxu0 %v9688_v3 }
0x1312   :  { %7154 = vmatpush3.msra.mxu0 %v8377_v44 }
0x1313   :  { %7169 = vmatprep.subr.mxu0 %v9688_v3 }
0x13c1   :  { %v2189_v0 = vpop.f32.mrf.mxu1 }
0x13c2   :  { %v2190_v1 = vadd.f32 %v2189_v0, %v8310_v41  ;;  %v8491_v0 = vld [vmem:[%s9681_s9] sm:$0xf] }
0x13c3   :  { %v7102_v2 = vpop.f32.mrf.mxu1  ;;  %v8382_v54 = vpop.f32.mrf.mxu0 }
0x13c4   :  { %v2193_v10 = vadd.f32 %v8387_v9, %v2190_v1 }
0x13c5   :  { %v7113_v30 = vpop.f32.mrf.mxu0 }
0x13c6   :  { %7550 = vtanh.f32 %v2193_v10  ;;  %v6248_v36 = vmul.f32 -1.442695, %v2193_v10 }
0x13cb   :  { %v2461_v12 = vpop.f32.mrf.mxu0 }
0x13cc   :  { %v2465_v13 = vadd.f32 %v2461_v12, %v2394_v11 }
0x13cd   :  { %v7135_v19 = vpop.f32.mrf.mxu0 }
0x13ce   :  { %7552 = vtanh.f32 %v2465_v13  ;;  %v6253_v37 = vmul.f32 -1.442695, %v2465_v13 }
0x13cf   :  { %7554 = vpow2.f32 %v6248_v36 }
0x13d0   :  { %7556 = vpow2.f32 %v6253_v37 }
0x13d3   :  { %v7551_v34 = vpop.eup %7550 }
0x13d4   :  { %2203 = vrot.lane.b32.xlu0 %v7551_v34, %s7668_s22 }
0x13db   :  { %v7553_v35 = vpop.eup %7552 }
0x13dc   :  { %2475 = vrot.lane.b32.xlu1 %v7553_v35, %s7668_s22  ;;  %v7555_v38 = vpop.eup %7554 }
0x13dd   :  { %v2197_v39 = vadd.f32 1.0, %v7555_v38  ;;  %v7557_v42 = vpop.eup %7556 }
0x13de   :  { %v2469_v40 = vadd.f32 1.0, %v7557_v42 }
0x13df   :  { %7558 = vrcp.f32 %v2197_v39 }
0x13e0   :  { %7560 = vrcp.f32 %v2469_v40 }
0x13ec   :  { %v7559_v21 = vpop.eup %7558 }
0x13ed   :  { %v7561_v31 = vpop.eup %7560  ;;  %v2201_v33 = vmul.f32 %v7559_v21, %v8222_v6 }
0x13ee   :  { %v2473_v47 = vmul.f32 %v7561_v31, %v8317_v51  ;;  %v8432_v51 = vld [vmem:[%s9678_s8 + $0x18] sm:$0xff] }
0x1446   :  { %v2204_v45 = vpop.permute.xlu0 %2203 }
0x1447   :  { %v2206_v41 = vmul.f32 %v7559_v21, %v2204_v45 }
0x1449   :  { %2208 = vrot.lane.b32.xlu0 %v2206_v41, %s7668_s22 }
0x144e   :  { %v2476_v32 = vpop.permute.xlu1 %2475 }
0x144f   :  { %v2478_v43 = vmul.f32 %v7561_v31, %v2476_v32 }
0x1451   :  { %2480 = vrot.lane.b32.xlu1 %v2478_v43, %s7668_s22 }
0x14bb   :  { %v2209_v46 = vpop.permute.xlu0 %2208 }
0x14bc   :  { %v8395_v23 = vadd.f32 %v2209_v46, %v2201_v33 }
0x14be   :  { %7562 = vtanh.f32 %v8395_v23 }
0x14c3   :  { %v2481_v26 = vpop.permute.xlu1 %2480 }
0x14c4   :  { %v8399_v20 = vadd.f32 %v2481_v26, %v2473_v47 }
0x14c6   :  { %7564 = vtanh.f32 %v8399_v20 }
0x14cb   :  { %v7563_v52 = vpop.eup %7562 }
0x14cc   :  { %2214 = vrot.lane.b32.xlu0 %v7563_v52, %s7668_s22 }
0x14d3   :  { %v7565_v48 = vpop.eup %7564 }
0x14d4   :  { %2486 = vrot.lane.b32.xlu1 %v7565_v48, %s7668_s22 }
0x153e   :  { %v2215_v4 = vpop.permute.xlu0 %2214 }
0x153f   :  { %v2217_v6 = vmul.f32 %v7559_v21, %v2215_v4 }
0x1541   :  { %2294 = vrot.lane.b32.xlu0 %v2217_v6, %s7669_s18 }
0x1546   :  { %v2487_v5 = vpop.permute.xlu1 %2486 }
0x1547   :  { %v2489_v7 = vmul.f32 %v7561_v31, %v2487_v5 }
0x1549   :  { %2561 = vrot.lane.b32.xlu1 %v2489_v7, %s7669_s18 }
0x15b3   :  { %v2295_v49 = vpop.permute.xlu0 %2294 }
0x15b4   :  { %7123 = vmatmul.mubr.msk.f32.vlgmr.msra.gmra.mxu1 %vm186_vm2, %v2295_v49 }
0x15b5   :  { %7137 = vmatpush3.msra.mxu1 %v8265_v22  ;;  %7144 = vmatprep.mubr.msk.f32.mxu1 %vm7667_vm1, %v9688_v3 }
0x15b6   :  { %7138 = vmatprep.subr.mxu1 %v9688_v3 }
0x15b7   :  { %7139 = vmatpush3.msra.mxu1 %v8275_v24 }
0x15b8   :  { %7140 = vmatprep.subr.mxu1 %v9688_v3 }
0x15b9   :  { %7141 = vmatpush3.msra.mxu1 %v8284_v25 }
0x15ba   :  { %7142 = vmatprep.subr.mxu1 %v9688_v3 }
0x15bb   :  { %v8415_v8 = vpop.permute.xlu1 %2561  ;;  %7143 = vmatpush3.msra.mxu1 %v8420_v50 }
0x15bc   :  { %7145 = vmatmul.mubr.msk.f32.vlgmr.msra.gmra.mxu1 %vm186_vm2, %v2295_v49  ;;  %7156 = vmatmul.mubr.msk.f32.vlgmr.msra.gmra.mxu0 %vm186_vm2, %v8415_v8 }
0x15bd   :  { %7158 = vmatprep.subr.mxu1 %v9688_v3  ;;  %7166 = vmatprep.mubr.msk.f32.mxu1 %vm7667_vm1, %v9688_v3 }
0x15be   :  { %7159 = vmatpush3.msra.mxu1 %v8432_v51  ;;  %7170 = vmatpush3.msra.mxu0 %v8438_v53 }
0x15bf   :  { %7160 = vmatprep.subr.mxu1 %v9688_v3  ;;  %7171 = vmatprep.subr.mxu0 %v9688_v3 }
0x15c0   :  { %7161 = vmatpush3.msra.mxu1 %v8446_v55  ;;  %7172 = vmatpush3.msra.mxu0 %v8452_v58 }
0x15c1   :  { %7162 = vmatprep.subr.mxu1 %v9688_v3  ;;  %7173 = vmatprep.subr.mxu0 %v9688_v3 }
0x15c2   :  { %7163 = vmatpush3.msra.mxu1 %v8460_v57  ;;  %7174 = vmatpush3.msra.mxu0 %v8466_v59 }
0x15c3   :  { %7164 = vmatprep.subr.mxu1 %v9688_v3  ;;  %7175 = vmatprep.subr.mxu0 %v9688_v3 }
0x15c4   :  { %7165 = vmatpush3.msra.mxu1 %v8474_v17  ;;  %7176 = vmatpush3.msra.mxu0 %v8480_v60 }
0x15c5   :  { %7180 = vmatprep.subr.mxu1 %v9688_v3  ;;  %7177 = vmatprep.mubr.msk.f32.mxu0 %vm7667_vm1, %v9688_v3 }
0x15c6   :  { %7191 = vmatprep.subr.mxu0 %v9688_v3 }
0x1674   :  { %v2364_v61 = vpop.f32.mrf.mxu1 }
0x1675   :  { %v2365_v62 = vadd.f32 %v2364_v61, %v8382_v54 }
0x1676   :  { %v7124_v63 = vpop.f32.mrf.mxu1 }
0x1677   :  { %v2368_v1 = vadd.f32 %v8491_v0, %v2365_v62  ;;  %v2836_v62 = vld [vmem:[#allocation2 + $0x18] sm:$0xf] }
0x1679   :  { %7566 = vtanh.f32 %v2368_v1  ;;  %v6251_v34 = vmul.f32 -1.442695, %v2368_v1 }
0x167c   :  { %v2556_v2 = vpop.f32.mrf.mxu1  ;;  %v2631_v10 = vpop.f32.mrf.mxu0 }
0x167d   :  { %v2632_v30 = vadd.f32 %v2631_v10, %v2556_v2 }
0x167e   :  { %v7146_v11 = vpop.f32.mrf.mxu1  ;;  %v7157_v12 = vpop.f32.mrf.mxu0 }
0x167f   :  { %v2635_v13 = vadd.f32 %v8387_v9, %v2632_v30 }
0x1681   :  { %7568 = vtanh.f32 %v2635_v13  ;;  %v6256_v35 = vmul.f32 -1.442695, %v2635_v13 }
0x1682   :  { %7570 = vpow2.f32 %v6251_v34 }
0x1683   :  { %7572 = vpow2.f32 %v6256_v35 }
0x1686   :  { %v7567_v19 = vpop.eup %7566 }
0x1687   :  { %2378 = vrot.lane.b32.xlu0 %v7567_v19, %s7668_s22 }
0x168e   :  { %v7569_v54 = vpop.eup %7568 }
0x168f   :  { %2645 = vrot.lane.b32.xlu1 %v7569_v54, %s7668_s22  ;;  %v7571_v36 = vpop.eup %7570 }
0x1690   :  { %v2372_v37 = vadd.f32 1.0, %v7571_v36  ;;  %v7573_v38 = vpop.eup %7572 }
0x1691   :  { %v2639_v39 = vadd.f32 1.0, %v7573_v38 }
0x1692   :  { %7574 = vrcp.f32 %v2372_v37 }
0x1693   :  { %7576 = vrcp.f32 %v2639_v39 }
0x169f   :  { %v7575_v42 = vpop.eup %7574 }
0x16a0   :  { %v7577_v45 = vpop.eup %7576  ;;  %v2376_v32 = vmul.f32 %v7575_v42, %v8321_v56 }
0x16a1   :  { %v2643_v46 = vmul.f32 %v7577_v45, %v8395_v23 }
0x16f9   :  { %v2379_v40 = vpop.permute.xlu0 %2378 }
0x16fa   :  { %v2381_v21 = vmul.f32 %v7575_v42, %v2379_v40 }
0x16fc   :  { %2383 = vrot.lane.b32.xlu0 %v2381_v21, %s7668_s22 }
0x1701   :  { %v2646_v41 = vpop.permute.xlu1 %2645 }
0x1702   :  { %v2648_v31 = vmul.f32 %v7577_v45, %v2646_v41 }
0x1704   :  { %2650 = vrot.lane.b32.xlu1 %v2648_v31, %s7668_s22 }
0x176e   :  { %v2384_v43 = vpop.permute.xlu0 %2383 }
0x176f   :  { %v8500_v33 = vadd.f32 %v2384_v43, %v2376_v32 }
0x1771   :  { %7578 = vtanh.f32 %v8500_v33 }
0x1776   :  { %v2651_v47 = vpop.permute.xlu1 %2650 }
0x1777   :  { %v8504_v26 = vadd.f32 %v2651_v47, %v2643_v46 }
0x1779   :  { %7580 = vtanh.f32 %v8504_v26 }
0x177e   :  { %v7579_v52 = vpop.eup %7578 }
0x177f   :  { %2389 = vrot.lane.b32.xlu0 %v7579_v52, %s7668_s22 }
0x1786   :  { %v7581_v48 = vpop.eup %7580 }
0x1787   :  { %2656 = vrot.lane.b32.xlu1 %v7581_v48, %s7668_s22 }
0x17f1   :  { %v2390_v4 = vpop.permute.xlu0 %2389 }
0x17f2   :  { %v2392_v56 = vmul.f32 %v7575_v42, %v2390_v4 }
0x17f4   :  { %2661 = vrot.lane.b32.xlu0 %v2392_v56, %s7669_s18 }
0x17f9   :  { %v2657_v6 = vpop.permute.xlu1 %2656 }
0x17fa   :  { %v2659_v5 = vmul.f32 %v7577_v45, %v2657_v6 }
0x17fc   :  { %2736 = vrot.lane.b32.xlu1 %v2659_v5, %s7669_s18 }
0x1866   :  { %v2662_v23 = vpop.permute.xlu0 %2661 }
0x1867   :  { %7167 = vmatmul.mubr.msk.f32.vlgmr.msra.gmra.mxu1 %vm186_vm2, %v2662_v23 }
0x1868   :  { %7181 = vmatpush3.msra.mxu1 %v8233_v14  ;;  %7188 = vmatprep.mubr.msk.f32.mxu1 %vm7667_vm1, %v9688_v3 }
0x1869   :  { %7182 = vmatprep.subr.mxu1 %v9688_v3 }
0x186a   :  { %7183 = vmatpush3.msra.mxu1 %v8242_v15 }
0x186b   :  { %7184 = vmatprep.subr.mxu1 %v9688_v3 }
0x186c   :  { %7185 = vmatpush3.msra.mxu1 %v8249_v16 }
0x186d   :  { %7186 = vmatprep.subr.mxu1 %v9688_v3 }
0x186e   :  { %7187 = vmatpush3.msra.mxu1 %v8256_v18  ;;  %v2737_v7 = vpop.permute.xlu1 %2736 }
0x186f   :  { %7178 = vmatmul.mubr.msk.f32.vlgmr.msra.gmra.mxu0 %vm186_vm2, %v2737_v7  ;;  %7189 = vmatmul.mubr.msk.f32.vlgmr.msra.gmra.mxu1 %vm186_vm2, %v8415_v8 }
0x1870   :  { %7192 = vmatpush3.msra.mxu0 %v8265_v22  ;;  %7199 = vmatprep.mubr.msk.f32.mxu0 %vm7667_vm1, %v9688_v3 }
0x1871   :  { %7193 = vmatprep.subr.mxu0 %v9688_v3  ;;  %7202 = vmatprep.subr.mxu1 %v9688_v3 }
0x1872   :  { %7194 = vmatpush3.msra.mxu0 %v8275_v24  ;;  %7203 = vmatpush3.msra.mxu1 %v8354_v27 }
0x1873   :  { %7195 = vmatprep.subr.mxu0 %v9688_v3  ;;  %7204 = vmatprep.subr.mxu1 %v9688_v3 }
0x1874   :  { %7196 = vmatpush3.msra.mxu0 %v8284_v25  ;;  %7205 = vmatpush3.msra.mxu1 %v8363_v28 }
0x1875   :  { %7197 = vmatprep.subr.mxu0 %v9688_v3  ;;  %7206 = vmatprep.subr.mxu1 %v9688_v3 }
0x1876   :  { %7198 = vmatpush3.msra.mxu0 %v8420_v50  ;;  %7207 = vmatpush3.msra.mxu1 %v8370_v29 }
0x1877   :  { %7200 = vmatmul.mubr.msk.f32.vlgmr.msra.gmra.mxu0 %vm186_vm2, %v2737_v7  ;;  %7213 = vmatprep.subr.mxu0 %v9688_v3 }
0x1878   :  { %7214 = vmatpush3.msra.mxu0 %v8432_v51  ;;  %7208 = vmatprep.subr.mxu1 %v9688_v3 }
0x1879   :  { %7215 = vmatprep.subr.mxu0 %v9688_v3  ;;  %7209 = vmatpush3.msra.mxu1 %v8377_v44 }
0x187a   :  { %7216 = vmatpush3.msra.mxu0 %v8446_v55  ;;  %7210 = vmatprep.mubr.msk.f32.mxu1 %vm7667_vm1, %v9688_v3 }
0x187b   :  { %7217 = vmatprep.subr.mxu0 %v9688_v3  ;;  %7221 = vmatprep.mubr.msk.f32.mxu0 %vm7667_vm1, %v9688_v3 }
0x187c   :  { %7218 = vmatpush3.msra.mxu0 %v8460_v57  ;;  %7224 = vmatprep.subr.mxu1 %v9688_v3 }
0x187d   :  { %7219 = vmatprep.subr.mxu0 %v9688_v3 }
0x187e   :  { %7220 = vmatpush3.msra.mxu0 %v8474_v17 }
0x187f   :  { %7235 = vmatprep.subr.mxu0 %v9688_v3 }
0x1927   :  { %v2731_v49 = vpop.f32.mrf.mxu1 }
0x1929   :  { %v7168_v8 = vpop.f32.mrf.mxu1 }
0x192f   :  { %v2806_v61 = vpop.f32.mrf.mxu0  ;;  %v2903_v63 = vpop.f32.mrf.mxu1 }
0x1930   :  { %v2807_v1 = vadd.f32 %v2806_v61, %v2731_v49  ;;  %v2907_v2 = vadd.f32 %v2903_v63, %v2836_v62 }
0x1931   :  { %v7179_v10 = vpop.f32.mrf.mxu0  ;;  %v7190_v30 = vpop.f32.mrf.mxu1 }
0x1932   :  { %v2810_v11 = vadd.f32 %v8491_v0, %v2807_v1  ;;  %7582 = vtanh.f32 %v2907_v2  ;;  %v6261_v34 = vmul.f32 -1.442695, %v2907_v2 }
0x1934   :  { %7584 = vtanh.f32 %v2810_v11  ;;  %v6259_v35 = vmul.f32 -1.442695, %v2810_v11 }
0x1935   :  { %7586 = vpow2.f32 %v6261_v34 }
0x1936   :  { %7588 = vpow2.f32 %v6259_v35 }
0x1937   :  { %v8557_v12 = vpop.f32.mrf.mxu0 }
0x1939   :  { %v7201_v13 = vpop.f32.mrf.mxu0 }
0x193f   :  { %v7583_v19 = vpop.eup %7582 }
0x1940   :  { %2917 = vrot.lane.b32.xlu0 %v7583_v19, %s7668_s22 }
0x1941   :  { %v7585_v54 = vpop.eup %7584 }
0x1942   :  { %2820 = vrot.lane.b32.xlu1 %v7585_v54, %s7668_s22  ;;  %v7587_v36 = vpop.eup %7586 }
0x1943   :  { %v7589_v37 = vpop.eup %7588  ;;  %v2911_v38 = vadd.f32 1.0, %v7587_v36 }
0x1944   :  { %v2814_v39 = vadd.f32 1.0, %v7589_v37 }
0x1945   :  { %7590 = vrcp.f32 %v2911_v38 }
0x1946   :  { %7592 = vrcp.f32 %v2814_v39 }
0x1952   :  { %v7591_v42 = vpop.eup %7590 }
0x1953   :  { %v7593_v45 = vpop.eup %7592  ;;  %v2915_v32 = vmul.f32 %v7591_v42, %v8399_v20 }
0x1954   :  { %v2818_v47 = vmul.f32 %v7593_v45, %v8500_v33 }
0x19b2   :  { %v2918_v40 = vpop.permute.xlu0 %2917 }
0x19b3   :  { %v2920_v21 = vmul.f32 %v7591_v42, %v2918_v40 }
0x19b4   :  { %v2821_v41 = vpop.permute.xlu1 %2820 }
0x19b5   :  { %v2823_v31 = vmul.f32 %v7593_v45, %v2821_v41  ;;  %2922 = vrot.lane.b32.xlu0 %v2920_v21, %s7668_s22 }
0x19b7   :  { %2825 = vrot.lane.b32.xlu1 %v2823_v31, %s7668_s22 }
0x1a27   :  { %v2923_v43 = vpop.permute.xlu0 %2922 }
0x1a28   :  { %v8564_v46 = vadd.f32 %v2923_v43, %v2915_v32 }
0x1a29   :  { %v2826_v52 = vpop.permute.xlu1 %2825 }
0x1a2a   :  { %7594 = vtanh.f32 %v8564_v46  ;;  %v8568_v48 = vadd.f32 %v2826_v52, %v2818_v47 }
0x1a2c   :  { %7596 = vtanh.f32 %v8568_v48 }
0x1a37   :  { %v7595_v4 = vpop.eup %7594 }
0x1a38   :  { %2928 = vrot.lane.b32.xlu0 %v7595_v4, %s7668_s22 }
0x1a39   :  { %v7597_v56 = vpop.eup %7596 }
0x1a3a   :  { %2831 = vrot.lane.b32.xlu1 %v7597_v56, %s7668_s22 }
0x1aaa   :  { %v2929_v6 = vpop.permute.xlu0 %2928 }
0x1aab   :  { %v2931_v20 = vmul.f32 %v7591_v42, %v2929_v6 }
0x1aac   :  { %v2832_v5 = vpop.permute.xlu1 %2831 }
0x1aad   :  { %v2834_v23 = vmul.f32 %v7593_v45, %v2832_v5  ;;  %3003 = vrot.lane.b32.xlu0 %v2931_v20, %s7669_s18 }
0x1aaf   :  { %3103 = vrot.lane.b32.xlu1 %v2834_v23, %s7669_s18 }
0x1b1f   :  { %v3004_v33 = vpop.permute.xlu0 %3003 }
0x1b20   :  { %7211 = vmatmul.mubr.msk.f32.vlgmr.msra.gmra.mxu1 %vm186_vm2, %v3004_v33 }
0x1b21   :  { %v3104_v7 = vpop.permute.xlu1 %3103  ;;  %7225 = vmatpush3.msra.mxu1 %v8438_v53  ;;  %7232 = vmatprep.mubr.msk.f32.mxu1 %vm7667_vm1, %v9688_v3 }
0x1b22   :  { %7222 = vmatmul.mubr.msk.f32.vlgmr.msra.gmra.mxu0 %vm186_vm2, %v3104_v7  ;;  %7226 = vmatprep.subr.mxu1 %v9688_v3 }
0x1b23   :  { %7236 = vmatpush3.msra.mxu0 %v8233_v14  ;;  %7243 = vmatprep.mubr.msk.f32.mxu0 %vm7667_vm1, %v9688_v3 }
0x1b24   :  { %7237 = vmatprep.subr.mxu0 %v9688_v3  ;;  %7227 = vmatpush3.msra.mxu1 %v8452_v58 }
0x1b25   :  { %7238 = vmatpush3.msra.mxu0 %v8242_v15  ;;  %7228 = vmatprep.subr.mxu1 %v9688_v3 }
0x1b26   :  { %7239 = vmatprep.subr.mxu0 %v9688_v3  ;;  %7229 = vmatpush3.msra.mxu1 %v8466_v59 }
0x1b27   :  { %7240 = vmatpush3.msra.mxu0 %v8249_v16  ;;  %7230 = vmatprep.subr.mxu1 %v9688_v3 }
0x1b28   :  { %7241 = vmatprep.subr.mxu0 %v9688_v3  ;;  %7231 = vmatpush3.msra.mxu1 %v8480_v60 }
0x1b29   :  { %7242 = vmatpush3.msra.mxu0 %v8256_v18  ;;  %7246 = vmatprep.subr.mxu1 %v9688_v3 }
0x1b2a   :  { %7244 = vmatmul.mubr.msk.f32.vlgmr.msra.gmra.mxu0 %vm186_vm2, %v3004_v33  ;;  %7257 = vmatprep.subr.mxu0 %v9688_v3 }
0x1b2b   :  { %7258 = vmatpush3.msra.mxu0 %v8354_v27  ;;  %7265 = vmatprep.mubr.msk.f32.mxu0 %vm7667_vm1, %v9688_v3 }
0x1b2c   :  { %7259 = vmatprep.subr.mxu0 %v9688_v3 }
0x1b2d   :  { %7260 = vmatpush3.msra.mxu0 %v8363_v28  ;;  %v3278_v28 = vld [vmem:[#allocation2 + $0x1c] sm:$0xf] }
0x1b2e   :  { %7261 = vmatprep.subr.mxu0 %v9688_v3 }
0x1b2f   :  { %7262 = vmatpush3.msra.mxu0 %v8370_v29 }
0x1b30   :  { %7263 = vmatprep.subr.mxu0 %v9688_v3 }
0x1b31   :  { %7264 = vmatpush3.msra.mxu0 %v8377_v44 }
0x1b32   :  { %7279 = vmatprep.subr.mxu0 %v9688_v3 }
0x1be0   :  { %v3073_v14 = vpop.f32.mrf.mxu1 }
0x1be1   :  { %v3074_v15 = vadd.f32 %v3073_v14, %v8557_v12 }
0x1be2   :  { %v7212_v16 = vpop.f32.mrf.mxu1  ;;  %v8609_v18 = vpop.f32.mrf.mxu0 }
0x1be3   :  { %v3077_v27 = vadd.f32 %v8387_v9, %v3074_v15 }
0x1be4   :  { %v7223_v49 = vpop.f32.mrf.mxu0 }
0x1be5   :  { %7598 = vtanh.f32 %v3077_v27  ;;  %v6264_v63 = vmul.f32 -1.442695, %v3077_v27 }
0x1bea   :  { %v3345_v8 = vpop.f32.mrf.mxu0 }
0x1beb   :  { %v3349_v61 = vadd.f32 %v3345_v8, %v3278_v28 }
0x1bec   :  { %v7245_v29 = vpop.f32.mrf.mxu0 }
0x1bed   :  { %7600 = vtanh.f32 %v3349_v61  ;;  %v6269_v1 = vmul.f32 -1.442695, %v3349_v61 }
0x1bee   :  { %7602 = vpow2.f32 %v6264_v63 }
0x1bef   :  { %7604 = vpow2.f32 %v6269_v1 }
0x1bf2   :  { %v7599_v62 = vpop.eup %7598 }
0x1bf3   :  { %3087 = vrot.lane.b32.xlu0 %v7599_v62, %s7668_s22 }
0x1bfa   :  { %v7601_v44 = vpop.eup %7600 }
0x1bfb   :  { %3359 = vrot.lane.b32.xlu1 %v7601_v44, %s7668_s22  ;;  %v7603_v2 = vpop.eup %7602 }
0x1bfc   :  { %v3081_v10 = vadd.f32 1.0, %v7603_v2  ;;  %v7605_v30 = vpop.eup %7604 }
0x1bfd   :  { %v3353_v11 = vadd.f32 1.0, %v7605_v30 }
0x1bfe   :  { %7606 = vrcp.f32 %v3081_v10 }
0x1bff   :  { %7608 = vrcp.f32 %v3353_v11 }
0x1c0b   :  { %v7607_v12 = vpop.eup %7606 }
0x1c0c   :  { %v7609_v54 = vpop.eup %7608  ;;  %v3085_v36 = vmul.f32 %v7607_v12, %v8504_v26 }
0x1c0d   :  { %v3357_v39 = vmul.f32 %v7609_v54, %v8564_v46 }
0x1c65   :  { %v3088_v13 = vpop.permute.xlu0 %3087 }
0x1c66   :  { %v3090_v19 = vmul.f32 %v7607_v12, %v3088_v13 }
0x1c68   :  { %3092 = vrot.lane.b32.xlu0 %v3090_v19, %s7668_s22 }
0x1c6d   :  { %v3360_v34 = vpop.permute.xlu1 %3359 }
0x1c6e   :  { %v3362_v35 = vmul.f32 %v7609_v54, %v3360_v34 }
0x1c70   :  { %3364 = vrot.lane.b32.xlu1 %v3362_v35, %s7668_s22 }
0x1cda   :  { %v3093_v37 = vpop.permute.xlu0 %3092 }
0x1cdb   :  { %v8617_v38 = vadd.f32 %v3093_v37, %v3085_v36  ;;  %v3730_v36 = vld [vmem:[%s9682_s10 + $0x80] sm:$0xff] }
0x1cdc   :  { %v3738_v37 = vld [vmem:[%s9682_s10 + $0xc0] sm:$0xff] }
0x1cdd   :  { %7610 = vtanh.f32 %v8617_v38 }
0x1ce2   :  { %v3365_v42 = vpop.permute.xlu1 %3364 }
0x1ce3   :  { %v3367_v40 = vadd.f32 %v3365_v42, %v3357_v39  ;;  %v6293_v39 = vcombine.high %v3730_v36, %v3738_v37  ;;  %v3739_v42 = vld [vmem:[%s9682_s10 + $0xc8] sm:$0xff] }
0x1ce5   :  { %7612 = vtanh.f32 %v3367_v40  ;;  %v3714_v40 = vld [vmem:[%s9682_s10] sm:$0xff] }
0x1cea   :  { %v7611_v21 = vpop.eup %7610 }
0x1ceb   :  { %3098 = vrot.lane.b32.xlu0 %v7611_v21, %s7668_s22  ;;  %v3722_v21 = vld [vmem:[%s9682_s10 + $0x40] sm:$0xff] }
0x1cf2   :  { %v7613_v45 = vpop.eup %7612 }
0x1cf3   :  { %3370 = vrot.lane.b32.xlu1 %v7613_v45, %s7668_s22 }
0x1d5d   :  { %v3099_v41 = vpop.permute.xlu0 %3098 }
0x1d5e   :  { %v3101_v31 = vmul.f32 %v7607_v12, %v3099_v41 }
0x1d60   :  { %3178 = vrot.lane.b32.xlu0 %v3101_v31, %s7669_s18  ;;  %v6277_v31 = vcombine.high %v3714_v40, %v3722_v21 }
0x1d65   :  { %v3371_v26 = vpop.permute.xlu1 %3370 }
0x1d66   :  { %v3373_v32 = vmul.f32 %v7609_v54, %v3371_v26  ;;  %v3715_v26 = vld [vmem:[%s9682_s10 + $0x8] sm:$0xff] }
0x1d68   :  { %3445 = vrot.lane.b32.xlu1 %v3373_v32, %s7669_s18  ;;  %v3723_v32 = vld [vmem:[%s9682_s10 + $0x48] sm:$0xff] }
0x1dd2   :  { %v3179_v43 = vpop.permute.xlu0 %3178 }
0x1dd3   :  { %7233 = vmatmul.mubr.msk.f32.vlgmr.msra.gmra.mxu1 %vm186_vm2, %v3179_v43 }
0x1dd4   :  { %7247 = vmatpush3.msra.mxu1 %v8265_v22  ;;  %7254 = vmatprep.mubr.msk.f32.mxu1 %vm7667_vm1, %v9688_v3 }
0x1dd5   :  { %7248 = vmatprep.subr.mxu1 %v9688_v3 }
0x1dd6   :  { %7249 = vmatpush3.msra.mxu1 %v8275_v24 }
0x1dd7   :  { %7250 = vmatprep.subr.mxu1 %v9688_v3 }
0x1dd8   :  { %7251 = vmatpush3.msra.mxu1 %v8284_v25 }
0x1dd9   :  { %7252 = vmatprep.subr.mxu1 %v9688_v3 }
0x1dda   :  { %v3446_v46 = vpop.permute.xlu1 %3445  ;;  %7253 = vmatpush3.msra.mxu1 %v8420_v50 }
0x1ddb   :  { %7255 = vmatmul.mubr.msk.f32.vlgmr.msra.gmra.mxu1 %vm186_vm2, %v3179_v43  ;;  %7266 = vmatmul.mubr.msk.f32.vlgmr.msra.gmra.mxu0 %vm186_vm2, %v3446_v46  ;;  %v6279_v43 = vcombine.high %v3715_v26, %v3723_v32  ;;  %v6276_v46 = vcombine.low %v3714_v40, %v3722_v21 }
0x1ddc   :  { %7268 = vmatprep.subr.mxu1 %v9688_v3  ;;  %7276 = vmatprep.mubr.msk.f32.mxu1 %vm7667_vm1, %v9688_v3 }
0x1ddd   :  { %7269 = vmatpush3.msra.mxu1 %v8432_v51  ;;  %7280 = vmatpush3.msra.mxu0 %v8438_v53 }
0x1dde   :  { %7270 = vmatprep.subr.mxu1 %v9688_v3  ;;  %7281 = vmatprep.subr.mxu0 %v9688_v3 }
0x1ddf   :  { %7271 = vmatpush3.msra.mxu1 %v8446_v55  ;;  %7282 = vmatpush3.msra.mxu0 %v8452_v58 }
0x1de0   :  { %7272 = vmatprep.subr.mxu1 %v9688_v3  ;;  %7283 = vmatprep.subr.mxu0 %v9688_v3 }
0x1de1   :  { %7273 = vmatpush3.msra.mxu1 %v8460_v57  ;;  %7284 = vmatpush3.msra.mxu0 %v8466_v59 }
0x1de2   :  { %7274 = vmatprep.subr.mxu1 %v9688_v3  ;;  %7285 = vmatprep.subr.mxu0 %v9688_v3 }
0x1de3   :  { %7275 = vmatpush3.msra.mxu1 %v8474_v17  ;;  %7286 = vmatpush3.msra.mxu0 %v8480_v60 }
0x1de4   :  { %7287 = vmatprep.mubr.msk.f32.mxu0 %vm7667_vm1, %v9688_v3  ;;  %3924 = vmatprep.subr.bf16.mxu1 %v6293_v39 }
0x1e93   :  { %v3248_v22 = vpop.f32.mrf.mxu1 }
0x1e94   :  { %v3249_v24 = vadd.f32 %v3248_v22, %v8609_v18 }
0x1e95   :  { %v7234_v25 = vpop.f32.mrf.mxu1 }
0x1e96   :  { %v3252_v50 = vadd.f32 %v8491_v0, %v3249_v24  ;;  %v6278_v25 = vcombine.low %v3715_v26, %v3723_v32  ;;  %v7319_v26 = vld [vmem:[%s9683_s11 + $0xf8] sm:$0xff]  }
0x1e97   :  { %v7320_v32 = vld [vmem:[%s9683_s11 + $0x38] sm:$0xff]  }
0x1e98   :  { %7614 = vtanh.f32 %v3252_v50  ;;  %v6267_v47 = vmul.f32 -1.442695, %v3252_v50 }
0x1e9b   :  { %v3440_v51 = vpop.f32.mrf.mxu1  ;;  %v3515_v53 = vpop.f32.mrf.mxu0 }
0x1e9c   :  { %v3516_v55 = vadd.f32 %v3515_v53, %v3440_v51  ;;  %v3732_v51 = vld [vmem:[%s9682_s10 + $0x90] sm:$0xff] }
0x1e9d   :  { %v7256_v58 = vpop.f32.mrf.mxu1  ;;  %v7267_v57 = vpop.f32.mrf.mxu0  ;;  %v3740_v53 = vld [vmem:[%s9682_s10 + $0xd0] sm:$0xff] }
0x1e9e   :  { %v3519_v59 = vadd.f32 %v8387_v9, %v3516_v55  ;;  %v3733_v55 = vld [vmem:[%s9682_s10 + $0x98] sm:$0xff]  ;;  %v7670_v58 = vmov 0   ;;  %v6297_v57 = vcombine.high %v3732_v51, %v3740_v53 }
0x1ea0   :  { %7616 = vtanh.f32 %v3519_v59  ;;  %v6272_v52 = vmul.f32 -1.442695, %v3519_v59  ;;  %v3741_v59 = vld [vmem:[%s9682_s10 + $0xd8] sm:$0xff] }
0x1ea1   :  { %7618 = vpow2.f32 %v6267_v47  ;;  %v6299_v47 = vcombine.high %v3733_v55, %v3741_v59 }
0x1ea2   :  { %7620 = vpow2.f32 %v6272_v52 }
0x1ea5   :  { %v7615_v17 = vpop.eup %7614 }
0x1ea6   :  { %3262 = vrot.lane.b32.xlu0 %v7615_v17, %s7668_s22  ;;  %v6296_v17 = vcombine.low %v3732_v51, %v3740_v53  ;;  %v7327_v51 = vld [vmem:[%s9683_s11 + $0xe8] sm:$0xff]  }
0x1ea7   :  { %v7328_v53 = vld [vmem:[%s9683_s11 + $0x28] sm:$0xff]  }
0x1ead   :  { %v7617_v60 = vpop.eup %7616 }
0x1eae   :  { %3529 = vrot.lane.b32.xlu1 %v7617_v60, %s7668_s22  ;;  %v7619_v4 = vpop.eup %7618  ;;  %v6298_v60 = vcombine.low %v3733_v55, %v3741_v59  ;;  %v7329_v55 = vld [vmem:[%s9683_s11 + $0xa8] sm:$0xff]   ;;  %v7332_v59 = vld [vmem:[%s9683_s11 + $0x20] sm:$0xff]  }
0x1eaf   :  { %v3256_v56 = vadd.f32 1.0, %v7619_v4  ;;  %v7621_v6 = vpop.eup %7620 }
0x1eb0   :  { %v3523_v20 = vadd.f32 1.0, %v7621_v6 }
0x1eb1   :  { %7622 = vrcp.f32 %v3256_v56 }
0x1eb2   :  { %7624 = vrcp.f32 %v3523_v20  ;;  %v3716_v20 = vld [vmem:[%s9682_s10 + $0x10] sm:$0xff] }
0x1ebe   :  { %v7623_v5 = vpop.eup %7622 }
0x1ebf   :  { %v7625_v33 = vpop.eup %7624  ;;  %v3260_v15 = vmul.f32 %v7623_v5, %v8568_v48 }
0x1ec0   :  { %v3527_v27 = vmul.f32 %v7625_v33, %v8617_v38  ;;  %v6292_v38 = vcombine.low %v3730_v36, %v3738_v37  ;;  %v3720_v36 = vld [vmem:[%s9682_s10 + $0x30] sm:$0xff] }
0x1ec1   :  { %v3728_v37 = vld [vmem:[%s9682_s10 + $0x70] sm:$0xff] }
0x1ec2   :  { %v6289_v40 = vcombine.high %v3720_v36, %v3728_v37 }
0x1f18   :  { %v3263_v23 = vpop.permute.xlu0 %3262 }
0x1f19   :  { %v3265_v9 = vmul.f32 %v7623_v5, %v3263_v23  ;;  %v3717_v23 = vld [vmem:[%s9682_s10 + $0x18] sm:$0xff] }
0x1f1b   :  { %3267 = vrot.lane.b32.xlu0 %v3265_v9, %s7668_s22  ;;  %v3725_v9 = vld [vmem:[%s9682_s10 + $0x58] sm:$0xff] }
0x1f20   :  { %v3530_v7 = vpop.permute.xlu1 %3529 }
0x1f21   :  { %v3532_v14 = vmul.f32 %v7625_v33, %v3530_v7  ;;  %v6283_v7 = vcombine.high %v3717_v23, %v3725_v9 }
0x1f23   :  { %3534 = vrot.lane.b32.xlu1 %v3532_v14, %s7668_s22  ;;  %v3734_v14 = vld [vmem:[%s9682_s10 + $0xa0] sm:$0xff] }
0x1f8d   :  { %v3268_v16 = vpop.permute.xlu0 %3267 }
0x1f8e   :  { %v8664_v18 = vadd.f32 %v3268_v16, %v3260_v15  ;;  %v3742_v16 = vld [vmem:[%s9682_s10 + $0xe0] sm:$0xff] }
0x1f90   :  { %7626 = vtanh.f32 %v8664_v18 }
0x1f95   :  { %v3535_v49 = vpop.permute.xlu1 %3534 }
0x1f96   :  { %v3537_v28 = vadd.f32 %v3535_v49, %v3527_v27  ;;  %v3743_v27 = vld [vmem:[%s9682_s10 + $0xe8] sm:$0xff] }
0x1f98   :  { %7628 = vtanh.f32 %v3537_v28  ;;  %v6282_v28 = vcombine.low %v3717_v23, %v3725_v9  ;;  %v7342_v23 = vld [vmem:[%s9683_s11 + $0x48] sm:$0xff]  }
0x1f99   :  { %v7343_v9 = vld [vmem:[%s9683_s11 + $0xc8] sm:$0xff]  }
0x1f9d   :  { %v7627_v8 = vpop.eup %7626 }
0x1f9e   :  { %3273 = vrot.lane.b32.xlu0 %v7627_v8, %s7668_s22  ;;  %v6301_v8 = vcombine.high %v3734_v14, %v3742_v16 }
0x1fa5   :  { %v7629_v61 = vpop.eup %7628 }
0x1fa6   :  { %3540 = vrot.lane.b32.xlu1 %v7629_v61, %s7668_s22 }
0x2010   :  { %v3274_v29 = vpop.permute.xlu0 %3273 }
0x2011   :  { %v3276_v62 = vmul.f32 %v7623_v5, %v3274_v29  ;;  %v3724_v5 = vld [vmem:[%s9682_s10 + $0x50] sm:$0xff]  ;;  %v3718_v29 = vld [vmem:[%s9682_s10 + $0x20] sm:$0xff] }
0x2012   :  { %v6280_v49 = vcombine.low %v3716_v20, %v3724_v5 }
0x2013   :  { %3545 = vrot.lane.b32.xlu0 %v3276_v62, %s7669_s18  ;;  %v3726_v62 = vld [vmem:[%s9682_s10 + $0x60] sm:$0xff] }
0x2018   :  { %v3541_v48 = vpop.permute.xlu1 %3540 }
0x2019   :  { %v3543_v44 = vmul.f32 %v7625_v33, %v3541_v48  ;;  %v6281_v33 = vcombine.high %v3716_v20, %v3724_v5  ;;  %v3719_v48 = vld [vmem:[%s9682_s10 + $0x28] sm:$0xff]  ;;  %v7340_v20 = vld [vmem:[%s9683_s11 + $0x10] sm:$0xff]  }
0x201a   :  { %v7341_v5 = vld [vmem:[%s9683_s11 + $0x90] sm:$0xff]  }
0x201b   :  { %3620 = vrot.lane.b32.xlu1 %v3543_v44, %s7669_s18  ;;  %v3727_v44 = vld [vmem:[%s9682_s10 + $0x68] sm:$0xff] }
0x2085   :  { %v3546_v63 = vpop.permute.xlu0 %3545 }
0x2086   :  { %7277 = vmatmul.mubr.msk.f32.vlgmr.msra.gmra.mxu1 %vm186_vm2, %v3546_v63  ;;  %v6300_v63 = vcombine.low %v3734_v14, %v3742_v16  ;;  %v7346_v14 = vld [vmem:[%s9683_s11 + $0x40] sm:$0xff]  }
0x2087   :  { %3925 = vmatpush1.bf16.msra.mxu1 %v6292_v38  ;;  %3944 = vmatprep.mubr.bf16.mxu1 %v7670_v58  ;;  %v3729_v38 = vld [vmem:[%s9682_s10 + $0x78] sm:$0xff]  ;;  %v7348_v16 = vld [vmem:[%s9683_s11] sm:$0xff]  }
0x2088   :  { %3926 = vmatprep.subr.bf16.mxu1 %v6277_v31  ;;  %v7318_v31 = vld [vmem:[%s9683_s11 + $0x78] sm:$0xff]  }
0x208b   :  { %3927 = vmatpush1.bf16.msra.mxu1 %v6276_v46  ;;  %v7322_v46 = vld [vmem:[%s9683_s11 + $0x70] sm:$0xff]  }
0x208c   :  { %4006 = vmatprep.subr.bf16.mxu1 %v6297_v57  ;;  %v7331_v57 = vld [vmem:[%s9683_s11 + $0xe0] sm:$0xff]  }
0x208d   :  { %v3621_v1 = vpop.permute.xlu1 %3620 }
0x208e   :  { %7288 = vmatmul.mubr.msk.f32.vlgmr.msra.gmra.mxu0 %vm186_vm2, %v3621_v1 }
0x208f   :  { %3985 = vmatprep.mubr.bf16.mxu0 %v7670_v58 }
0x2146   :  { %v3615_v2 = vpop.f32.mrf.mxu1 }
0x2148   :  { %v7278_v10 = vpop.f32.mrf.mxu1 }
0x2149   :  { %v6287_v10 = vcombine.high %v3719_v48, %v3727_v44 }
0x214e   :  { %v3690_v30 = vpop.f32.mrf.mxu0 }
0x214f   :  { %v3691_v11 = vadd.f32 %v3690_v30, %v3615_v2  ;;  %v6285_v2 = vcombine.high %v3718_v29, %v3726_v62  ;;  %v3736_v30 = vld [vmem:[%s9682_s10 + $0xb0] sm:$0xff] }
0x2150   :  { %v7289_v12 = vpop.f32.mrf.mxu0 }
0x2151   :  { %v3694_v13 = vadd.f32 %v8491_v0, %v3691_v11  ;;  %v3731_v0 = vld [vmem:[%s9682_s10 + $0x88] sm:$0xff]  ;;  %v3744_v11 = vld [vmem:[%s9682_s10 + $0xf0] sm:$0xff]  ;;  %v3737_v12 = vld [vmem:[%s9682_s10 + $0xb8] sm:$0xff] }
0x2152   :  { %v6294_v45 = vcombine.low %v3731_v0, %v3739_v42  ;;  %v6295_v41 = vcombine.high %v3731_v0, %v3739_v42  ;;  %v3721_v0 = vld [vmem:[%s9682_s10 + $0x38] sm:$0xff]  ;;  %v6304_v39 = vcombine.low %v3736_v30, %v3744_v11 }
0x2153   :  { %7630 = vtanh.f32 %v3694_v13  ;;  %v6275_v54 = vmul.f32 -1.442695, %v3694_v13  ;;  %v3745_v13 = vld [vmem:[%s9682_s10 + $0xf8] sm:$0xff]  ;;  %v6291_v21 = vcombine.high %v3721_v0, %v3729_v38 }
0x2154   :  { %3965 = vmatprep.subr.bf16.mxu0 %v6295_v41  ;;  %v6306_v42 = vcombine.low %v3737_v12, %v3745_v13  ;;  %v6290_v41 = vcombine.low %v3721_v0, %v3729_v38 }
0x2155   :  { %7632 = vpow2.f32 %v6275_v54  ;;  %3966 = vmatpush1.bf16.msra.mxu0 %v6294_v45  ;;  %v6286_v54 = vcombine.low %v3719_v48, %v3727_v44  ;;  %v6288_v45 = vcombine.low %v3720_v36, %v3728_v37 }
0x2156   :  { %3967 = vmatprep.subr.bf16.mxu0 %v6279_v43  ;;  %v7321_v43 = vld [vmem:[%s9683_s11 + $0xb8] sm:$0xff]  }
0x2159   :  { %3968 = vmatpush1.bf16.msra.mxu0 %v6278_v25  ;;  %v7325_v25 = vld [vmem:[%s9683_s11 + $0xb0] sm:$0xff]  }
0x215a   :  { %4047 = vmatprep.subr.bf16.mxu0 %v6299_v47  ;;  %v7335_v47 = vld [vmem:[%s9683_s11 + $0xd8] sm:$0xff]  }
0x2160   :  { %v7631_v19 = vpop.eup %7630 }
0x2161   :  { %3704 = vrot.lane.b32.xlu0 %v7631_v19, %s7668_s22  ;;  %v6284_v19 = vcombine.low %v3718_v29, %v3726_v62 }
0x2162   :  { %v7633_v34 = vpop.eup %7632 }
0x2163   :  { %v3698_v35 = vadd.f32 1.0, %v7633_v34  ;;  %v6305_v34 = vcombine.high %v3736_v30, %v3744_v11 }
0x2165   :  { %7634 = vrcp.f32 %v3698_v35  ;;  %v6307_v35 = vcombine.high %v3737_v12, %v3745_v13 }
0x2172   :  { %v7635_v22 = vpop.eup %7634 }
0x2173   :  { %v3702_v52 = vmul.f32 %v7635_v22, %v8664_v18  ;;  %v3735_v18 = vld [vmem:[%s9682_s10 + $0xa8] sm:$0xff] }
0x2174   :  { %v6303_v61 = vcombine.high %v3735_v18, %v3743_v27  ;;  %v6302_v1 = vcombine.low %v3735_v18, %v3743_v27  ;;  %v7349_v18 = vld [vmem:[%s9683_s11 + $0x80] sm:$0xff]   ;;  %v7350_v27 = vld [vmem:[%s9683_s11 + $0x178] sm:$0xff]  }
0x21d3   :  { %v3705_v24 = vpop.permute.xlu0 %3704 }
0x21d4   :  { %v3707_v50 = vmul.f32 %v7635_v22, %v3705_v24  ;;  %v7323_v22 = vld [vmem:[%s9683_s11 + $0xf0] sm:$0xff]  }
0x21d5   :  { %v7324_v24 = vld [vmem:[%s9683_s11 + $0x30] sm:$0xff]  }
0x21d6   :  { %3709 = vrot.lane.b32.xlu1 %v3707_v50, %s7668_s22  ;;  %v7326_v50 = vld [vmem:[%s9683_s11 + $0x68] sm:$0xff]  }
0x2248   :  { %v3710_v4 = vpop.permute.xlu1 %3709 }
0x2249   :  { %v3712_v56 = vadd.f32 %v3710_v4, %v3702_v52  ;;  %v7336_v52 = vld [vmem:[%s9683_s11 + $0x18] sm:$0xff]  }
0x224a   :  { %v7337_v4 = vld [vmem:[%s9683_s11 + $0x98] sm:$0xff]  }
0x224b   :  { %v3713_v6 = vpack.c.bf16 %v3712_v56, %v3712_v56  ;;  %6123 = vrot.lane.b32.xlu1 %v3712_v56, %s7671_s24  ;;  %v7338_v56 = vld [vmem:[%s9683_s11 + $0x50] sm:$0xff]  }
0x224d   :  { %3747 = vrot.lane.b32.xlu0 %v3713_v6, %s7671_s24  ;;  %v7339_v6 = vld [vmem:[%s9683_s11 + $0xd0] sm:$0xff]  }
0x22bf   :  { %v8731_v15 = vpop.permute.xlu0 %3747 }
0x22c0   :  { %6308 = vmatmul.mubr.msk.bf16.vlgmr.msra.gmra.mxu1 %vm186_vm2, %v8731_v15  ;;  %6309 = vmatmul.mubr.msk.bf16.vlgmr.msra.gmra.mxu0 %vm186_vm2, %v8731_v15 }
0x22c1   :  { %4007 = vmatpush1.bf16.msra.mxu1 %v6296_v17  ;;  %4048 = vmatpush1.bf16.msra.mxu0 %v6298_v60  ;;  %v7333_v17 = vld [vmem:[%s9683_s11 + $0xa0] sm:$0xff]   ;;  %v7334_v60 = vld [vmem:[%s9683_s11 + $0x58] sm:$0xff]  }
0x22c2   :  { %4008 = vmatprep.subr.bf16.mxu1 %v6281_v33  ;;  %4049 = vmatprep.subr.bf16.mxu0 %v6283_v7  ;;  %v7344_v33 = vld [vmem:[%s9683_s11 + $0x8] sm:$0xff]  }
0x22c3   :  { %4026 = vmatprep.mubr.bf16.mxu1 %v7670_v58  ;;  %4067 = vmatprep.mubr.bf16.mxu0 %v7670_v58  ;;  %v7345_v7 = vld [vmem:[%s9683_s11 + $0x88] sm:$0xff]  }
0x22c5   :  { %4009 = vmatpush1.bf16.msra.mxu1 %v6280_v49  ;;  %4050 = vmatpush1.bf16.msra.mxu0 %v6282_v28  ;;  %v7351_v49 = vld [vmem:[%s9683_s11 + $0x1f8] sm:$0xff]   ;;  %v4305_v28 = vlaneseq }
0x22c6   :  { %4088 = vmatprep.subr.bf16.mxu1 %v6301_v8  ;;  %4129 = vmatprep.subr.bf16.mxu0 %v6303_v61 }
0x22c7   :  { %v4306_v8 = vshrl.u32 %v4305_v28, 7 }
0x22c8   :  { %6310 = vmatmul.mubr.msk.bf16.vlgmr.msra.gmra.mxu1 %vm186_vm2, %v8731_v15  ;;  %6311 = vmatmul.mubr.msk.bf16.vlgmr.msra.gmra.mxu0 %vm186_vm2, %v8731_v15 }
0x22c9   :  { %4089 = vmatpush1.bf16.msra.mxu1 %v6300_v63  ;;  %4130 = vmatpush1.bf16.msra.mxu0 %v6302_v1  ;;  %v8902_v61 = vsub.s32 0, %v4306_v8  ;;  %v8904_v29 = vsub.s32 1, %v4306_v8  ;;  %v8906_v62 = vsub.s32 2, %v4306_v8 }
0x22ca   :  { %4090 = vmatprep.subr.bf16.mxu1 %v6285_v2  ;;  %4131 = vmatprep.subr.bf16.mxu0 %v6287_v10  ;;  %v8915_v2 = vsub.s32 3, %v4306_v8 }
0x22cb   :  { %4108 = vmatprep.mubr.bf16.mxu1 %v7670_v58  ;;  %4149 = vmatprep.mubr.bf16.mxu0 %v7670_v58 }
0x22cd   :  { %4091 = vmatpush1.bf16.msra.mxu1 %v6284_v19  ;;  %4132 = vmatpush1.bf16.msra.mxu0 %v6286_v54 }
0x22ce   :  { %4170 = vmatprep.subr.bf16.mxu1 %v6305_v34  ;;  %4211 = vmatprep.subr.bf16.mxu0 %v6307_v35 }
0x22d0   :  { %6312 = vmatmul.mubr.msk.bf16.vlgmr.msra.gmra.mxu1 %vm186_vm2, %v8731_v15  ;;  %6313 = vmatmul.mubr.msk.bf16.vlgmr.msra.gmra.mxu0 %vm186_vm2, %v8731_v15 }
0x22d1   :  { %4171 = vmatpush1.bf16.msra.mxu1 %v6304_v39  ;;  %4212 = vmatpush1.bf16.msra.mxu0 %v6306_v42 }
0x22d2   :  { %4172 = vmatprep.subr.bf16.mxu1 %v6289_v40  ;;  %4213 = vmatprep.subr.bf16.mxu0 %v6291_v21 }
0x22d3   :  { %4190 = vmatprep.mubr.bf16.mxu1 %v7670_v58  ;;  %4231 = vmatprep.mubr.bf16.mxu0 %v7670_v58  ;;  %v7330_v58 = vld [vmem:[%s9683_s11 + $0x60] sm:$0xff]  }
0x22d5   :  { %4173 = vmatpush1.bf16.msra.mxu1 %v6288_v45  ;;  %4214 = vmatpush1.bf16.msra.mxu0 %v6290_v41 }
0x22d6   :  { %6654 = vmatprep.subr.bf16.mxu1 %v7318_v31  ;;  %6676 = vmatprep.subr.bf16.mxu0 %v7319_v26 }
0x22d8   :  { %6314 = vmatmul.mubr.msk.bf16.vlgmr.msra.gmra.mxu1 %vm186_vm2, %v8731_v15  ;;  %6315 = vmatmul.mubr.msk.bf16.vlgmr.msra.gmra.mxu0 %vm186_vm2, %v8731_v15  ;;  %v7347_v15 = vld [vmem:[%s9683_s11 + $0xc0] sm:$0xff]  }
0x22d9   :  { %6655 = vmatpush3.bf16.msra.mxu1 %v7320_v32  ;;  %6677 = vmatpush3.bf16.msra.mxu0 %v7321_v43 }
0x22da   :  { %6656 = vmatprep.subr.bf16.mxu1 %v7322_v46  ;;  %6678 = vmatprep.subr.bf16.mxu0 %v7323_v22 }
0x22dd   :  { %6657 = vmatpush3.bf16.msra.mxu1 %v7324_v24  ;;  %6679 = vmatpush3.bf16.msra.mxu0 %v7325_v25 }
0x22de   :  { %6658 = vmatprep.subr.bf16.mxu1 %v7326_v50  ;;  %6680 = vmatprep.subr.bf16.mxu0 %v7327_v51 }
0x22e1   :  { %6659 = vmatpush3.bf16.msra.mxu1 %v7328_v53  ;;  %6681 = vmatpush3.bf16.msra.mxu0 %v7329_v55 }
0x22e2   :  { %6660 = vmatprep.subr.bf16.mxu1 %v7330_v58  ;;  %6682 = vmatprep.subr.bf16.mxu0 %v7331_v57 }
0x22e5   :  { %6661 = vmatpush3.bf16.msra.mxu1 %v7332_v59  ;;  %6683 = vmatpush3.bf16.msra.mxu0 %v7333_v17 }
0x22e6   :  { %6662 = vmatprep.subr.bf16.mxu1 %v7334_v60  ;;  %6684 = vmatprep.subr.bf16.mxu0 %v7335_v47 }
0x22e9   :  { %6663 = vmatpush3.bf16.msra.mxu1 %v7336_v52  ;;  %6685 = vmatpush3.bf16.msra.mxu0 %v7337_v4 }
0x22ea   :  { %6664 = vmatprep.subr.bf16.mxu1 %v7338_v56  ;;  %6686 = vmatprep.subr.bf16.mxu0 %v7339_v6 }
0x22ed   :  { %6665 = vmatpush3.bf16.msra.mxu1 %v7340_v20  ;;  %6687 = vmatpush3.bf16.msra.mxu0 %v7341_v5 }
0x22ee   :  { %6666 = vmatprep.subr.bf16.mxu1 %v7342_v23  ;;  %6688 = vmatprep.subr.bf16.mxu0 %v7343_v9 }
0x22f1   :  { %6667 = vmatpush3.bf16.msra.mxu1 %v7344_v33  ;;  %6689 = vmatpush3.bf16.msra.mxu0 %v7345_v7 }
0x22f2   :  { %6668 = vmatprep.subr.bf16.mxu1 %v7346_v14  ;;  %6690 = vmatprep.subr.bf16.mxu0 %v7347_v15 }
0x22f5   :  { %6669 = vmatpush3.bf16.msra.mxu1 %v7348_v16  ;;  %6691 = vmatpush3.bf16.msra.mxu0 %v7349_v18 }
0x22f6   :  { %6698 = vmatprep.subr.bf16.mxu1 %v7350_v27  ;;  %6720 = vmatprep.subr.bf16.mxu0 %v7351_v49 }
0x2380   :  { %v8908_v48 = vpop.f32.mrf.mxu1  ;;  %v8910_v44 = vpop.f32.mrf.mxu0 }
0x2381   :  { %v4256_v63 = vrot.slane %v8908_v48, 4  ;;  %v4308_v1 = vrot.slane %v8908_v48, %v8902_v61  ;;  %v4372_v11 = vrot.slane %v8908_v48, %v8904_v29  ;;  %v4436_v12 = vrot.slane %v8908_v48, %v8906_v62 }
0x2382   :  { %v3948_v10 = vpop.f32.mrf.mxu1  ;;  %v3989_v30 = vpop.f32.mrf.mxu0  ;;  %v4500_v43 = vrot.slane %v8908_v48, %v8915_v2  ;;  %v4258_v46 = vrot.slane %v8910_v44, 4  ;;  %v4316_v25 = vrot.slane %v8910_v44, %v8902_v61  ;;  %v4380_v50 = vrot.slane %v8910_v44, %v8904_v29 }
0x2383   :  { %v4257_v13 = vrot.slane %v3948_v10, 4  ;;  %v4312_v19 = vrot.slane %v3948_v10, %v8902_v61  ;;  %v4376_v54 = vrot.slane %v3948_v10, %v8904_v29  ;;  %v4440_v34 = vrot.slane %v3948_v10, %v8906_v62 }
0x2384   :  { %v4504_v35 = vrot.slane %v3948_v10, %v8915_v2  ;;  %v4259_v36 = vrot.slane %v3989_v30, 4  ;;  %v3950_v37 = vpop.f32.mrf.mxu1  ;;  %v3991_v0 = vpop.f32.mrf.mxu0  ;;  %v4320_v38 = vrot.slane %v3989_v30, %v8902_v61  ;;  %v4384_v39 = vrot.slane %v3989_v30, %v8904_v29 }
0x2385   :  { %v4448_v42 = vrot.slane %v3989_v30, %v8906_v62  ;;  %v4512_v40 = vrot.slane %v3989_v30, %v8915_v2  ;;  %v4290_v41 = vsel %vm4288_vm3, %v3948_v10, %v4257_v13  ;;  %v4562_v31 = vsel %vm4288_vm3, %v4312_v19, %v4376_v54 }
0x2386   :  { %v3951_v21 = vpop.f32.mrf.mxu1  ;;  %v3992_v45 = vpop.f32.mrf.mxu0  ;;  %v4578_v26 = vsel %vm4288_vm3, %v4440_v34, %v4504_v35  ;;  %v4292_v32 = vsel %vm4288_vm3, %v3989_v30, %v4259_v36  ;;  %v4564_v22 = vsel %vm4288_vm3, %v4320_v38, %v4384_v39  ;;  %v4444_v51 = vrot.slane %v8910_v44, %v8906_v62 }
0x2387   :  { %v4580_v24 = vsel %vm4288_vm3, %v4448_v42, %v4512_v40  ;;  %v4508_v53 = vrot.slane %v8910_v44, %v8915_v2  ;;  %v4594_v57 = vsub.f32 %v4290_v41, %v4562_v31  ;;  %v4610_v59 = vsub.f32 %v4290_v41, %v4578_v26 }
0x2388   :  { %v8946_v55 = vpop.f32.mrf.mxu1  ;;  %v8948_v58 = vpop.f32.mrf.mxu0  ;;  %v4596_v17 = vsub.f32 %v4292_v32, %v4564_v22  ;;  %v4612_v60 = vsub.f32 %v4292_v32, %v4580_v24  ;;  %v4289_v6 = vsel %vm4288_vm3, %v8908_v48, %v4256_v63  ;;  %v4561_v20 = vsel %vm4288_vm3, %v4308_v1, %v4372_v11  ;;  %v7352_v32 = vld [vmem:[%s9683_s11 + $0x138] sm:$0xff]  }
0x2389   :  { %v4260_v47 = vrot.slane %v8946_v55, 4  ;;  %v4324_v52 = vrot.slane %v8946_v55, %v8902_v61  ;;  %v4388_v5 = vrot.slane %v8946_v55, %v8904_v29  ;;  %v4452_v23 = vrot.slane %v8946_v55, %v8906_v62 }
0x238a   :  { %v8953_v4 = vpop.f32.mrf.mxu1  ;;  %v8955_v56 = vpop.f32.mrf.mxu0  ;;  %v4516_v9 = vrot.slane %v8946_v55, %v8915_v2  ;;  %v4262_v33 = vrot.slane %v8948_v58, 4  ;;  %v4332_v7 = vrot.slane %v8948_v58, %v8902_v61  ;;  %v4396_v14 = vrot.slane %v8948_v58, %v8904_v29 }
0x238b   :  { %v4460_v15 = vrot.slane %v8948_v58, %v8906_v62  ;;  %v4524_v16 = vrot.slane %v8948_v58, %v8915_v2  ;;  %v4261_v49 = vrot.slane %v8953_v4, 4  ;;  %v4328_v28 = vrot.slane %v8953_v4, %v8902_v61 }
0x238c   :  { %v4032_v18 = vpop.f32.mrf.mxu1  ;;  %v4073_v27 = vpop.f32.mrf.mxu0  ;;  %v4392_v8 = vrot.slane %v8953_v4, %v8904_v29  ;;  %v4456_v48 = vrot.slane %v8953_v4, %v8906_v62  ;;  %v4626_v63 = vand.u32 2147483647, %v4594_v57  ;;  %v4642_v1 = vand.u32 2147483647, %v4610_v59 }
0x238d   :  { %v4628_v10 = vand.u32 2147483647, %v4596_v17  ;;  %v4577_v30 = vsel %vm4288_vm3, %v4436_v12, %v4500_v43  ;;  %v4644_v19 = vand.u32 2147483647, %v4612_v60  ;;  %v4593_v54 = vsub.f32 %v4289_v6, %v4561_v20  ;;  %v7353_v20 = vld [vmem:[%s9683_s11 + $0x1b8] sm:$0xff]  }
0x238e   :  { %v4033_v11 = vpop.f32.mrf.mxu1  ;;  %v4074_v13 = vpop.f32.mrf.mxu0  ;;  %v4609_v34 = vsub.f32 %v4289_v6, %v4577_v30  ;;  %v4291_v35 = vsel %vm4288_vm3, %v8910_v44, %v4258_v46  ;;  %v4520_v36 = vrot.slane %v8953_v4, %v8915_v2  ;;  %v4658_v37 = vpack.c.bf16 %v4642_v1, %v4626_v63 }
0x238f   :  { %v4563_v0 = vsel %vm4288_vm3, %v4316_v25, %v4380_v50  ;;  %v4579_v38 = vsel %vm4288_vm3, %v4444_v51, %v4508_v53  ;;  %v4660_v12 = vpack.c.bf16 %v4644_v19, %v4628_v10  ;;  %v4625_v40 = vand.u32 2147483647, %v4593_v54  ;;  %v7354_v51 = vld [vmem:[%s9683_s11 + $0x170] sm:$0xff]  }
0x2390   :  { %v8989_v39 = vpop.f32.mrf.mxu1  ;;  %v8991_v42 = vpop.f32.mrf.mxu0  ;;  %v4641_v21 = vand.u32 2147483647, %v4609_v34  ;;  %v4595_v45 = vsub.f32 %v4291_v35, %v4563_v0  ;;  %v4263_v41 = vrot.slane %v8955_v56, 4  ;;  %v4336_v44 = vrot.slane %v8955_v56, %v8902_v61  ;;  %5729 = vmatprep.mubr.bf16.mxu1 %v4658_v37  ;;  %v7355_v13 = vld [vmem:[%s9683_s11 + $0x1f0] sm:$0xff]  }
0x2391   :  { %v4400_v31 = vrot.slane %v8955_v56, %v8904_v29  ;;  %v4611_v26 = vsub.f32 %v4291_v35, %v4579_v38  ;;  %v4464_v22 = vrot.slane %v8955_v56, %v8906_v62  ;;  %v4528_v24 = vrot.slane %v8955_v56, %v8915_v2  ;;  %5770 = vmatprep.mubr.bf16.mxu0 %v4660_v12  ;;  %v7356_v19 = vld [vmem:[%s9683_s11 + $0x130] sm:$0xff]   ;;  %v7358_v12 = vld [vmem:[%s9683_s11 + $0x168] sm:$0xff]  }
0x2392   :  { %v9001_v43 = vpop.f32.mrf.mxu1  ;;  %v9003_v46 = vpop.f32.mrf.mxu0  ;;  %v4657_v25 = vpack.c.bf16 %v4641_v21, %v4625_v40  ;;  %v4627_v50 = vand.u32 2147483647, %v4595_v45  ;;  %v4264_v57 = vrot.slane %v8989_v39, 4  ;;  %v4340_v59 = vrot.slane %v8989_v39, %v8902_v61 }
0x2393   :  { %v4643_v53 = vand.u32 2147483647, %v4611_v26  ;;  %v4294_v6 = vsel %vm4288_vm3, %v8953_v4, %v4261_v49  ;;  %v4404_v18 = vrot.slane %v8989_v39, %v8904_v29  ;;  %v4468_v27 = vrot.slane %v8989_v39, %v8906_v62 }
0x2394   :  { %v4114_v17 = vpop.f32.mrf.mxu1  ;;  %v4155_v60 = vpop.f32.mrf.mxu0  ;;  %5730 = vmatmul.mubr.bf16.vlgmr.msra.gmra.mxu1 %v4657_v25  ;;  %v4532_v63 = vrot.slane %v8989_v39, %v8915_v2  ;;  %v4266_v1 = vrot.slane %v8991_v42, 4  ;;  %v4348_v49 = vrot.slane %v8991_v42, %v8902_v61  ;;  %v4412_v30 = vrot.slane %v8991_v42, %v8904_v29 }
0x2395   :  { %v4659_v10 = vpack.c.bf16 %v4643_v53, %v4627_v50  ;;  %6699 = vmatpush3.bf16.msra.mxu1 %v7352_v32  ;;  %v4476_v11 = vrot.slane %v8991_v42, %v8906_v62  ;;  %v4540_v35 = vrot.slane %v8991_v42, %v8915_v2  ;;  %v4344_v37 = vrot.slane %v9001_v43, %v8902_v61  ;;  %v7357_v50 = vld [vmem:[%s9683_s11 + $0x1b0] sm:$0xff]  }
0x2396   :  { %v4115_v54 = vpop.f32.mrf.mxu1  ;;  %v4156_v34 = vpop.f32.mrf.mxu0  ;;  %6700 = vmatprep.subr.bf16.mxu1 %v7354_v51  ;;  %v4408_v0 = vrot.slane %v9001_v43, %v8904_v29  ;;  %v4472_v38 = vrot.slane %v9001_v43, %v8906_v62  ;;  %v4536_v40 = vrot.slane %v9001_v43, %v8915_v2  ;;  %v4566_v21 = vsel %vm4288_vm3, %v4328_v28, %v4392_v8 }
0x2397   :  { %5771 = vmatmul.mubr.bf16.vlgmr.msra.gmra.mxu0 %v4659_v10  ;;  %v4582_v45 = vsel %vm4288_vm3, %v4456_v48, %v4520_v36  ;;  %v4296_v26 = vsel %vm4288_vm3, %v8955_v56, %v4263_v41  ;;  %v4598_v51 = vsub.f32 %v4294_v6, %v4566_v21  ;;  %v4568_v28 = vsel %vm4288_vm3, %v4336_v44, %v4400_v31  ;;  %v7359_v56 = vld [vmem:[%s9683_s11 + $0x1e8] sm:$0xff]  }
0x2398   :  { %v9065_v32 = vpop.f32.mrf.mxu1  ;;  %v9067_v25 = vpop.f32.mrf.mxu0  ;;  %6721 = vmatpush3.bf16.msra.mxu0 %v7353_v20  ;;  %v4614_v53 = vsub.f32 %v4294_v6, %v4582_v45  ;;  %v4584_v4 = vsel %vm4288_vm3, %v4464_v22, %v4528_v24  ;;  %v4265_v8 = vrot.slane %v9001_v43, 4  ;;  %v4600_v48 = vsub.f32 %v4296_v26, %v4568_v28  ;;  %v7360_v41 = vld [vmem:[%s9683_s11 + $0x128] sm:$0xff]   ;;  %v7362_v20 = vld [vmem:[%s9683_s11 + $0x160] sm:$0xff]  }
0x2399   :  { %6722 = vmatprep.subr.bf16.mxu0 %v7355_v13  ;;  %6701 = vmatpush3.bf16.msra.mxu1 %v7356_v19  ;;  %v4616_v36 = vsub.f32 %v4296_v26, %v4584_v4  ;;  %v4356_v17 = vrot.slane %v9065_v32, %v8902_v61  ;;  %v4630_v22 = vand.u32 2147483647, %v4598_v51  ;;  %v4420_v60 = vrot.slane %v9065_v32, %v8904_v29  ;;  %v7361_v45 = vld [vmem:[%s9683_s11 + $0x1a8] sm:$0xff]  }
0x239a   :  { %v9083_v44 = vpop.f32.mrf.mxu1  ;;  %v9085_v31 = vpop.f32.mrf.mxu0  ;;  %6702 = vmatprep.subr.bf16.mxu1 %v7358_v12  ;;  %v4646_v24 = vand.u32 2147483647, %v4614_v53  ;;  %v4484_v6 = vrot.slane %v9065_v32, %v8906_v62  ;;  %v4352_v10 = vrot.slane %v9003_v46, %v8902_v61  ;;  %v4632_v13 = vand.u32 2147483647, %v4600_v48 }
0x239b   :  { %v4648_v19 = vand.u32 2147483647, %v4616_v36  ;;  %v4548_v54 = vrot.slane %v9065_v32, %v8915_v2  ;;  %v4428_v51 = vrot.slane %v9067_v25, %v8904_v29  ;;  %v4267_v28 = vrot.slane %v9003_v46, 4  ;;  %v7363_v36 = vld [vmem:[%s9683_s11 + $0x1e0] sm:$0xff]  }
0x239c   :  { %v4196_v34 = vpop.f32.mrf.mxu1  ;;  %v4237_v12 = vpop.f32.mrf.mxu0  ;;  %6723 = vmatpush3.bf16.msra.mxu0 %v7357_v50  ;;  %v4662_v21 = vpack.c.bf16 %v4646_v24, %v4630_v22  ;;  %v4416_v4 = vrot.slane %v9003_v46, %v8904_v29  ;;  %v7364_v22 = vld [vmem:[%s9683_s11 + $0x120] sm:$0xff]   ;;  %v4488_v3 = vrot.slane %v9083_v44, %v8906_v62  ;;  %v4565_v53 = vsel %vm4288_vm3, %v4324_v52, %v4388_v5  ;;  %v7367_v52 = vld [vmem:[%s9683_s11 + $0x1d8] sm:$0xff]  }
0x239d   :  { %6724 = vmatprep.subr.bf16.mxu0 %v7359_v56  ;;  %v4664_v50 = vpack.c.bf16 %v4648_v19, %v4632_v13  ;;  %6703 = vmatpush3.bf16.msra.mxu1 %v7360_v41  ;;  %v4480_v12 = vrot.slane %v9003_v46, %v8906_v62  ;;  %v4544_v56 = vrot.slane %v9003_v46, %v8915_v2  ;;  %v4268_v41 = vrot.slane %v9065_v32, 4  ;;  %v7366_v19 = vld [vmem:[%s9683_s11 + $0x158] sm:$0xff]  }
0x239e   :  { %v4197_v24 = vpop.f32.mrf.mxu1  ;;  %v4238_v34 = vpop.f32.mrf.mxu0  ;;  %5811 = vmatprep.mubr.bf16.mxu1 %v4662_v21  ;;  %v4270_v13 = vrot.slane %v9067_v25, 4  ;;  %6704 = vmatprep.subr.bf16.mxu1 %v7362_v20  ;;  %v4552_v21 = vrot.slane %v9083_v44, %v8915_v2  ;;  %v7365_v20 = vld [vmem:[%s9683_s11 + $0x1a0] sm:$0xff]   ;;  %v4269_v48 = vrot.slane %v9083_v44, 4  ;;  %v7368_v5 = vld [vmem:[%s9683_s11 + $0x118] sm:$0xff]  }
0x239f   :  { %5852 = vmatprep.mubr.bf16.mxu0 %v4664_v50  ;;  %v4360_v24 = vrot.slane %v9083_v44, %v8902_v61  ;;  %v4424_v34 = vrot.slane %v9083_v44, %v8904_v29  ;;  %v4293_v50 = vsel %vm4288_vm3, %v8946_v55, %v4260_v47  ;;  %v4295_v47 = vsel %vm4288_vm3, %v8948_v58, %v4262_v33 }
0x23a0   :  { %6725 = vmatpush3.bf16.msra.mxu0 %v7361_v45  ;;  %v4581_v45 = vsel %vm4288_vm3, %v4452_v23, %v4516_v9  ;;  %v4597_v55 = vsub.f32 %v4293_v50, %v4565_v53  ;;  %v4567_v23 = vsel %vm4288_vm3, %v4332_v7, %v4396_v14  ;;  %v7370_v9 = vld [vmem:[%s9683_s11 + $0x150] sm:$0xff]   ;;  %v4583_v33 = vsel %vm4288_vm3, %v4460_v15, %v4524_v16 }
0x23a1   :  { %6726 = vmatprep.subr.bf16.mxu0 %v7363_v36  ;;  %6705 = vmatpush3.bf16.msra.mxu1 %v7364_v22  ;;  %v4613_v26 = vsub.f32 %v4293_v50, %v4581_v45  ;;  %v4599_v53 = vsub.f32 %v4295_v47, %v4567_v23  ;;  %v4298_v36 = vsel %vm4288_vm3, %v9001_v43, %v4265_v8  ;;  %v7371_v43 = vld [vmem:[%s9683_s11 + $0x1d0] sm:$0xff]  }
0x23a2   :  { %6706 = vmatprep.subr.bf16.mxu1 %v7366_v19  ;;  %v4570_v7 = vsel %vm4288_vm3, %v4344_v37, %v4408_v0  ;;  %v4368_v14 = vrot.slane %v9085_v31, %v8902_v61  ;;  %v9197_v58 = vand.u32 2147483647, %v4597_v55  ;;  %v4586_v16 = vsel %vm4288_vm3, %v4472_v38, %v4536_v40  ;;  %v7369_v37 = vld [vmem:[%s9683_s11 + $0x198] sm:$0xff]   ;;  %v7372_v38 = vld [vmem:[%s9683_s11 + $0x110] sm:$0xff]  }
0x23a3   :  { %v9199_v15 = vand.u32 2147483647, %v4613_v26  ;;  %v4432_v8 = vrot.slane %v9085_v31, %v8904_v29  ;;  %v4615_v0 = vsub.f32 %v4295_v47, %v4583_v33  ;;  %v4602_v22 = vsub.f32 %v4298_v36, %v4570_v7  ;;  %v7374_v47 = vld [vmem:[%s9683_s11 + $0x148] sm:$0xff]  }
0x23a4   :  { %6727 = vmatpush3.bf16.msra.mxu0 %v7365_v20  ;;  %v9215_v26 = vsel %vm4288_vm3, %v9003_v46, %v4267_v28  ;;  %v4271_v19 = vrot.slane %v9085_v31, 4  ;;  %v4618_v40 = vsub.f32 %v4298_v36, %v4586_v16  ;;  %v4572_v20 = vsel %vm4288_vm3, %v4352_v10, %v4416_v4 }
0x23a5   :  { %6728 = vmatprep.subr.bf16.mxu0 %v7367_v52  ;;  %6707 = vmatpush3.bf16.msra.mxu1 %v7368_v5  ;;  %v9229_v28 = vsel %vm4288_vm3, %v4480_v12, %v4544_v56  ;;  %v4496_v50 = vrot.slane %v9085_v31, %v8906_v62  ;;  %v4560_v45 = vrot.slane %v9085_v31, %v8915_v2  ;;  %v9238_v52 = vand.u32 2147483647, %v4599_v53  ;;  %v7378_v53 = vld [vmem:[%s9683_s11 + $0x140] sm:$0xff]  }
0x23a6   :  { %6708 = vmatprep.subr.bf16.mxu1 %v7370_v9  ;;  %v4604_v46 = vsub.f32 %v9215_v26, %v4572_v20  ;;  %v4661_v10 = vpack.c.bf16 %v9199_v15, %v9197_v58  ;;  %v4297_v4 = vsel %vm4288_vm3, %v8989_v39, %v4264_v57  ;;  %v4569_v12 = vsel %vm4288_vm3, %v4340_v59, %v4404_v18  ;;  %v7373_v57 = vld [vmem:[%s9683_s11 + $0x190] sm:$0xff]   ;;  %v7375_v39 = vld [vmem:[%s9683_s11 + $0x1c8] sm:$0xff]  }
0x23a7   :  { %v4585_v56 = vsel %vm4288_vm3, %v4468_v27, %v4532_v63  ;;  %v9264_v5 = vand.u32 2147483647, %v4615_v0  ;;  %v9266_v55 = vand.u32 2147483647, %v4602_v22  ;;  %v4620_v59 = vsub.f32 %v9215_v26, %v9229_v28  ;;  %v7376_v27 = vld [vmem:[%s9683_s11 + $0x108] sm:$0xff]   ;;  %v7388_v58 = vld [vmem:[%s9683_s11 + $0x230] sm:$0xff]  }
0x23a8   :  { %6729 = vmatpush3.bf16.msra.mxu0 %v7369_v37  ;;  %v4601_v18 = vsub.f32 %v4297_v4, %v4569_v12  ;;  %v9276_v63 = vand.u32 2147483647, %v4618_v40  ;;  %v4617_v23 = vsub.f32 %v4297_v4, %v4585_v56  ;;  %v4299_v9 = vsel %vm4288_vm3, %v8991_v42, %v4266_v1  ;;  %v7377_v42 = vld [vmem:[%s9683_s11 + $0x188] sm:$0xff]   ;;  %v7386_v56 = vld [vmem:[%s9683_s11 + $0x270] sm:$0xff]  }
0x23a9   :  { %6730 = vmatprep.subr.bf16.mxu0 %v7371_v43  ;;  %6709 = vmatpush3.bf16.msra.mxu1 %v7372_v38  ;;  %v4571_v33 = vsel %vm4288_vm3, %v4348_v49, %v4412_v30  ;;  %v9292_v36 = vand.u32 2147483647, %v4604_v46  ;;  %v4587_v1 = vsel %vm4288_vm3, %v4476_v11, %v4540_v35  ;;  %v4302_v30 = vsel %vm4288_vm3, %v9083_v44, %v4269_v48  ;;  %v7384_v46 = vld [vmem:[%s9683_s11 + $0x238] sm:$0xff]  }
0x23aa   :  { %6710 = vmatprep.subr.bf16.mxu1 %v7374_v47  ;;  %v9294_v7 = vand.u32 2147483647, %v4601_v18  ;;  %v4603_v16 = vsub.f32 %v4299_v9, %v4571_v33  ;;  %v9303_v37 = vand.u32 2147483647, %v4617_v23  ;;  %v4619_v49 = vsub.f32 %v4299_v9, %v4587_v1  ;;  %v7387_v9 = vld [vmem:[%s9683_s11 + $0x2f0] sm:$0xff]   ;;  %v7391_v33 = vld [vmem:[%s9683_s11 + $0x2e8] sm:$0xff]  }
0x23ab   :  { %v4574_v0 = vsel %vm4288_vm3, %v4360_v24, %v4424_v34  ;;  %v4590_v35 = vsel %vm4288_vm3, %v4488_v3, %v4552_v21  ;;  %v4304_v22 = vsel %vm4288_vm3, %v9085_v31, %v4271_v19  ;;  %v7379_v24 = vld [vmem:[%s9683_s11 + $0x1c0] sm:$0xff]   ;;  %v4576_v21 = vsel %vm4288_vm3, %v4368_v14, %v4432_v8  ;;  %v7382_v19 = vld [vmem:[%s9683_s11 + $0x278] sm:$0xff]   ;;  %v7393_v1 = vld [vmem:[%s9683_s11 + $0x2a8] sm:$0xff]  }
0x23ac   :  { %6731 = vmatpush3.bf16.msra.mxu0 %v7373_v57  ;;  %v9319_v11 = vand.u32 2147483647, %v4603_v16  ;;  %v4606_v48 = vsub.f32 %v4302_v30, %v4574_v0  ;;  %v7380_v34 = vld [vmem:[%s9683_s11 + $0x100] sm:$0xff]   ;;  %v4665_v26 = vpack.c.bf16 %v9303_v37, %v9294_v7  ;;  %v9338_v44 = vand.u32 2147483647, %v4619_v49  ;;  %v7422_v7 = vld [vmem:[%s9683_s11 + $0x368] sm:$0xff]  }
0x23ad   :  { %6732 = vmatprep.subr.bf16.mxu0 %v7375_v39  ;;  %6711 = vmatpush3.bf16.msra.mxu1 %v7376_v27  ;;  %v4622_v3 = vsub.f32 %v4302_v30, %v4590_v35  ;;  %v4592_v38 = vsel %vm4288_vm3, %v4496_v50, %v4560_v45  ;;  %v4608_v40 = vsub.f32 %v4304_v22, %v4576_v21  ;;  %v7381_v50 = vld [vmem:[%s9683_s11 + $0x180] sm:$0xff]   ;;  %v4652_v12 = vand.u32 2147483647, %v4620_v59  ;;  %v7398_v30 = vld [vmem:[%s9683_s11 + $0x258] sm:$0xff]   ;;  %v7405_v21 = vld [vmem:[%s9683_s11 + $0x290] sm:$0xff]  }
0x23ae   :  { %6712 = vmatprep.subr.bf16.mxu1 %v7378_v53  ;;  %v9347_v43 = vand.u32 2147483647, %v4606_v48  ;;  %v4301_v20 = vsel %vm4288_vm3, %v9065_v32, %v4268_v41  ;;  %v4667_v31 = vpack.c.bf16 %v9338_v44, %v9319_v11  ;;  %v4624_v14 = vsub.f32 %v4304_v22, %v4592_v38  ;;  %v7392_v53 = vld [vmem:[%s9683_s11 + $0x228] sm:$0xff]   ;;  %v7395_v16 = vld [vmem:[%s9683_s11 + $0x2e0] sm:$0xff]   ;;  %v7400_v35 = vld [vmem:[%s9683_s11 + $0x218] sm:$0xff]  }
0x23af   :  { %v9356_v28 = vand.u32 2147483647, %v4622_v3  ;;  %v4573_v8 = vsel %vm4288_vm3, %v4356_v17, %v4420_v60  ;;  %v9368_v41 = vand.u32 2147483647, %v4608_v40  ;;  %v4589_v45 = vsel %vm4288_vm3, %v4484_v6, %v4548_v54  ;;  %v7383_v60 = vld [vmem:[%s9683_s11 + $0x2f8] sm:$0xff]   ;;  %v7396_v49 = vld [vmem:[%s9683_s11 + $0x220] sm:$0xff]  }
0x23b0   :  { %6733 = vmatpush3.bf16.msra.mxu0 %v7377_v42  ;;  %v4605_v47 = vsub.f32 %v4301_v20, %v4573_v8  ;;  %v4303_v17 = vsel %vm4288_vm3, %v9067_v25, %v4270_v13  ;;  %v9389_v6 = vand.u32 2147483647, %v4624_v14  ;;  %v4621_v54 = vsub.f32 %v4301_v20, %v4589_v45  ;;  %v7397_v0 = vld [vmem:[%s9683_s11 + $0x2a0] sm:$0xff]   ;;  %v7399_v42 = vld [vmem:[%s9683_s11 + $0x2d8] sm:$0xff]   ;;  %v7402_v48 = vld [vmem:[%s9683_s11 + $0x250] sm:$0xff]  }
0x23b1   :  { %6734 = vmatprep.subr.bf16.mxu0 %v7379_v24  ;;  %6713 = vmatpush3.bf16.msra.mxu1 %v7380_v34  ;;  %v4670_v32 = vpack.c.bf16 %v9356_v28, %v9347_v43  ;;  %v9690_v13 = vrot.slane %v9067_v25, %v8902_v61  ;;  %v9691_v18 = vrot.slane %v9067_v25, %v8915_v2  ;;  %v7401_v22 = vld [vmem:[%s9683_s11 + $0x298] sm:$0xff]   ;;  %v7403_v24 = vld [vmem:[%s9683_s11 + $0x2d0] sm:$0xff]   ;;  %v7406_v3 = vld [vmem:[%s9683_s11 + $0x248] sm:$0xff]  }
0x23b2   :  { %6742 = vmatprep.subr.bf16.mxu1 %v7382_v19  ;;  %v9401_v57 = vand.u32 2147483647, %v4605_v47  ;;  %v9692_v39 = vrot.slane %v9067_v25, %v8906_v62  ;;  %v4672_v61 = vpack.c.bf16 %v9389_v6, %v9368_v41  ;;  %v4666_v2 = vpack.c.bf16 %v9276_v63, %v9266_v55  ;;  %v7385_v62 = vld [vmem:[%s9683_s11 + $0x2b8] sm:$0xff]   ;;  %v7389_v63 = vld [vmem:[%s9683_s11 + $0x2b0] sm:$0xff]   ;;  %v7407_v19 = vld [vmem:[%s9683_s11 + $0x2c8] sm:$0xff]  }
0x23b3   :  { %v4575_v4 = vsel %vm4288_vm3, %v9690_v13, %v4428_v51  ;;  %v9412_v51 = vand.u32 2147483647, %v4621_v54  ;;  %v4663_v23 = vpack.c.bf16 %v9264_v5, %v9238_v52  ;;  %v4668_v55 = vpack.c.bf16 %v4652_v12, %v9292_v36  ;;  %v7390_v52 = vld [vmem:[%s9683_s11 + $0x268] sm:$0xff]   ;;  %v7394_v36 = vld [vmem:[%s9683_s11 + $0x260] sm:$0xff]   ;;  %v7404_v34 = vld [vmem:[%s9683_s11 + $0x210] sm:$0xff]  }
0x23b4   :  { %v4591_v29 = vsel %vm4288_vm3, %v9692_v39, %v9691_v18  ;;  %v4607_v27 = vsub.f32 %v4303_v17, %v4575_v4  ;;  %6735 = vmatpush3.bf16.msra.mxu0 %v7381_v50  ;;  %5812 = vmatmul.mubr.bf16.vlgmr.msra.gmra.mxu1 %v4661_v10  ;;  %v7408_v38 = vld [vmem:[%s9683_s11 + $0x208] sm:$0xff]   ;;  %v7410_v40 = vld [vmem:[%s9683_s11 + $0x240] sm:$0xff]   ;;  %v7414_v50 = vld [vmem:[%s9683_s11 + $0x378] sm:$0xff]  }
0x23b5   :  { %v4623_v59 = vsub.f32 %v4303_v17, %v4591_v29  ;;  %6764 = vmatprep.subr.bf16.mxu0 %v7383_v60  ;;  %6743 = vmatpush3.bf16.msra.mxu1 %v7384_v46  ;;  %v4669_v15 = vpack.c.bf16 %v9412_v51, %v9401_v57  ;;  %v7409_v20 = vld [vmem:[%s9683_s11 + $0x288] sm:$0xff]   ;;  %v7411_v14 = vld [vmem:[%s9683_s11 + $0x2c0] sm:$0xff]   ;;  %v7415_v47 = vld [vmem:[%s9683_s11 + $0x3f8] sm:$0xff]  }
0x23b6   :  { %v9422_v25 = vand.u32 2147483647, %v4607_v27  ;;  %5893 = vmatprep.mubr.bf16.mxu1 %v4666_v2  ;;  %6744 = vmatprep.subr.bf16.mxu1 %v7386_v56  ;;  %v7412_v8 = vld [vmem:[%s9683_s11 + $0x200] sm:$0xff]   ;;  %v7416_v17 = vld [vmem:[%s9683_s11 + $0x338] sm:$0xff]   ;;  %v7418_v60 = vld [vmem:[%s9683_s11 + $0x370] sm:$0xff]  }
0x23b7   :  { %v9434_v10 = vand.u32 2147483647, %v4623_v59  ;;  %5853 = vmatmul.mubr.bf16.vlgmr.msra.gmra.mxu0 %v4663_v23  ;;  %v7413_v45 = vld [vmem:[%s9683_s11 + $0x280] sm:$0xff]   ;;  %v7417_v46 = vld [vmem:[%s9683_s11 + $0x3b8] sm:$0xff]   ;;  %v7419_v54 = vld [vmem:[%s9683_s11 + $0x3f0] sm:$0xff]  }
0x23b8   :  { %6765 = vmatpush3.bf16.msra.mxu0 %v7385_v62  ;;  %5934 = vmatprep.mubr.bf16.mxu0 %v4668_v55  ;;  %v7420_v13 = vld [vmem:[%s9683_s11 + $0x330] sm:$0xff]   ;;  %v7424_v11 = vld [vmem:[%s9683_s11 + $0x328] sm:$0xff]   ;;  %v7426_v44 = vld [vmem:[%s9683_s11 + $0x360] sm:$0xff]   ;;  %v9693_v55 = vmov 0.0  }
0x23b9   :  { %v4671_v5 = vpack.c.bf16 %v9434_v10, %v9422_v25  ;;  %6766 = vmatprep.subr.bf16.mxu0 %v7387_v9  ;;  %6745 = vmatpush3.bf16.msra.mxu1 %v7388_v58  ;;  %v7421_v37 = vld [vmem:[%s9683_s11 + $0x3b0] sm:$0xff]   ;;  %v7425_v43 = vld [vmem:[%s9683_s11 + $0x3a8] sm:$0xff]   ;;  %v7428_v28 = vld [vmem:[%s9683_s11 + $0x320] sm:$0xff]   ;;  %v6124_v25 = vpop.permute.xlu1 %6123 }
0x23ba   :  { %6746 = vmatprep.subr.bf16.mxu1 %v7390_v52  ;;  %v7430_v41 = vld [vmem:[%s9683_s11 + $0x358] sm:$0xff]   ;;  %v7434_v12 = vld [vmem:[%s9683_s11 + $0x350] sm:$0xff]   ;;  %v7438_v29 = vld [vmem:[%s9683_s11 + $0x348] sm:$0xff]  }
0x23bb   :  { %v7431_v6 = vld [vmem:[%s9683_s11 + $0x3d8] sm:$0xff]   ;;  %v7435_v18 = vld [vmem:[%s9683_s11 + $0x3d0] sm:$0xff]   ;;  %v7440_v59 = vld [vmem:[%s9683_s11 + $0x308] sm:$0xff]  }
0x23bc   :  { %6767 = vmatpush3.bf16.msra.mxu0 %v7389_v63  ;;  %v7432_v4 = vld [vmem:[%s9683_s11 + $0x318] sm:$0xff]   ;;  %v7436_v39 = vld [vmem:[%s9683_s11 + $0x310] sm:$0xff]   ;;  %v7442_v2 = vld [vmem:[%s9683_s11 + $0x340] sm:$0xff]  }
0x23bd   :  { %6768 = vmatprep.subr.bf16.mxu0 %v7391_v33  ;;  %6747 = vmatpush3.bf16.msra.mxu1 %v7392_v53  ;;  %v7433_v56 = vld [vmem:[%s9683_s11 + $0x398] sm:$0xff]   ;;  %v7437_v27 = vld [vmem:[%s9683_s11 + $0x390] sm:$0xff]   ;;  %v7441_v62 = vld [vmem:[%s9683_s11 + $0x388] sm:$0xff]  }
0x23be   :  { %6748 = vmatprep.subr.bf16.mxu1 %v7394_v36  ;;  %v7443_v23 = vld [vmem:[%s9683_s11 + $0x3c0] sm:$0xff]   ;;  %v6044_v52 = vld [vmem:[%s9684_s12 + $0x18] sm:$0xff]  ;;  %v6043_v63 = vld [vmem:[%s9684_s12 + $0x10] sm:$0xff] }
0x23bf   :  { %v7444_v9 = vld [vmem:[%s9683_s11 + $0x300] sm:$0xff]   ;;  %v6042_v57 = vld [vmem:[%s9684_s12 + $0x8] sm:$0xff]  ;;  %v6047_v10 = vld [vmem:[%s9685_s13 + $0x10] sm:$0xff] }
0x23c0   :  { %6769 = vmatpush3.bf16.msra.mxu0 %v7393_v1  ;;  %v7445_v58 = vld [vmem:[%s9683_s11 + $0x380] sm:$0xff]  }
0x23c1   :  { %6770 = vmatprep.subr.bf16.mxu0 %v7395_v16  ;;  %6749 = vmatpush3.bf16.msra.mxu1 %v7396_v49  ;;  %v6041_v51 = vld [vmem:[%s9684_s12] sm:$0xff] }
0x23c2   :  { %6750 = vmatprep.subr.bf16.mxu1 %v7398_v30  ;;  %v6045_v33 = vld [vmem:[%s9685_s13] sm:$0xff] }
0x23c4   :  { %6771 = vmatpush3.bf16.msra.mxu0 %v7397_v0 }
0x23c5   :  { %6772 = vmatprep.subr.bf16.mxu0 %v7399_v42  ;;  %6751 = vmatpush3.bf16.msra.mxu1 %v7400_v35 }
0x23c6   :  { %6752 = vmatprep.subr.bf16.mxu1 %v7402_v48 }
0x23c8   :  { %6773 = vmatpush3.bf16.msra.mxu0 %v7401_v22 }
0x23c9   :  { %6774 = vmatprep.subr.bf16.mxu0 %v7403_v24  ;;  %6753 = vmatpush3.bf16.msra.mxu1 %v7404_v34 }
0x23ca   :  { %6754 = vmatprep.subr.bf16.mxu1 %v7406_v3 }
0x23cc   :  { %6775 = vmatpush3.bf16.msra.mxu0 %v7405_v21 }
0x23cd   :  { %6776 = vmatprep.subr.bf16.mxu0 %v7407_v19  ;;  %6755 = vmatpush3.bf16.msra.mxu1 %v7408_v38 }
0x23ce   :  { %6756 = vmatprep.subr.bf16.mxu1 %v7410_v40 }
0x23d0   :  { %6777 = vmatpush3.bf16.msra.mxu0 %v7409_v20 }
0x23d1   :  { %6778 = vmatprep.subr.bf16.mxu0 %v7411_v14  ;;  %6757 = vmatpush3.bf16.msra.mxu1 %v7412_v8 }
0x23d2   :  { %6786 = vmatprep.subr.bf16.mxu1 %v7414_v50 }
0x23d4   :  { %6779 = vmatpush3.bf16.msra.mxu0 %v7413_v45  ;;  %5894 = vmatmul.mubr.bf16.vlgmr.msra.gmra.mxu1 %v4665_v26  ;;  %v7423_v26 = vld [vmem:[%s9683_s11 + $0x3e8] sm:$0xff]  }
0x23d5   :  { %6808 = vmatprep.subr.bf16.mxu0 %v7415_v47  ;;  %6787 = vmatpush3.bf16.msra.mxu1 %v7416_v17 }
0x23d6   :  { %5975 = vmatprep.mubr.bf16.mxu1 %v4670_v32  ;;  %6788 = vmatprep.subr.bf16.mxu1 %v7418_v60  ;;  %v7429_v32 = vld [vmem:[%s9683_s11 + $0x3a0] sm:$0xff]  }
0x23d7   :  { %5935 = vmatmul.mubr.bf16.vlgmr.msra.gmra.mxu0 %v4667_v31  ;;  %v7427_v31 = vld [vmem:[%s9683_s11 + $0x3e0] sm:$0xff]  }
0x23d8   :  { %6809 = vmatpush3.bf16.msra.mxu0 %v7417_v46  ;;  %6016 = vmatprep.mubr.bf16.mxu0 %v4672_v61  ;;  %v7439_v61 = vld [vmem:[%s9683_s11 + $0x3c8] sm:$0xff]  }
0x23d9   :  { %6810 = vmatprep.subr.bf16.mxu0 %v7419_v54  ;;  %6789 = vmatpush3.bf16.msra.mxu1 %v7420_v13 }
0x23da   :  { %6790 = vmatprep.subr.bf16.mxu1 %v7422_v7 }
0x23dc   :  { %6811 = vmatpush3.bf16.msra.mxu0 %v7421_v37 }
0x23dd   :  { %6812 = vmatprep.subr.bf16.mxu0 %v7423_v26  ;;  %6791 = vmatpush3.bf16.msra.mxu1 %v7424_v11 }
0x23de   :  { %6792 = vmatprep.subr.bf16.mxu1 %v7426_v44 }
0x23e0   :  { %6813 = vmatpush3.bf16.msra.mxu0 %v7425_v43 }
0x23e1   :  { %6814 = vmatprep.subr.bf16.mxu0 %v7427_v31  ;;  %6793 = vmatpush3.bf16.msra.mxu1 %v7428_v28 }
0x23e2   :  { %6794 = vmatprep.subr.bf16.mxu1 %v7430_v41 }
0x23e4   :  { %6815 = vmatpush3.bf16.msra.mxu0 %v7429_v32 }
0x23e5   :  { %6816 = vmatprep.subr.bf16.mxu0 %v7431_v6  ;;  %6795 = vmatpush3.bf16.msra.mxu1 %v7432_v4 }
0x23e6   :  { %6796 = vmatprep.subr.bf16.mxu1 %v7434_v12 }
0x23e8   :  { %6817 = vmatpush3.bf16.msra.mxu0 %v7433_v56 }
0x23e9   :  { %6818 = vmatprep.subr.bf16.mxu0 %v7435_v18  ;;  %6797 = vmatpush3.bf16.msra.mxu1 %v7436_v39 }
0x23ea   :  { %6798 = vmatprep.subr.bf16.mxu1 %v7438_v29 }
0x23ec   :  { %6819 = vmatpush3.bf16.msra.mxu0 %v7437_v27 }
0x23ed   :  { %6820 = vmatprep.subr.bf16.mxu0 %v7439_v61  ;;  %6799 = vmatpush3.bf16.msra.mxu1 %v7440_v59 }
0x23ee   :  { %6800 = vmatprep.subr.bf16.mxu1 %v7442_v2 }
0x23f0   :  { %6821 = vmatpush3.bf16.msra.mxu0 %v7441_v62 }
0x23f1   :  { %6822 = vmatprep.subr.bf16.mxu0 %v7443_v23  ;;  %6801 = vmatpush3.bf16.msra.mxu1 %v7444_v9 }
0x23f2   :  { %7290 = vmatprep.subr.mxu1 %v9693_v55 }
0x23f4   :  { %6823 = vmatpush3.bf16.msra.mxu0 %v7445_v58  ;;  %5976 = vmatmul.mubr.bf16.vlgmr.msra.gmra.mxu1 %v4669_v15  ;;  %v6048_v15 = vld [vmem:[%s9685_s13 + $0x18] sm:$0xff] }
0x23f5   :  { %7301 = vmatprep.subr.mxu0 %v9693_v55  ;;  %7298 = vmatprep.mubr.msk.f32.mxu1 %vm7667_vm1, %v9693_v55 }
0x23f6   :  { %7291 = vmatpush3.msra.mxu1 %v6048_v15 }
0x23f7   :  { %6017 = vmatmul.mubr.bf16.vlgmr.msra.gmra.mxu0 %v4671_v5  ;;  %7292 = vmatprep.subr.mxu1 %v9693_v55  ;;  %v6046_v5 = vld [vmem:[%s9685_s13 + $0x8] sm:$0xff] }
0x23f8   :  { %7302 = vmatpush3.msra.mxu0 %v6044_v52  ;;  %7309 = vmatprep.mubr.msk.f32.mxu0 %vm7667_vm1, %v9693_v55 }
0x23f9   :  { %7303 = vmatprep.subr.mxu0 %v9693_v55  ;;  %7293 = vmatpush3.msra.mxu1 %v6047_v10 }
0x23fa   :  { %7304 = vmatpush3.msra.mxu0 %v6043_v63  ;;  %7294 = vmatprep.subr.mxu1 %v9693_v55 }
0x23fb   :  { %7305 = vmatprep.subr.mxu0 %v9693_v55  ;;  %7295 = vmatpush3.msra.mxu1 %v6046_v5 }
0x23fc   :  { %7306 = vmatpush3.msra.mxu0 %v6042_v57  ;;  %7296 = vmatprep.subr.mxu1 %v9693_v55 }
0x23fd   :  { %7307 = vmatprep.subr.mxu0 %v9693_v55  ;;  %7297 = vmatpush3.msra.mxu1 %v6045_v33 }
0x23fe   :  { %7308 = vmatpush3.msra.mxu0 %v6041_v51 }
0x23ff   :  { %7310 = vmatmul.mubr.msk.f32.vlgmr.msra.gmra.mxu0 %vm186_vm2, %v6124_v25 }
0x2454   :  { %v6670_v53 = vpop.f32.mrf.mxu1 }
0x2456   :  { %v6671_v36 = vpop.f32.mrf.mxu1 }
0x2457   :  { %v6692_v1 = vpop.f32.mrf.mxu0  ;;  %v6672_v38 = vadd.f32 %v6671_v36, %v6670_v53 }
0x2458   :  { %v6673_v16 = vpop.f32.mrf.mxu1 }
0x2459   :  { %v6693_v49 = vpop.f32.mrf.mxu0 }
0x245a   :  { %v6674_v30 = vpop.f32.mrf.mxu1  ;;  %v6694_v40 = vadd.f32 %v6693_v49, %v6692_v1 }
0x245b   :  { %v6695_v0 = vpop.f32.mrf.mxu0  ;;  %v6675_v47 = vadd.f32 %v6674_v30, %v6673_v16 }
0x245c   :  { %v5773_v45 = vadd.f32 %v6694_v40, %v6672_v38 }
0x245d   :  { %v6696_v35 = vpop.f32.mrf.mxu0 }
0x245e   :  { %v6697_v17 = vadd.f32 %v6696_v35, %v6695_v0 }
0x2460   :  { %v5776_v7 = vadd.f32 %v6697_v17, %v6675_v47 }
0x2474   :  { %v6714_v42 = vpop.f32.mrf.mxu1 }
0x2476   :  { %v6715_v48 = vpop.f32.mrf.mxu1 }
0x2477   :  { %v6736_v22 = vpop.f32.mrf.mxu0  ;;  %v6716_v8 = vadd.f32 %v6715_v48, %v6714_v42 }
0x2478   :  { %v6717_v24 = vpop.f32.mrf.mxu1 }
0x2479   :  { %v6737_v34 = vpop.f32.mrf.mxu0  ;;  %v5814_v46 = vadd.f32 %v6716_v8, %v5773_v45 }
0x247a   :  { %v6718_v3 = vpop.f32.mrf.mxu1  ;;  %v6738_v37 = vadd.f32 %v6737_v34, %v6736_v22 }
0x247b   :  { %v6739_v21 = vpop.f32.mrf.mxu0  ;;  %v6719_v54 = vadd.f32 %v6718_v3, %v6717_v24  ;;  %v6197_v3 = vld [vmem:[%s9686_s14] sm:$0xf] }
0x247c   :  { %v5855_v44 = vadd.f32 %v6738_v37, %v5814_v46 }
0x247d   :  { %v6740_v20 = vpop.f32.mrf.mxu0  ;;  %v5817_v43 = vadd.f32 %v6719_v54, %v5776_v7 }
0x247e   :  { %v6741_v28 = vadd.f32 %v6740_v20, %v6739_v21 }
0x2480   :  { %v5858_v4 = vadd.f32 %v6741_v28, %v5817_v43 }
0x2494   :  { %v6758_v19 = vpop.f32.mrf.mxu1 }
0x2496   :  { %v6759_v14 = vpop.f32.mrf.mxu1 }
0x2497   :  { %v6780_v50 = vpop.f32.mrf.mxu0  ;;  %v6760_v26 = vadd.f32 %v6759_v14, %v6758_v19 }
0x2498   :  { %v6761_v60 = vpop.f32.mrf.mxu1 }
0x2499   :  { %v6781_v13 = vpop.f32.mrf.mxu0  ;;  %v5896_v41 = vadd.f32 %v6760_v26, %v5855_v44 }
0x249a   :  { %v6762_v11 = vpop.f32.mrf.mxu1  ;;  %v6782_v12 = vadd.f32 %v6781_v13, %v6780_v50 }
0x249b   :  { %v6783_v31 = vpop.f32.mrf.mxu0  ;;  %v6763_v32 = vadd.f32 %v6762_v11, %v6761_v60 }
0x249c   :  { %v5937_v39 = vadd.f32 %v6782_v12, %v5896_v41 }
0x249d   :  { %v6784_v56 = vpop.f32.mrf.mxu0  ;;  %v5899_v29 = vadd.f32 %v6763_v32, %v5858_v4 }
0x249e   :  { %v6785_v2 = vadd.f32 %v6784_v56, %v6783_v31 }
0x24a0   :  { %v5940_v55 = vadd.f32 %v6785_v2, %v5899_v29 }
0x24b4   :  { %v6802_v6 = vpop.f32.mrf.mxu1 }
0x24b6   :  { %v6803_v18 = vpop.f32.mrf.mxu1 }
0x24b7   :  { %v6824_v27 = vpop.f32.mrf.mxu0  ;;  %v6804_v61 = vadd.f32 %v6803_v18, %v6802_v6 }
0x24b8   :  { %v6805_v59 = vpop.f32.mrf.mxu1 }
0x24b9   :  { %v5978_v62 = vadd.f32 %v6804_v61, %v5937_v39  ;;  %v6825_v23 = vpop.f32.mrf.mxu0 }
0x24ba   :  { %v6826_v9 = vadd.f32 %v6825_v23, %v6824_v27  ;;  %v6806_v58 = vpop.f32.mrf.mxu1 }
0x24bb   :  { %v6827_v52 = vpop.f32.mrf.mxu0  ;;  %v6807_v63 = vadd.f32 %v6806_v58, %v6805_v59 }
0x24bc   :  { %v6019_v57 = vadd.f32 %v6826_v9, %v5978_v62 }
0x24bd   :  { %v5981_v51 = vadd.f32 %v6807_v63, %v5940_v55  ;;  %v6828_v25 = vpop.f32.mrf.mxu0 }
0x24be   :  { %v6025_v15 = vsub.f32 0.0, %v6019_v57  ;;  %v6829_v10 = vadd.f32 %v6828_v25, %v6827_v52 }
0x24bf   :  { %v6193_v5 = vpop.f32.mrf.mxu0 }
0x24c0   :  { %v6027_v33 = vmul.f32 1.442695, %v6025_v15  ;;  %v6022_v53 = vadd.f32 %v6829_v10, %v5981_v51 }
0x24c1   :  { %v7311_v36 = vpop.f32.mrf.mxu0 }
0x24c2   :  { %7636 = vpow2.f32 %v6027_v33  ;;  %v6026_v1 = vsub.f32 0.0, %v6022_v53 }
0x24c4   :  { %v6029_v16 = vmul.f32 1.442695, %v6026_v1 }
0x24c6   :  { %7638 = vpow2.f32 %v6029_v16 }
0x24cf   :  { %v7637_v49 = vpop.eup %7636 }
0x24d0   :  { %v6032_v30 = vrot.slane %v7637_v49, 4 }
0x24d2   :  { %v6034_v0 = vadd.f32 %v7637_v49, %v6032_v30 }
0x24d3   :  { %v7639_v42 = vpop.eup %7638 }
0x24d4   :  { %v6035_v35 = vadd.f32 %v7639_v42, %v6034_v0  ;;  %v6037_v48 = vrot.slane %v7639_v42, 4 }
0x24d6   :  { %v6039_v22 = vadd.f32 %v6037_v48, %v6035_v35 }
0x24d8   :  { %v6444_v24 = vadd.f32 -1.0, %v6039_v22 }
0x24da   :  { %7299 = vmatmul.mubr.msk.f32.vlgmr.msra.gmra.mxu1 %vm186_vm2, %v6444_v24 }
0x259a   :  { %v6118_v34 = vpop.f32.mrf.mxu1 }
0x259b   :  { %v6194_v21 = vadd.f32 %v6193_v5, %v6118_v34 }
0x259c   :  { %v7300_v19 = vpop.f32.mrf.mxu1 }
0x259d   :  { %v6198_v38 = vadd.f32 %v6197_v3, %v6194_v21 }
0x259f   :  { %v6447_v40 = vmul.f32 -1.442695, %v6198_v38 }
0x25a1   :  { %7640 = vpow2.f32 %v6447_v40 }
0x25ae   :  { %v7641_v20 = vpop.eup %7640 }
0x25af   :  { %v6202_v14 = vadd.f32 1.0, %v7641_v20 }
0x25b1   :  { %7642 = vrcp.f32 %v6202_v14 }
0x25be   :  { %v7643_v8 = vpop.eup %7642 }
0x25bf   :  { %6206 = vst.msk [vmem:[%s9687_s15] sm:$0xf] %vm6205_vm4, %v7643_v8 }

</bundles_post_ra>
